<compile_context>
chip_gen: v6e
topology: v6e:2x2x1
jax: 0.10.0
libtpu: 0.0.40
codegen_flags: <defaults>
</compile_context>

<pallas_src>
import math
from functools import partial

import jax
import jax.numpy as jnp
from jax.experimental import pallas as pl
from jax.experimental.pallas import tpu as pltpu


# bf16 operands are MXU-native on v5e/v6e/v7x and halve weight DMA/VMEM bytes;
# accumulation is always f32.  Set to jnp.float32 for tight parity with PyTorch.
MATMUL_DTYPE = jnp.bfloat16

LANE = 128  # TPU lane width; used to pad outputs to lane-dense slabs.


# ----------------------------- config -----------------------------
class Config:
    vocab_size = 64
    hidden_size = 32
    num_attention_heads = 4
    intermediate_size = 64
    max_position_embeddings = 32
    type_vocab_size = 2
    num_hidden_layers = 2
    num_labels = 4
    layer_norm_eps = 1e-12
    initializer_range = 0.02
    hidden_dropout_prob = 0.1     # inference -> identity
    norm_type = "layer"           # 'layer' | 'adanorm' | 'scalenorm'
    prenorm = False
    output_attentions = True


CFG = Config()


# ----------------------------- helpers used inside the kernel ------------
def _mm(a, b):
    # Matmul operands in MATMUL_DTYPE, accumulation in f32 (MXU-friendly).
    return jnp.dot(a.astype(MATMUL_DTYPE), b.astype(MATMUL_DTYPE),
                   preferred_element_type=jnp.float32)


def _layer_norm(x, g, b, eps):
    mu = jnp.mean(x, axis=-1, keepdims=True)
    var = jnp.mean((x - mu) ** 2, axis=-1, keepdims=True)
    return (x - mu) * jax.lax.rsqrt(var + eps) * g + b


def _ada_norm(x, adanorm_scale, eps):
    # Matches the reference AdaNorm (torch.std is unbiased, ddof=1).
    n = x.shape[-1]
    mu = jnp.mean(x, axis=-1, keepdims=True)
    var = jnp.sum((x - mu) ** 2, axis=-1, keepdims=True) / (n - 1)
    std = jnp.sqrt(var)
    xc = x - mu
    mu2 = jnp.mean(xc, axis=-1, keepdims=True)
    gra = (1.0 / 10.0) * (xc - mu2) / (std + eps)
    out = (xc - xc * gra) / (std + eps)
    return out * adanorm_scale


def _scale_norm(x, scale, eps):
    # TODO(synk): ScaleNorm's scale is a learnable scalar in the reference; here it
    # is its init value sqrt(H) (no checkpoint loading in this script).
    nrm = jnp.sqrt(jnp.sum(x * x, axis=-1, keepdims=True))
    nrm = jnp.maximum(nrm, eps)
    return x * (scale / nrm)


def _gelu(x):
    # TODO(synk): exact erf-GELU (HF BertIntermediate default); tanh approximation
    # is used for robust Mosaic lowering.
    c = math.sqrt(2.0 / math.pi)
    return 0.5 * x * (1.0 + jnp.tanh(c * (x + 0.044715 * x * x * x)))


# ----------------------------- fused kernel -----------------------------
def fused_forward_kernel(
    emb_ref, mask_ref,
    eg_ref, eb_ref,
    wqkv_ref, bqkv_ref, wo_ref, bo_ref, g1_ref, b1_ref,
    wi_ref, bi_ref, w2_ref, b2_ref, g2_ref, b2n_ref,
    wp_ref, bp_ref, wc_ref, bc_ref,
    logits_ref, attn_ref=None,
    *, B, S, L, nh, dh, H, eps, norm_type, prenorm, sn_scale, store_attn, att_lane,
):
    BS = B * S
    G = nh * B   # fused head*batch axis for attention einsums (g = head*B + batch)

    # ---- embeddings: word+pos+tok summed in the wrapper; BertLayerNorm here ----
    x = _layer_norm(emb_ref[...], eg_ref[...], eb_ref[...], eps)        # (BS, H)

    # additive mask, replicated over heads once (hoisted out of the layer loop)
    mask_g = jnp.concatenate([mask_ref[...]] * nh, axis=0)              # (G, 1, S)

    if store_attn and att_lane > S:
        attn_pad = jnp.zeros((G, S, att_lane - S), jnp.float32)         # hoisted once

    def norm(v, g, b):
        if norm_type == "layer":
            return _layer_norm(v, g, b, eps)
        elif norm_type == "adanorm":
            return _ada_norm(v, 0.3, eps)          # 0.3 hard-coded as in reference
        else:                                      # scalenorm (ScaleNorm eps 1e-5)
            return _scale_norm(v, sn_scale, 1e-5)

    inv_sqrt_dh = 1.0 / math.sqrt(dh)

    # L=2: static unroll is fine.  TODO(synk): switch to lax.fori_loop / a layer
    # grid axis once L grows beyond a handful (register pressure / VMEM residency).
    for l in range(L):
        g1, b1 = g1_ref[l], b1_ref[l]
        g2, b2n = g2_ref[l], b2n_ref[l]

        # ---- self-attention block ----
        residual = x
        h = norm(x, g1, b1) if prenorm else x

        qkv = _mm(h, wqkv_ref[l]) + bqkv_ref[l]                         # (BS, 3H) fused QKV

        def split_heads(off):
            # (BS, H)-slice of qkv -> (G, S, dh); the reshapes only regroup the
            # sublane dim at (8,128)-tile boundaries (lane dim unchanged).
            return jnp.concatenate(
                [qkv[:, off + n * dh: off + (n + 1) * dh].reshape(B, S, dh)
                 for n in range(nh)], axis=0)

        qh = split_heads(0) * inv_sqrt_dh           # scale Q, not the (G,S,S) scores
        kh = split_heads(H)
        vh = split_heads(2 * H)

        s = jnp.einsum("gqd,gkd->gqk",
                       qh.astype(MATMUL_DTYPE), kh.astype(MATMUL_DTYPE),
                       preferred_element_type=jnp.float32)              # (G, S, S)
        s = s + mask_g
        s = s - jnp.max(s, axis=-1, keepdims=True)
        p = jnp.exp(s)
        p = p / jnp.sum(p, axis=-1, keepdims=True)                      # exact softmax

        if store_attn:
            # One lane-dense (padded to 128-lane) store per layer.
            slab = p if att_lane == S else jnp.concatenate([p, attn_pad], axis=-1)
            attn_ref[l] = slab                                          # (G, S, att_lane)

        ctx_g = jnp.einsum("gqk,gkd->gqd",
                           p.astype(MATMUL_DTYPE), vh.astype(MATMUL_DTYPE),
                           preferred_element_type=jnp.float32)          # (G, S, dh)
        ctx = jnp.concatenate(
            [ctx_g[n * B:(n + 1) * B].reshape(BS, dh) for n in range(nh)],
            axis=-1)                                                    # (BS, H)

        attn_out = _mm(ctx, wo_ref[l]) + bo_ref[l]
        h1 = attn_out + residual                                        # self_dropout == id
        if not prenorm:
            h1 = norm(h1, g1, b1)

        # ---- feed-forward block ----
        residual = h1
        h2 = norm(h1, g2, b2n) if prenorm else h1
        ff = _gelu(_mm(h2, wi_ref[l]) + bi_ref[l])                      # BertIntermediate
        ff = _mm(ff, w2_ref[l]) + b2_ref[l]
        x = ff + residual                                               # ff_dropout == id
        if not prenorm:
            x = norm(x, g2, b2n)
    # NOTE: matches the reference — no final norm before the pooler (even if prenorm).

    # ---- pooler + classifier epilogue (batched over B, lane-padded logits) ----
    first = jnp.concatenate([x[b * S: b * S + 1, :] for b in range(B)], axis=0)  # (B, H)
    pooled = jnp.tanh(_mm(first, wp_ref[...]) + bp_ref[...])
    logits_ref[...] = _mm(pooled, wc_ref[...]) + bc_ref[...]            # (B, NL_pad)


# ----------------------------- wrapper -----------------------------
def run_model(emb2d, mask3d, weights, cfg, B, S):
    H = cfg.hidden_size
    L = cfg.num_hidden_layers
    nh = cfg.num_attention_heads
    dh = H // nh
    G = nh * B
    att_lane = ((S + LANE - 1) // LANE) * LANE
    nl_pad = weights[-1].shape[-1]          # lane-padded classifier width

    kernel = partial(
        fused_forward_kernel,
        B=B, S=S, L=L, nh=nh, dh=dh, H=H,
        eps=cfg.layer_norm_eps,
        norm_type=cfg.norm_type,
        prenorm=cfg.prenorm,
        sn_scale=float(math.sqrt(H)),
        store_attn=cfg.output_attentions,
        att_lane=att_lane,
    )

    def full_spec(a):
        n = a.ndim
        return pl.BlockSpec(a.shape, lambda i, n=n: (0,) * n)

    in_specs = [full_spec(emb2d), full_spec(mask3d)] + [full_spec(w) for w in weights]

    logits_shape = jax.ShapeDtypeStruct((B, nl_pad), jnp.float32)
    logits_spec = pl.BlockSpec((B, nl_pad), lambda i: (0, 0))
    if cfg.output_attentions:
        out_shape = (logits_shape,
                     jax.ShapeDtypeStruct((L, G, S, att_lane), jnp.float32))
        out_specs = (logits_spec,
                     pl.BlockSpec((L, G, S, att_lane), lambda i: (0, 0, 0, 0)))
    else:
        out_shape = logits_shape
        out_specs = logits_spec

    result = pl.pallas_call(
        kernel,
        grid=(1,),   # batch folded into the matmul M dim; single pipelined step.
                     # TODO(synk): on v7x use grid=(2,) "parallel" over batch halves.
        in_specs=in_specs,
        out_specs=out_specs,
        out_shape=out_shape,
        compiler_params=pltpu.CompilerParams(
            dimension_semantics=("arbitrary",),
            vmem_limit_bytes=32 * 1024 * 1024),
    )(emb2d, mask3d, *weights)

    if cfg.output_attentions:
        return result[0], result[1]
    return result, None


# ----------------------------- parameters -----------------------------
def init_params(cfg, key):
    H, I = cfg.hidden_size, cfg.intermediate_size
    V, P, T, NL = (cfg.vocab_size, cfg.max_position_embeddings,
                   cfg.type_vocab_size, cfg.num_labels)
    std = cfg.initializer_range
    n_keys = 5 + 6 * cfg.num_hidden_layers
    keys = iter(jax.random.split(key, n_keys))

    def nrm(shape):
        return jax.random.normal(next(keys), shape, jnp.float32) * std

    z = lambda s: jnp.zeros(s, jnp.float32)
    o = lambda s: jnp.ones(s, jnp.float32)

    params = {
        # padding_idx=0 rows zero-initialized, matching nn.Embedding(padding_idx=0)
        "word_emb": nrm((V, H)).at[0].set(0.0),
        "pos_emb": nrm((P, H)).at[0].set(0.0),
        "tok_emb": nrm((T, H)).at[0].set(0.0),
        "emb_ln_g": o((1, H)),
        "emb_ln_b": z((1, H)),
        "pool_w": nrm((H, H)),
        "pool_b": z((1, H)),
        "cls_w": nrm((H, NL)),
        "cls_b": z((1, NL)),
        "layers": [],
    }
    for _ in range(cfg.num_hidden_layers):
        params["layers"].append({
            "wq": nrm((H, H)), "bq": z((1, H)),
            "wk": nrm((H, H)), "bk": z((1, H)),
            "wv": nrm((H, H)), "bv": z((1, H)),
            "wo": nrm((H, H)), "bo": z((1, H)),
            "g1": o((1, H)), "b1": z((1, H)),     # attention_norm (used if 'layer')
            "wi": nrm((H, I)), "bi": z((1, I)),   # BertIntermediate
            "w2": nrm((I, H)), "b2": z((1, H)),
            "g2": o((1, H)), "b2n": z((1, H)),    # ff_norm
        })
    return params


def stack_layer_params(params, cfg):
    """Fuse Q/K/V into one (H,3H) weight, stack all per-layer tensors along a
    leading layer axis, cast matmul weights to MATMUL_DTYPE (bf16), and lane-pad
    the classifier to 128 output features (sliced back in the wrapper)."""
    Ls = params["layers"]
    md = MATMUL_DTYPE
    st = lambda name: jnp.stack([l[name] for l in Ls], axis=0)
    wqkv = jnp.stack(
        [jnp.concatenate([l["wq"], l["wk"], l["wv"]], axis=1) for l in Ls],
        axis=0).astype(md)
    bqkv = jnp.stack(
        [jnp.concatenate([l["bq"], l["bk"], l["bv"]], axis=1) for l in Ls], axis=0)

    H, NL = cfg.hidden_size, cfg.num_labels
    nl_pad = ((NL + LANE - 1) // LANE) * LANE
    cls_w = jnp.zeros((H, nl_pad), jnp.float32).at[:, :NL].set(params["cls_w"]).astype(md)
    cls_b = jnp.zeros((1, nl_pad), jnp.float32).at[:, :NL].set(params["cls_b"])

    return [
        params["emb_ln_g"], params["emb_ln_b"],
        wqkv, bqkv,
        st("wo").astype(md), st("bo"), st("g1"), st("b1"),
        st("wi").astype(md), st("bi"), st("w2").astype(md), st("b2"),
        st("g2"), st("b2n"),
        params["pool_w"].astype(md), params["pool_b"],
        cls_w, cls_b,
    ]


# ----------------------------- forward -----------------------------
def forward(params, input_ids, token_type_ids, attention_mask, cfg):
    B, S = input_ids.shape
    H = cfg.hidden_size
    L = cfg.num_hidden_layers
    nh = cfg.num_attention_heads

    # Glue: data-dependent embedding gathers stay in plain JAX; summed once.
    pos_ids = jnp.arange(S, dtype=jnp.int32)
    emb = (params["word_emb"][input_ids]
           + params["pos_emb"][pos_ids][None, :, :]
           + params["tok_emb"][token_type_ids])                       # (B,S,H)
    emb2d = emb.reshape(B * S, H)                                     # batch folded into M

    # top-level mask transform: (1 - mask) * -10000 -> additive (B,1,S)
    mask3d = ((1.0 - attention_mask.astype(jnp.float32)) * -10000.0)[:, None, :]

    weights = stack_layer_params(params, cfg)
    logits_pad, attn_slab = run_model(emb2d, mask3d, weights, cfg, B, S)
    logits = logits_pad[:, :cfg.num_labels]

    if attn_slab is None:
        return logits, tuple()

    # attn_slab: (L, nh*B, S, att_lane) with g = head*B + batch; unpad + reorder
    att = attn_slab[:, :, :, :S].reshape(L, nh, B, S, S)
    all_attentions = tuple(jnp.transpose(att[l], (1, 0, 2, 3)) for l in range(L))
    return logits, all_attentions


# ----------------------------- main -----------------------------
if __name__ == "__main__":
    cfg = CFG
    B, S = 2, 8

    key = jax.random.PRNGKey(0)
    k_param, k_ids, k_tok = jax.random.split(key, 3)

    params = init_params(cfg, k_param)

    input_ids = jax.random.randint(k_ids, (B, S), 1, cfg.vocab_size, dtype=jnp.int32)
    token_type_ids = jax.random.randint(k_tok, (B, S), 0, cfg.type_vocab_size,
                                        dtype=jnp.int32)
    attention_mask = jnp.ones((B, S), jnp.float32).at[1, -2:].set(0.0)  # pad last 2 of ex. 1

    logits, attentions = forward(params, input_ids, token_type_ids, attention_mask, cfg)
    jax.block_until_ready(logits)
    for a in attentions:
        jax.block_until_ready(a)

    assert logits.shape == (B, cfg.num_labels)
    assert len(attentions) == cfg.num_hidden_layers
    assert attentions[0].shape == (B, cfg.num_attention_heads, S, S)
    assert bool(jnp.all(jnp.isfinite(logits)))
    for a in attentions:
        assert bool(jnp.all(jnp.isfinite(a)))

    print("KERNEL_OK")
</pallas_src>

<mosaic_0001>
module attributes {stable_mosaic.version = 11 : i64} {
  func.func @fused_forward_kernel(%arg0: i32, %arg1: memref<16x32xf32, #tpu.memory_space<vmem>>, %arg2: memref<2x1x8xf32, #tpu.memory_space<vmem>>, %arg3: memref<1x32xf32, #tpu.memory_space<vmem>>, %arg4: memref<1x32xf32, #tpu.memory_space<vmem>>, %arg5: memref<2x32x96xbf16, #tpu.memory_space<vmem>>, %arg6: memref<2x1x96xf32, #tpu.memory_space<vmem>>, %arg7: memref<2x32x32xbf16, #tpu.memory_space<vmem>>, %arg8: memref<2x1x32xf32, #tpu.memory_space<vmem>>, %arg9: memref<2x1x32xf32, #tpu.memory_space<vmem>>, %arg10: memref<2x1x32xf32, #tpu.memory_space<vmem>>, %arg11: memref<2x32x64xbf16, #tpu.memory_space<vmem>>, %arg12: memref<2x1x64xf32, #tpu.memory_space<vmem>>, %arg13: memref<2x64x32xbf16, #tpu.memory_space<vmem>>, %arg14: memref<2x1x32xf32, #tpu.memory_space<vmem>>, %arg15: memref<2x1x32xf32, #tpu.memory_space<vmem>>, %arg16: memref<2x1x32xf32, #tpu.memory_space<vmem>>, %arg17: memref<32x32xbf16, #tpu.memory_space<vmem>>, %arg18: memref<1x32xf32, #tpu.memory_space<vmem>>, %arg19: memref<32x128xbf16, #tpu.memory_space<vmem>>, %arg20: memref<1x128xf32, #tpu.memory_space<vmem>>, %arg21: memref<2x128xf32, #tpu.memory_space<vmem>>, %arg22: memref<2x8x8x128xf32, #tpu.memory_space<vmem>>) attributes {dimension_semantics = [#tpu.dimension_semantics<arbitrary>], iteration_bounds = array<i64: 1>, scalar_prefetch = 0 : i64, scratch_operands = 0 : i64, tpu.core_type = #tpu.core_type<tc>, window_params = [{pipeline_mode = #tpu.pipeline_mode<synchronous>, transform_indices = @transform_0, window_bounds = array<i64: 16, 32>}, {pipeline_mode = #tpu.pipeline_mode<synchronous>, transform_indices = @transform_1, window_bounds = array<i64: 2, 1, 8>}, {pipeline_mode = #tpu.pipeline_mode<synchronous>, transform_indices = @transform_2, window_bounds = array<i64: 1, 32>}, {pipeline_mode = #tpu.pipeline_mode<synchronous>, transform_indices = @transform_3, window_bounds = array<i64: 1, 32>}, {pipeline_mode = #tpu.pipeline_mode<synchronous>, transform_indices = @transform_4, window_bounds = array<i64: 2, 32, 96>}, {pipeline_mode = #tpu.pipeline_mode<synchronous>, transform_indices = @transform_5, window_bounds = array<i64: 2, 1, 96>}, {pipeline_mode = #tpu.pipeline_mode<synchronous>, transform_indices = @transform_6, window_bounds = array<i64: 2, 32, 32>}, {pipeline_mode = #tpu.pipeline_mode<synchronous>, transform_indices = @transform_7, window_bounds = array<i64: 2, 1, 32>}, {pipeline_mode = #tpu.pipeline_mode<synchronous>, transform_indices = @transform_8, window_bounds = array<i64: 2, 1, 32>}, {pipeline_mode = #tpu.pipeline_mode<synchronous>, transform_indices = @transform_9, window_bounds = array<i64: 2, 1, 32>}, {pipeline_mode = #tpu.pipeline_mode<synchronous>, transform_indices = @transform_10, window_bounds = array<i64: 2, 32, 64>}, {pipeline_mode = #tpu.pipeline_mode<synchronous>, transform_indices = @transform_11, window_bounds = array<i64: 2, 1, 64>}, {pipeline_mode = #tpu.pipeline_mode<synchronous>, transform_indices = @transform_12, window_bounds = array<i64: 2, 64, 32>}, {pipeline_mode = #tpu.pipeline_mode<synchronous>, transform_indices = @transform_13, window_bounds = array<i64: 2, 1, 32>}, {pipeline_mode = #tpu.pipeline_mode<synchronous>, transform_indices = @transform_14, window_bounds = array<i64: 2, 1, 32>}, {pipeline_mode = #tpu.pipeline_mode<synchronous>, transform_indices = @transform_15, window_bounds = array<i64: 2, 1, 32>}, {pipeline_mode = #tpu.pipeline_mode<synchronous>, transform_indices = @transform_16, window_bounds = array<i64: 32, 32>}, {pipeline_mode = #tpu.pipeline_mode<synchronous>, transform_indices = @transform_17, window_bounds = array<i64: 1, 32>}, {pipeline_mode = #tpu.pipeline_mode<synchronous>, transform_indices = @transform_18, window_bounds = array<i64: 32, 128>}, {pipeline_mode = #tpu.pipeline_mode<synchronous>, transform_indices = @transform_19, window_bounds = array<i64: 1, 128>}, {pipeline_mode = #tpu.pipeline_mode<synchronous>, transform_indices = @transform_20, window_bounds = array<i64: 2, 128>}, {pipeline_mode = #tpu.pipeline_mode<synchronous>, transform_indices = @transform_21, window_bounds = array<i64: 2, 8, 8, 128>}]} {
    %c0 = arith.constant 0 : index
    %c0_0 = arith.constant 0 : index
    %0 = vector.load %arg1[%c0, %c0_0] : memref<16x32xf32, #tpu.memory_space<vmem>>, vector<16x32xf32>
    %c0_1 = arith.constant 0 : index
    %c0_2 = arith.constant 0 : index
    %1 = vector.load %arg3[%c0_1, %c0_2] : memref<1x32xf32, #tpu.memory_space<vmem>>, vector<1x32xf32>
    %c0_3 = arith.constant 0 : index
    %c0_4 = arith.constant 0 : index
    %2 = vector.load %arg4[%c0_3, %c0_4] : memref<1x32xf32, #tpu.memory_space<vmem>>, vector<1x32xf32>
    %cst = arith.constant dense<0.000000e+00> : vector<16xf32>
    %3 = vector.multi_reduction <add>, %0, %cst [1] : vector<16x32xf32> to vector<16xf32>
    %4 = vector.shape_cast %3 : vector<16xf32> to vector<16x1xf32>
    %cst_5 = arith.constant 3.200000e+01 : f32
    %5 = vector.broadcast %cst_5 : f32 to vector<16x1xf32>
    %6 = arith.divf %4, %5 : vector<16x1xf32>
    %7 = vector.broadcast %6 : vector<16x1xf32> to vector<16x32xf32>
    %8 = arith.subf %0, %7 : vector<16x32xf32>
    %9 = arith.mulf %8, %8 : vector<16x32xf32>
    %cst_6 = arith.constant dense<0.000000e+00> : vector<16xf32>
    %10 = vector.multi_reduction <add>, %9, %cst_6 [1] : vector<16x32xf32> to vector<16xf32>
    %11 = vector.shape_cast %10 : vector<16xf32> to vector<16x1xf32>
    %cst_7 = arith.constant 3.200000e+01 : f32
    %12 = vector.broadcast %cst_7 : f32 to vector<16x1xf32>
    %13 = arith.divf %11, %12 : vector<16x1xf32>
    %14 = vector.broadcast %6 : vector<16x1xf32> to vector<16x32xf32>
    %15 = arith.subf %0, %14 : vector<16x32xf32>
    %cst_8 = arith.constant 9.99999996E-13 : f32
    %16 = vector.broadcast %cst_8 : f32 to vector<16x1xf32>
    %17 = arith.addf %13, %16 : vector<16x1xf32>
    %18 = math.rsqrt %17 : vector<16x1xf32>
    %19 = vector.broadcast %18 : vector<16x1xf32> to vector<16x32xf32>
    %20 = arith.mulf %15, %19 : vector<16x32xf32>
    %21 = vector.broadcast %1 : vector<1x32xf32> to vector<16x32xf32>
    %22 = arith.mulf %20, %21 : vector<16x32xf32>
    %23 = vector.broadcast %2 : vector<1x32xf32> to vector<16x32xf32>
    %24 = arith.addf %22, %23 : vector<16x32xf32>
    %c0_9 = arith.constant 0 : index
    %c0_10 = arith.constant 0 : index
    %c0_11 = arith.constant 0 : index
    %25 = vector.load %arg2[%c0_9, %c0_10, %c0_11] : memref<2x1x8xf32, #tpu.memory_space<vmem>>, vector<2x1x8xf32>
    %26 = tpu.concatenate %25, %25, %25, %25 in 0 : vector<2x1x8xf32>, vector<2x1x8xf32>, vector<2x1x8xf32>, vector<2x1x8xf32> -> vector<8x1x8xf32>
    %cst_12 = arith.constant 0.000000e+00 : f32
    %27 = vector.broadcast %cst_12 : f32 to vector<8x8x120xf32>
    %c0_13 = arith.constant 0 : index
    %c0_14 = arith.constant 0 : index
    %c0_15 = arith.constant 0 : index
    %28 = vector.load %arg9[%c0_13, %c0_14, %c0_15] : memref<2x1x32xf32, #tpu.memory_space<vmem>>, vector<1x1x32xf32>
    %29 = vector.shape_cast %28 : vector<1x1x32xf32> to vector<1x32xf32>
    %c0_16 = arith.constant 0 : index
    %c0_17 = arith.constant 0 : index
    %c0_18 = arith.constant 0 : index
    %30 = vector.load %arg10[%c0_16, %c0_17, %c0_18] : memref<2x1x32xf32, #tpu.memory_space<vmem>>, vector<1x1x32xf32>
    %31 = vector.shape_cast %30 : vector<1x1x32xf32> to vector<1x32xf32>
    %c0_19 = arith.constant 0 : index
    %c0_20 = arith.constant 0 : index
    %c0_21 = arith.constant 0 : index
    %32 = vector.load %arg15[%c0_19, %c0_20, %c0_21] : memref<2x1x32xf32, #tpu.memory_space<vmem>>, vector<1x1x32xf32>
    %33 = vector.shape_cast %32 : vector<1x1x32xf32> to vector<1x32xf32>
    %c0_22 = arith.constant 0 : index
    %c0_23 = arith.constant 0 : index
    %c0_24 = arith.constant 0 : index
    %34 = vector.load %arg16[%c0_22, %c0_23, %c0_24] : memref<2x1x32xf32, #tpu.memory_space<vmem>>, vector<1x1x32xf32>
    %35 = vector.shape_cast %34 : vector<1x1x32xf32> to vector<1x32xf32>
    %c0_25 = arith.constant 0 : index
    %c0_26 = arith.constant 0 : index
    %c0_27 = arith.constant 0 : index
    %36 = vector.load %arg5[%c0_25, %c0_26, %c0_27] : memref<2x32x96xbf16, #tpu.memory_space<vmem>>, vector<1x32x96xbf16>
    %37 = vector.shape_cast %36 : vector<1x32x96xbf16> to vector<32x96xbf16>
    %38 = arith.truncf %24 : vector<16x32xf32> to vector<16x32xbf16>
    %cst_28 = arith.constant dense<0.000000e+00> : vector<16x96xf32>
    %39 = tpu.matmul %38, %37, %cst_28 {dimension_numbers = #tpu.dot_dimension_numbers<[1], [0], [0], [1], [0, 0, 1, 1], [], []>} : vector<16x32xbf16>, vector<32x96xbf16>, vector<16x96xf32> -> vector<16x96xf32>
    %c0_29 = arith.constant 0 : index
    %c0_30 = arith.constant 0 : index
    %c0_31 = arith.constant 0 : index
    %40 = vector.load %arg6[%c0_29, %c0_30, %c0_31] : memref<2x1x96xf32, #tpu.memory_space<vmem>>, vector<1x1x96xf32>
    %41 = vector.shape_cast %40 : vector<1x1x96xf32> to vector<1x96xf32>
    %42 = vector.broadcast %41 : vector<1x96xf32> to vector<16x96xf32>
    %43 = arith.addf %39, %42 : vector<16x96xf32>
    %44 = vector.extract_strided_slice %43 {offsets = [0, 0], sizes = [16, 8], strides = [1, 1]} : vector<16x96xf32> to vector<16x8xf32>
    %45 = vector.shape_cast %44 : vector<16x8xf32> to vector<2x8x8xf32>
    %46 = vector.extract_strided_slice %43 {offsets = [0, 8], sizes = [16, 8], strides = [1, 1]} : vector<16x96xf32> to vector<16x8xf32>
    %47 = vector.shape_cast %46 : vector<16x8xf32> to vector<2x8x8xf32>
    %48 = vector.extract_strided_slice %43 {offsets = [0, 16], sizes = [16, 8], strides = [1, 1]} : vector<16x96xf32> to vector<16x8xf32>
    %49 = vector.shape_cast %48 : vector<16x8xf32> to vector<2x8x8xf32>
    %50 = vector.extract_strided_slice %43 {offsets = [0, 24], sizes = [16, 8], strides = [1, 1]} : vector<16x96xf32> to vector<16x8xf32>
    %51 = vector.shape_cast %50 : vector<16x8xf32> to vector<2x8x8xf32>
    %52 = tpu.concatenate %45, %47, %49, %51 in 0 : vector<2x8x8xf32>, vector<2x8x8xf32>, vector<2x8x8xf32>, vector<2x8x8xf32> -> vector<8x8x8xf32>
    %cst_32 = arith.constant 0.353553385 : f32
    %53 = vector.broadcast %cst_32 : f32 to vector<8x8x8xf32>
    %54 = arith.mulf %52, %53 : vector<8x8x8xf32>
    %55 = vector.extract_strided_slice %43 {offsets = [0, 32], sizes = [16, 8], strides = [1, 1]} : vector<16x96xf32> to vector<16x8xf32>
    %56 = vector.shape_cast %55 : vector<16x8xf32> to vector<2x8x8xf32>
    %57 = vector.extract_strided_slice %43 {offsets = [0, 40], sizes = [16, 8], strides = [1, 1]} : vector<16x96xf32> to vector<16x8xf32>
    %58 = vector.shape_cast %57 : vector<16x8xf32> to vector<2x8x8xf32>
    %59 = vector.extract_strided_slice %43 {offsets = [0, 48], sizes = [16, 8], strides = [1, 1]} : vector<16x96xf32> to vector<16x8xf32>
    %60 = vector.shape_cast %59 : vector<16x8xf32> to vector<2x8x8xf32>
    %61 = vector.extract_strided_slice %43 {offsets = [0, 56], sizes = [16, 8], strides = [1, 1]} : vector<16x96xf32> to vector<16x8xf32>
    %62 = vector.shape_cast %61 : vector<16x8xf32> to vector<2x8x8xf32>
    %63 = tpu.concatenate %56, %58, %60, %62 in 0 : vector<2x8x8xf32>, vector<2x8x8xf32>, vector<2x8x8xf32>, vector<2x8x8xf32> -> vector<8x8x8xf32>
    %64 = vector.extract_strided_slice %43 {offsets = [0, 64], sizes = [16, 8], strides = [1, 1]} : vector<16x96xf32> to vector<16x8xf32>
    %65 = vector.shape_cast %64 : vector<16x8xf32> to vector<2x8x8xf32>
    %66 = vector.extract_strided_slice %43 {offsets = [0, 72], sizes = [16, 8], strides = [1, 1]} : vector<16x96xf32> to vector<16x8xf32>
    %67 = vector.shape_cast %66 : vector<16x8xf32> to vector<2x8x8xf32>
    %68 = vector.extract_strided_slice %43 {offsets = [0, 80], sizes = [16, 8], strides = [1, 1]} : vector<16x96xf32> to vector<16x8xf32>
    %69 = vector.shape_cast %68 : vector<16x8xf32> to vector<2x8x8xf32>
    %70 = vector.extract_strided_slice %43 {offsets = [0, 88], sizes = [16, 8], strides = [1, 1]} : vector<16x96xf32> to vector<16x8xf32>
    %71 = vector.shape_cast %70 : vector<16x8xf32> to vector<2x8x8xf32>
    %72 = tpu.concatenate %65, %67, %69, %71 in 0 : vector<2x8x8xf32>, vector<2x8x8xf32>, vector<2x8x8xf32>, vector<2x8x8xf32> -> vector<8x8x8xf32>
    %73 = arith.truncf %54 : vector<8x8x8xf32> to vector<8x8x8xbf16>
    %74 = arith.truncf %63 : vector<8x8x8xf32> to vector<8x8x8xbf16>
    "tpu.trace_start"() <{level = 10 : i32, message = "gqd,gkd->gqk"}> : () -> ()
    %cst_33 = arith.constant dense<0.000000e+00> : vector<8x8x8xf32>
    %75 = tpu.matmul %73, %74, %cst_33 {dimension_numbers = #tpu.dot_dimension_numbers<[2], [2], [1], [1], [0, 0, 0, 1, 1, 1], [0], [0]>} : vector<8x8x8xbf16>, vector<8x8x8xbf16>, vector<8x8x8xf32> -> vector<8x8x8xf32>
    "tpu.trace_stop"() : () -> ()
    %76 = vector.broadcast %26 : vector<8x1x8xf32> to vector<8x8x8xf32>
    %77 = arith.addf %75, %76 : vector<8x8x8xf32>
    %cst_34 = arith.constant dense<0xFF800000> : vector<8x8xf32>
    %78 = vector.multi_reduction <maximumf>, %77, %cst_34 [2] : vector<8x8x8xf32> to vector<8x8xf32>
    %79 = vector.shape_cast %78 : vector<8x8xf32> to vector<8x8x1xf32>
    %80 = vector.broadcast %79 : vector<8x8x1xf32> to vector<8x8x8xf32>
    %81 = arith.subf %77, %80 : vector<8x8x8xf32>
    %82 = math.exp %81 : vector<8x8x8xf32>
    %cst_35 = arith.constant dense<0.000000e+00> : vector<8x8xf32>
    %83 = vector.multi_reduction <add>, %82, %cst_35 [2] : vector<8x8x8xf32> to vector<8x8xf32>
    %84 = vector.shape_cast %83 : vector<8x8xf32> to vector<8x8x1xf32>
    %85 = vector.broadcast %84 : vector<8x8x1xf32> to vector<8x8x8xf32>
    %86 = arith.divf %82, %85 : vector<8x8x8xf32>
    %87 = tpu.concatenate %86, %27 in 2 : vector<8x8x8xf32>, vector<8x8x120xf32> -> vector<8x8x128xf32>
    %c0_36 = arith.constant 0 : index
    %c0_37 = arith.constant 0 : index
    %c0_38 = arith.constant 0 : index
    %c0_39 = arith.constant 0 : index
    %88 = vector.load %arg22[%c0_36, %c0_37, %c0_38, %c0_39] : memref<2x8x8x128xf32, #tpu.memory_space<vmem>>, vector<1x8x8x128xf32>
    %89 = vector.shape_cast %88 : vector<1x8x8x128xf32> to vector<8x8x128xf32>
    %90 = vector.shape_cast %87 : vector<8x8x128xf32> to vector<1x8x8x128xf32>
    tpu.vector_store %arg22[%c0_36, %c0_37, %c0_38, %c0_39], %90 {strides = array<i32>} : memref<2x8x8x128xf32, #tpu.memory_space<vmem>>, vector<1x8x8x128xf32>,
    %91 = arith.truncf %86 : vector<8x8x8xf32> to vector<8x8x8xbf16>
    %92 = arith.truncf %72 : vector<8x8x8xf32> to vector<8x8x8xbf16>
    "tpu.trace_start"() <{level = 10 : i32, message = "gqk,gkd->gqd"}> : () -> ()
    %cst_40 = arith.constant dense<0.000000e+00> : vector<8x8x8xf32>
    %93 = tpu.matmul %91, %92, %cst_40 {dimension_numbers = #tpu.dot_dimension_numbers<[2], [1], [1], [2], [0, 0, 0, 1, 1, 2], [0], [0]>} : vector<8x8x8xbf16>, vector<8x8x8xbf16>, vector<8x8x8xf32> -> vector<8x8x8xf32>
    "tpu.trace_stop"() : () -> ()
    %94 = vector.extract_strided_slice %93 {offsets = [0, 0, 0], sizes = [2, 8, 8], strides = [1, 1, 1]} : vector<8x8x8xf32> to vector<2x8x8xf32>
    %95 = vector.shape_cast %94 : vector<2x8x8xf32> to vector<16x8xf32>
    %96 = vector.extract_strided_slice %93 {offsets = [2, 0, 0], sizes = [2, 8, 8], strides = [1, 1, 1]} : vector<8x8x8xf32> to vector<2x8x8xf32>
    %97 = vector.shape_cast %96 : vector<2x8x8xf32> to vector<16x8xf32>
    %98 = vector.extract_strided_slice %93 {offsets = [4, 0, 0], sizes = [2, 8, 8], strides = [1, 1, 1]} : vector<8x8x8xf32> to vector<2x8x8xf32>
    %99 = vector.shape_cast %98 : vector<2x8x8xf32> to vector<16x8xf32>
    %100 = vector.extract_strided_slice %93 {offsets = [6, 0, 0], sizes = [2, 8, 8], strides = [1, 1, 1]} : vector<8x8x8xf32> to vector<2x8x8xf32>
    %101 = vector.shape_cast %100 : vector<2x8x8xf32> to vector<16x8xf32>
    %102 = tpu.concatenate %95, %97, %99, %101 in 1 : vector<16x8xf32>, vector<16x8xf32>, vector<16x8xf32>, vector<16x8xf32> -> vector<16x32xf32>
    %c0_41 = arith.constant 0 : index
    %c0_42 = arith.constant 0 : index
    %c0_43 = arith.constant 0 : index
    %103 = vector.load %arg7[%c0_41, %c0_42, %c0_43] : memref<2x32x32xbf16, #tpu.memory_space<vmem>>, vector<1x32x32xbf16>
    %104 = vector.shape_cast %103 : vector<1x32x32xbf16> to vector<32x32xbf16>
    %105 = arith.truncf %102 : vector<16x32xf32> to vector<16x32xbf16>
    %cst_44 = arith.constant dense<0.000000e+00> : vector<16x32xf32>
    %106 = tpu.matmul %105, %104, %cst_44 {dimension_numbers = #tpu.dot_dimension_numbers<[1], [0], [0], [1], [0, 0, 1, 1], [], []>} : vector<16x32xbf16>, vector<32x32xbf16>, vector<16x32xf32> -> vector<16x32xf32>
    %c0_45 = arith.constant 0 : index
    %c0_46 = arith.constant 0 : index
    %c0_47 = arith.constant 0 : index
    %107 = vector.load %arg8[%c0_45, %c0_46, %c0_47] : memref<2x1x32xf32, #tpu.memory_space<vmem>>, vector<1x1x32xf32>
    %108 = vector.shape_cast %107 : vector<1x1x32xf32> to vector<1x32xf32>
    %109 = vector.broadcast %108 : vector<1x32xf32> to vector<16x32xf32>
    %110 = arith.addf %106, %109 : vector<16x32xf32>
    %111 = arith.addf %110, %24 : vector<16x32xf32>
    %cst_48 = arith.constant dense<0.000000e+00> : vector<16xf32>
    %112 = vector.multi_reduction <add>, %111, %cst_48 [1] : vector<16x32xf32> to vector<16xf32>
    %113 = vector.shape_cast %112 : vector<16xf32> to vector<16x1xf32>
    %cst_49 = arith.constant 3.200000e+01 : f32
    %114 = vector.broadcast %cst_49 : f32 to vector<16x1xf32>
    %115 = arith.divf %113, %114 : vector<16x1xf32>
    %116 = vector.broadcast %115 : vector<16x1xf32> to vector<16x32xf32>
    %117 = arith.subf %111, %116 : vector<16x32xf32>
    %118 = arith.mulf %117, %117 : vector<16x32xf32>
    %cst_50 = arith.constant dense<0.000000e+00> : vector<16xf32>
    %119 = vector.multi_reduction <add>, %118, %cst_50 [1] : vector<16x32xf32> to vector<16xf32>
    %120 = vector.shape_cast %119 : vector<16xf32> to vector<16x1xf32>
    %cst_51 = arith.constant 3.200000e+01 : f32
    %121 = vector.broadcast %cst_51 : f32 to vector<16x1xf32>
    %122 = arith.divf %120, %121 : vector<16x1xf32>
    %123 = vector.broadcast %115 : vector<16x1xf32> to vector<16x32xf32>
    %124 = arith.subf %111, %123 : vector<16x32xf32>
    %cst_52 = arith.constant 9.99999996E-13 : f32
    %125 = vector.broadcast %cst_52 : f32 to vector<16x1xf32>
    %126 = arith.addf %122, %125 : vector<16x1xf32>
    %127 = math.rsqrt %126 : vector<16x1xf32>
    %128 = vector.broadcast %127 : vector<16x1xf32> to vector<16x32xf32>
    %129 = arith.mulf %124, %128 : vector<16x32xf32>
    %130 = vector.broadcast %29 : vector<1x32xf32> to vector<16x32xf32>
    %131 = arith.mulf %129, %130 : vector<16x32xf32>
    %132 = vector.broadcast %31 : vector<1x32xf32> to vector<16x32xf32>
    %133 = arith.addf %131, %132 : vector<16x32xf32>
    %c0_53 = arith.constant 0 : index
    %c0_54 = arith.constant 0 : index
    %c0_55 = arith.constant 0 : index
    %134 = vector.load %arg11[%c0_53, %c0_54, %c0_55] : memref<2x32x64xbf16, #tpu.memory_space<vmem>>, vector<1x32x64xbf16>
    %135 = vector.shape_cast %134 : vector<1x32x64xbf16> to vector<32x64xbf16>
    %136 = arith.truncf %133 : vector<16x32xf32> to vector<16x32xbf16>
    %cst_56 = arith.constant dense<0.000000e+00> : vector<16x64xf32>
    %137 = tpu.matmul %136, %135, %cst_56 {dimension_numbers = #tpu.dot_dimension_numbers<[1], [0], [0], [1], [0, 0, 1, 1], [], []>} : vector<16x32xbf16>, vector<32x64xbf16>, vector<16x64xf32> -> vector<16x64xf32>
    %c0_57 = arith.constant 0 : index
    %c0_58 = arith.constant 0 : index
    %c0_59 = arith.constant 0 : index
    %138 = vector.load %arg12[%c0_57, %c0_58, %c0_59] : memref<2x1x64xf32, #tpu.memory_space<vmem>>, vector<1x1x64xf32>
    %139 = vector.shape_cast %138 : vector<1x1x64xf32> to vector<1x64xf32>
    %140 = vector.broadcast %139 : vector<1x64xf32> to vector<16x64xf32>
    %141 = arith.addf %137, %140 : vector<16x64xf32>
    %cst_60 = arith.constant 5.000000e-01 : f32
    %142 = vector.broadcast %cst_60 : f32 to vector<16x64xf32>
    %143 = arith.mulf %142, %141 : vector<16x64xf32>
    %cst_61 = arith.constant 4.471500e-02 : f32
    %144 = vector.broadcast %cst_61 : f32 to vector<16x64xf32>
    %145 = arith.mulf %144, %141 : vector<16x64xf32>
    %146 = arith.mulf %145, %141 : vector<16x64xf32>
    %147 = arith.mulf %146, %141 : vector<16x64xf32>
    %148 = arith.addf %141, %147 : vector<16x64xf32>
    %cst_62 = arith.constant 0.797884583 : f32
    %149 = vector.broadcast %cst_62 : f32 to vector<16x64xf32>
    %150 = arith.mulf %149, %148 : vector<16x64xf32>
    %151 = math.tanh %150 : vector<16x64xf32>
    %cst_63 = arith.constant 1.000000e+00 : f32
    %152 = vector.broadcast %cst_63 : f32 to vector<16x64xf32>
    %153 = arith.addf %152, %151 : vector<16x64xf32>
    %154 = arith.mulf %143, %153 : vector<16x64xf32>
    %c0_64 = arith.constant 0 : index
    %c0_65 = arith.constant 0 : index
    %c0_66 = arith.constant 0 : index
    %155 = vector.load %arg13[%c0_64, %c0_65, %c0_66] : memref<2x64x32xbf16, #tpu.memory_space<vmem>>, vector<1x64x32xbf16>
    %156 = vector.shape_cast %155 : vector<1x64x32xbf16> to vector<64x32xbf16>
    %157 = arith.truncf %154 : vector<16x64xf32> to vector<16x64xbf16>
    %cst_67 = arith.constant dense<0.000000e+00> : vector<16x32xf32>
    %158 = tpu.matmul %157, %156, %cst_67 {dimension_numbers = #tpu.dot_dimension_numbers<[1], [0], [0], [1], [0, 0, 1, 1], [], []>} : vector<16x64xbf16>, vector<64x32xbf16>, vector<16x32xf32> -> vector<16x32xf32>
    %c0_68 = arith.constant 0 : index
    %c0_69 = arith.constant 0 : index
    %c0_70 = arith.constant 0 : index
    %159 = vector.load %arg14[%c0_68, %c0_69, %c0_70] : memref<2x1x32xf32, #tpu.memory_space<vmem>>, vector<1x1x32xf32>
    %160 = vector.shape_cast %159 : vector<1x1x32xf32> to vector<1x32xf32>
    %161 = vector.broadcast %160 : vector<1x32xf32> to vector<16x32xf32>
    %162 = arith.addf %158, %161 : vector<16x32xf32>
    %163 = arith.addf %162, %133 : vector<16x32xf32>
    %cst_71 = arith.constant dense<0.000000e+00> : vector<16xf32>
    %164 = vector.multi_reduction <add>, %163, %cst_71 [1] : vector<16x32xf32> to vector<16xf32>
    %165 = vector.shape_cast %164 : vector<16xf32> to vector<16x1xf32>
    %cst_72 = arith.constant 3.200000e+01 : f32
    %166 = vector.broadcast %cst_72 : f32 to vector<16x1xf32>
    %167 = arith.divf %165, %166 : vector<16x1xf32>
    %168 = vector.broadcast %167 : vector<16x1xf32> to vector<16x32xf32>
    %169 = arith.subf %163, %168 : vector<16x32xf32>
    %170 = arith.mulf %169, %169 : vector<16x32xf32>
    %cst_73 = arith.constant dense<0.000000e+00> : vector<16xf32>
    %171 = vector.multi_reduction <add>, %170, %cst_73 [1] : vector<16x32xf32> to vector<16xf32>
    %172 = vector.shape_cast %171 : vector<16xf32> to vector<16x1xf32>
    %cst_74 = arith.constant 3.200000e+01 : f32
    %173 = vector.broadcast %cst_74 : f32 to vector<16x1xf32>
    %174 = arith.divf %172, %173 : vector<16x1xf32>
    %175 = vector.broadcast %167 : vector<16x1xf32> to vector<16x32xf32>
    %176 = arith.subf %163, %175 : vector<16x32xf32>
    %cst_75 = arith.constant 9.99999996E-13 : f32
    %177 = vector.broadcast %cst_75 : f32 to vector<16x1xf32>
    %178 = arith.addf %174, %177 : vector<16x1xf32>
    %179 = math.rsqrt %178 : vector<16x1xf32>
    %180 = vector.broadcast %179 : vector<16x1xf32> to vector<16x32xf32>
    %181 = arith.mulf %176, %180 : vector<16x32xf32>
    %182 = vector.broadcast %33 : vector<1x32xf32> to vector<16x32xf32>
    %183 = arith.mulf %181, %182 : vector<16x32xf32>
    %184 = vector.broadcast %35 : vector<1x32xf32> to vector<16x32xf32>
    %185 = arith.addf %183, %184 : vector<16x32xf32>
    %c1 = arith.constant 1 : index
    %c0_76 = arith.constant 0 : index
    %c0_77 = arith.constant 0 : index
    %186 = vector.load %arg9[%c1, %c0_76, %c0_77] : memref<2x1x32xf32, #tpu.memory_space<vmem>>, vector<1x1x32xf32>
    %187 = vector.shape_cast %186 : vector<1x1x32xf32> to vector<1x32xf32>
    %c1_78 = arith.constant 1 : index
    %c0_79 = arith.constant 0 : index
    %c0_80 = arith.constant 0 : index
    %188 = vector.load %arg10[%c1_78, %c0_79, %c0_80] : memref<2x1x32xf32, #tpu.memory_space<vmem>>, vector<1x1x32xf32>
    %189 = vector.shape_cast %188 : vector<1x1x32xf32> to vector<1x32xf32>
    %c1_81 = arith.constant 1 : index
    %c0_82 = arith.constant 0 : index
    %c0_83 = arith.constant 0 : index
    %190 = vector.load %arg15[%c1_81, %c0_82, %c0_83] : memref<2x1x32xf32, #tpu.memory_space<vmem>>, vector<1x1x32xf32>
    %191 = vector.shape_cast %190 : vector<1x1x32xf32> to vector<1x32xf32>
    %c1_84 = arith.constant 1 : index
    %c0_85 = arith.constant 0 : index
    %c0_86 = arith.constant 0 : index
    %192 = vector.load %arg16[%c1_84, %c0_85, %c0_86] : memref<2x1x32xf32, #tpu.memory_space<vmem>>, vector<1x1x32xf32>
    %193 = vector.shape_cast %192 : vector<1x1x32xf32> to vector<1x32xf32>
    %c1_87 = arith.constant 1 : index
    %c0_88 = arith.constant 0 : index
    %c0_89 = arith.constant 0 : index
    %194 = vector.load %arg5[%c1_87, %c0_88, %c0_89] : memref<2x32x96xbf16, #tpu.memory_space<vmem>>, vector<1x32x96xbf16>
    %195 = vector.shape_cast %194 : vector<1x32x96xbf16> to vector<32x96xbf16>
    %196 = arith.truncf %185 : vector<16x32xf32> to vector<16x32xbf16>
    %cst_90 = arith.constant dense<0.000000e+00> : vector<16x96xf32>
    %197 = tpu.matmul %196, %195, %cst_90 {dimension_numbers = #tpu.dot_dimension_numbers<[1], [0], [0], [1], [0, 0, 1, 1], [], []>} : vector<16x32xbf16>, vector<32x96xbf16>, vector<16x96xf32> -> vector<16x96xf32>
    %c1_91 = arith.constant 1 : index
    %c0_92 = arith.constant 0 : index
    %c0_93 = arith.constant 0 : index
    %198 = vector.load %arg6[%c1_91, %c0_92, %c0_93] : memref<2x1x96xf32, #tpu.memory_space<vmem>>, vector<1x1x96xf32>
    %199 = vector.shape_cast %198 : vector<1x1x96xf32> to vector<1x96xf32>
    %200 = vector.broadcast %199 : vector<1x96xf32> to vector<16x96xf32>
    %201 = arith.addf %197, %200 : vector<16x96xf32>
    %202 = vector.extract_strided_slice %201 {offsets = [0, 0], sizes = [16, 8], strides = [1, 1]} : vector<16x96xf32> to vector<16x8xf32>
    %203 = vector.shape_cast %202 : vector<16x8xf32> to vector<2x8x8xf32>
    %204 = vector.extract_strided_slice %201 {offsets = [0, 8], sizes = [16, 8], strides = [1, 1]} : vector<16x96xf32> to vector<16x8xf32>
    %205 = vector.shape_cast %204 : vector<16x8xf32> to vector<2x8x8xf32>
    %206 = vector.extract_strided_slice %201 {offsets = [0, 16], sizes = [16, 8], strides = [1, 1]} : vector<16x96xf32> to vector<16x8xf32>
    %207 = vector.shape_cast %206 : vector<16x8xf32> to vector<2x8x8xf32>
    %208 = vector.extract_strided_slice %201 {offsets = [0, 24], sizes = [16, 8], strides = [1, 1]} : vector<16x96xf32> to vector<16x8xf32>
    %209 = vector.shape_cast %208 : vector<16x8xf32> to vector<2x8x8xf32>
    %210 = tpu.concatenate %203, %205, %207, %209 in 0 : vector<2x8x8xf32>, vector<2x8x8xf32>, vector<2x8x8xf32>, vector<2x8x8xf32> -> vector<8x8x8xf32>
    %cst_94 = arith.constant 0.353553385 : f32
    %211 = vector.broadcast %cst_94 : f32 to vector<8x8x8xf32>
    %212 = arith.mulf %210, %211 : vector<8x8x8xf32>
    %213 = vector.extract_strided_slice %201 {offsets = [0, 32], sizes = [16, 8], strides = [1, 1]} : vector<16x96xf32> to vector<16x8xf32>
    %214 = vector.shape_cast %213 : vector<16x8xf32> to vector<2x8x8xf32>
    %215 = vector.extract_strided_slice %201 {offsets = [0, 40], sizes = [16, 8], strides = [1, 1]} : vector<16x96xf32> to vector<16x8xf32>
    %216 = vector.shape_cast %215 : vector<16x8xf32> to vector<2x8x8xf32>
    %217 = vector.extract_strided_slice %201 {offsets = [0, 48], sizes = [16, 8], strides = [1, 1]} : vector<16x96xf32> to vector<16x8xf32>
    %218 = vector.shape_cast %217 : vector<16x8xf32> to vector<2x8x8xf32>
    %219 = vector.extract_strided_slice %201 {offsets = [0, 56], sizes = [16, 8], strides = [1, 1]} : vector<16x96xf32> to vector<16x8xf32>
    %220 = vector.shape_cast %219 : vector<16x8xf32> to vector<2x8x8xf32>
    %221 = tpu.concatenate %214, %216, %218, %220 in 0 : vector<2x8x8xf32>, vector<2x8x8xf32>, vector<2x8x8xf32>, vector<2x8x8xf32> -> vector<8x8x8xf32>
    %222 = vector.extract_strided_slice %201 {offsets = [0, 64], sizes = [16, 8], strides = [1, 1]} : vector<16x96xf32> to vector<16x8xf32>
    %223 = vector.shape_cast %222 : vector<16x8xf32> to vector<2x8x8xf32>
    %224 = vector.extract_strided_slice %201 {offsets = [0, 72], sizes = [16, 8], strides = [1, 1]} : vector<16x96xf32> to vector<16x8xf32>
    %225 = vector.shape_cast %224 : vector<16x8xf32> to vector<2x8x8xf32>
    %226 = vector.extract_strided_slice %201 {offsets = [0, 80], sizes = [16, 8], strides = [1, 1]} : vector<16x96xf32> to vector<16x8xf32>
    %227 = vector.shape_cast %226 : vector<16x8xf32> to vector<2x8x8xf32>
    %228 = vector.extract_strided_slice %201 {offsets = [0, 88], sizes = [16, 8], strides = [1, 1]} : vector<16x96xf32> to vector<16x8xf32>
    %229 = vector.shape_cast %228 : vector<16x8xf32> to vector<2x8x8xf32>
    %230 = tpu.concatenate %223, %225, %227, %229 in 0 : vector<2x8x8xf32>, vector<2x8x8xf32>, vector<2x8x8xf32>, vector<2x8x8xf32> -> vector<8x8x8xf32>
    %231 = arith.truncf %212 : vector<8x8x8xf32> to vector<8x8x8xbf16>
    %232 = arith.truncf %221 : vector<8x8x8xf32> to vector<8x8x8xbf16>
    "tpu.trace_start"() <{level = 10 : i32, message = "gqd,gkd->gqk"}> : () -> ()
    %cst_95 = arith.constant dense<0.000000e+00> : vector<8x8x8xf32>
    %233 = tpu.matmul %231, %232, %cst_95 {dimension_numbers = #tpu.dot_dimension_numbers<[2], [2], [1], [1], [0, 0, 0, 1, 1, 1], [0], [0]>} : vector<8x8x8xbf16>, vector<8x8x8xbf16>, vector<8x8x8xf32> -> vector<8x8x8xf32>
    "tpu.trace_stop"() : () -> ()
    %234 = vector.broadcast %26 : vector<8x1x8xf32> to vector<8x8x8xf32>
    %235 = arith.addf %233, %234 : vector<8x8x8xf32>
    %cst_96 = arith.constant dense<0xFF800000> : vector<8x8xf32>
    %236 = vector.multi_reduction <maximumf>, %235, %cst_96 [2] : vector<8x8x8xf32> to vector<8x8xf32>
    %237 = vector.shape_cast %236 : vector<8x8xf32> to vector<8x8x1xf32>
    %238 = vector.broadcast %237 : vector<8x8x1xf32> to vector<8x8x8xf32>
    %239 = arith.subf %235, %238 : vector<8x8x8xf32>
    %240 = math.exp %239 : vector<8x8x8xf32>
    %cst_97 = arith.constant dense<0.000000e+00> : vector<8x8xf32>
    %241 = vector.multi_reduction <add>, %240, %cst_97 [2] : vector<8x8x8xf32> to vector<8x8xf32>
    %242 = vector.shape_cast %241 : vector<8x8xf32> to vector<8x8x1xf32>
    %243 = vector.broadcast %242 : vector<8x8x1xf32> to vector<8x8x8xf32>
    %244 = arith.divf %240, %243 : vector<8x8x8xf32>
    %245 = tpu.concatenate %244, %27 in 2 : vector<8x8x8xf32>, vector<8x8x120xf32> -> vector<8x8x128xf32>
    %c1_98 = arith.constant 1 : index
    %c0_99 = arith.constant 0 : index
    %c0_100 = arith.constant 0 : index
    %c0_101 = arith.constant 0 : index
    %246 = vector.load %arg22[%c1_98, %c0_99, %c0_100, %c0_101] : memref<2x8x8x128xf32, #tpu.memory_space<vmem>>, vector<1x8x8x128xf32>
    %247 = vector.shape_cast %246 : vector<1x8x8x128xf32> to vector<8x8x128xf32>
    %248 = vector.shape_cast %245 : vector<8x8x128xf32> to vector<1x8x8x128xf32>
    tpu.vector_store %arg22[%c1_98, %c0_99, %c0_100, %c0_101], %248 {strides = array<i32>} : memref<2x8x8x128xf32, #tpu.memory_space<vmem>>, vector<1x8x8x128xf32>,
    %249 = arith.truncf %244 : vector<8x8x8xf32> to vector<8x8x8xbf16>
    %250 = arith.truncf %230 : vector<8x8x8xf32> to vector<8x8x8xbf16>
    "tpu.trace_start"() <{level = 10 : i32, message = "gqk,gkd->gqd"}> : () -> ()
    %cst_102 = arith.constant dense<0.000000e+00> : vector<8x8x8xf32>
    %251 = tpu.matmul %249, %250, %cst_102 {dimension_numbers = #tpu.dot_dimension_numbers<[2], [1], [1], [2], [0, 0, 0, 1, 1, 2], [0], [0]>} : vector<8x8x8xbf16>, vector<8x8x8xbf16>, vector<8x8x8xf32> -> vector<8x8x8xf32>
    "tpu.trace_stop"() : () -> ()
    %252 = vector.extract_strided_slice %251 {offsets = [0, 0, 0], sizes = [2, 8, 8], strides = [1, 1, 1]} : vector<8x8x8xf32> to vector<2x8x8xf32>
    %253 = vector.shape_cast %252 : vector<2x8x8xf32> to vector<16x8xf32>
    %254 = vector.extract_strided_slice %251 {offsets = [2, 0, 0], sizes = [2, 8, 8], strides = [1, 1, 1]} : vector<8x8x8xf32> to vector<2x8x8xf32>
    %255 = vector.shape_cast %254 : vector<2x8x8xf32> to vector<16x8xf32>
    %256 = vector.extract_strided_slice %251 {offsets = [4, 0, 0], sizes = [2, 8, 8], strides = [1, 1, 1]} : vector<8x8x8xf32> to vector<2x8x8xf32>
    %257 = vector.shape_cast %256 : vector<2x8x8xf32> to vector<16x8xf32>
    %258 = vector.extract_strided_slice %251 {offsets = [6, 0, 0], sizes = [2, 8, 8], strides = [1, 1, 1]} : vector<8x8x8xf32> to vector<2x8x8xf32>
    %259 = vector.shape_cast %258 : vector<2x8x8xf32> to vector<16x8xf32>
    %260 = tpu.concatenate %253, %255, %257, %259 in 1 : vector<16x8xf32>, vector<16x8xf32>, vector<16x8xf32>, vector<16x8xf32> -> vector<16x32xf32>
    %c1_103 = arith.constant 1 : index
    %c0_104 = arith.constant 0 : index
    %c0_105 = arith.constant 0 : index
    %261 = vector.load %arg7[%c1_103, %c0_104, %c0_105] : memref<2x32x32xbf16, #tpu.memory_space<vmem>>, vector<1x32x32xbf16>
    %262 = vector.shape_cast %261 : vector<1x32x32xbf16> to vector<32x32xbf16>
    %263 = arith.truncf %260 : vector<16x32xf32> to vector<16x32xbf16>
    %cst_106 = arith.constant dense<0.000000e+00> : vector<16x32xf32>
    %264 = tpu.matmul %263, %262, %cst_106 {dimension_numbers = #tpu.dot_dimension_numbers<[1], [0], [0], [1], [0, 0, 1, 1], [], []>} : vector<16x32xbf16>, vector<32x32xbf16>, vector<16x32xf32> -> vector<16x32xf32>
    %c1_107 = arith.constant 1 : index
    %c0_108 = arith.constant 0 : index
    %c0_109 = arith.constant 0 : index
    %265 = vector.load %arg8[%c1_107, %c0_108, %c0_109] : memref<2x1x32xf32, #tpu.memory_space<vmem>>, vector<1x1x32xf32>
    %266 = vector.shape_cast %265 : vector<1x1x32xf32> to vector<1x32xf32>
    %267 = vector.broadcast %266 : vector<1x32xf32> to vector<16x32xf32>
    %268 = arith.addf %264, %267 : vector<16x32xf32>
    %269 = arith.addf %268, %185 : vector<16x32xf32>
    %cst_110 = arith.constant dense<0.000000e+00> : vector<16xf32>
    %270 = vector.multi_reduction <add>, %269, %cst_110 [1] : vector<16x32xf32> to vector<16xf32>
    %271 = vector.shape_cast %270 : vector<16xf32> to vector<16x1xf32>
    %cst_111 = arith.constant 3.200000e+01 : f32
    %272 = vector.broadcast %cst_111 : f32 to vector<16x1xf32>
    %273 = arith.divf %271, %272 : vector<16x1xf32>
    %274 = vector.broadcast %273 : vector<16x1xf32> to vector<16x32xf32>
    %275 = arith.subf %269, %274 : vector<16x32xf32>
    %276 = arith.mulf %275, %275 : vector<16x32xf32>
    %cst_112 = arith.constant dense<0.000000e+00> : vector<16xf32>
    %277 = vector.multi_reduction <add>, %276, %cst_112 [1] : vector<16x32xf32> to vector<16xf32>
    %278 = vector.shape_cast %277 : vector<16xf32> to vector<16x1xf32>
    %cst_113 = arith.constant 3.200000e+01 : f32
    %279 = vector.broadcast %cst_113 : f32 to vector<16x1xf32>
    %280 = arith.divf %278, %279 : vector<16x1xf32>
    %281 = vector.broadcast %273 : vector<16x1xf32> to vector<16x32xf32>
    %282 = arith.subf %269, %281 : vector<16x32xf32>
    %cst_114 = arith.constant 9.99999996E-13 : f32
    %283 = vector.broadcast %cst_114 : f32 to vector<16x1xf32>
    %284 = arith.addf %280, %283 : vector<16x1xf32>
    %285 = math.rsqrt %284 : vector<16x1xf32>
    %286 = vector.broadcast %285 : vector<16x1xf32> to vector<16x32xf32>
    %287 = arith.mulf %282, %286 : vector<16x32xf32>
    %288 = vector.broadcast %187 : vector<1x32xf32> to vector<16x32xf32>
    %289 = arith.mulf %287, %288 : vector<16x32xf32>
    %290 = vector.broadcast %189 : vector<1x32xf32> to vector<16x32xf32>
    %291 = arith.addf %289, %290 : vector<16x32xf32>
    %c1_115 = arith.constant 1 : index
    %c0_116 = arith.constant 0 : index
    %c0_117 = arith.constant 0 : index
    %292 = vector.load %arg11[%c1_115, %c0_116, %c0_117] : memref<2x32x64xbf16, #tpu.memory_space<vmem>>, vector<1x32x64xbf16>
    %293 = vector.shape_cast %292 : vector<1x32x64xbf16> to vector<32x64xbf16>
    %294 = arith.truncf %291 : vector<16x32xf32> to vector<16x32xbf16>
    %cst_118 = arith.constant dense<0.000000e+00> : vector<16x64xf32>
    %295 = tpu.matmul %294, %293, %cst_118 {dimension_numbers = #tpu.dot_dimension_numbers<[1], [0], [0], [1], [0, 0, 1, 1], [], []>} : vector<16x32xbf16>, vector<32x64xbf16>, vector<16x64xf32> -> vector<16x64xf32>
    %c1_119 = arith.constant 1 : index
    %c0_120 = arith.constant 0 : index
    %c0_121 = arith.constant 0 : index
    %296 = vector.load %arg12[%c1_119, %c0_120, %c0_121] : memref<2x1x64xf32, #tpu.memory_space<vmem>>, vector<1x1x64xf32>
    %297 = vector.shape_cast %296 : vector<1x1x64xf32> to vector<1x64xf32>
    %298 = vector.broadcast %297 : vector<1x64xf32> to vector<16x64xf32>
    %299 = arith.addf %295, %298 : vector<16x64xf32>
    %cst_122 = arith.constant 5.000000e-01 : f32
    %300 = vector.broadcast %cst_122 : f32 to vector<16x64xf32>
    %301 = arith.mulf %300, %299 : vector<16x64xf32>
    %cst_123 = arith.constant 4.471500e-02 : f32
    %302 = vector.broadcast %cst_123 : f32 to vector<16x64xf32>
    %303 = arith.mulf %302, %299 : vector<16x64xf32>
    %304 = arith.mulf %303, %299 : vector<16x64xf32>
    %305 = arith.mulf %304, %299 : vector<16x64xf32>
    %306 = arith.addf %299, %305 : vector<16x64xf32>
    %cst_124 = arith.constant 0.797884583 : f32
    %307 = vector.broadcast %cst_124 : f32 to vector<16x64xf32>
    %308 = arith.mulf %307, %306 : vector<16x64xf32>
    %309 = math.tanh %308 : vector<16x64xf32>
    %cst_125 = arith.constant 1.000000e+00 : f32
    %310 = vector.broadcast %cst_125 : f32 to vector<16x64xf32>
    %311 = arith.addf %310, %309 : vector<16x64xf32>
    %312 = arith.mulf %301, %311 : vector<16x64xf32>
    %c1_126 = arith.constant 1 : index
    %c0_127 = arith.constant 0 : index
    %c0_128 = arith.constant 0 : index
    %313 = vector.load %arg13[%c1_126, %c0_127, %c0_128] : memref<2x64x32xbf16, #tpu.memory_space<vmem>>, vector<1x64x32xbf16>
    %314 = vector.shape_cast %313 : vector<1x64x32xbf16> to vector<64x32xbf16>
    %315 = arith.truncf %312 : vector<16x64xf32> to vector<16x64xbf16>
    %cst_129 = arith.constant dense<0.000000e+00> : vector<16x32xf32>
    %316 = tpu.matmul %315, %314, %cst_129 {dimension_numbers = #tpu.dot_dimension_numbers<[1], [0], [0], [1], [0, 0, 1, 1], [], []>} : vector<16x64xbf16>, vector<64x32xbf16>, vector<16x32xf32> -> vector<16x32xf32>
    %c1_130 = arith.constant 1 : index
    %c0_131 = arith.constant 0 : index
    %c0_132 = arith.constant 0 : index
    %317 = vector.load %arg14[%c1_130, %c0_131, %c0_132] : memref<2x1x32xf32, #tpu.memory_space<vmem>>, vector<1x1x32xf32>
    %318 = vector.shape_cast %317 : vector<1x1x32xf32> to vector<1x32xf32>
    %319 = vector.broadcast %318 : vector<1x32xf32> to vector<16x32xf32>
    %320 = arith.addf %316, %319 : vector<16x32xf32>
    %321 = arith.addf %320, %291 : vector<16x32xf32>
    %cst_133 = arith.constant dense<0.000000e+00> : vector<16xf32>
    %322 = vector.multi_reduction <add>, %321, %cst_133 [1] : vector<16x32xf32> to vector<16xf32>
    %323 = vector.shape_cast %322 : vector<16xf32> to vector<16x1xf32>
    %cst_134 = arith.constant 3.200000e+01 : f32
    %324 = vector.broadcast %cst_134 : f32 to vector<16x1xf32>
    %325 = arith.divf %323, %324 : vector<16x1xf32>
    %326 = vector.broadcast %325 : vector<16x1xf32> to vector<16x32xf32>
    %327 = arith.subf %321, %326 : vector<16x32xf32>
    %328 = arith.mulf %327, %327 : vector<16x32xf32>
    %cst_135 = arith.constant dense<0.000000e+00> : vector<16xf32>
    %329 = vector.multi_reduction <add>, %328, %cst_135 [1] : vector<16x32xf32> to vector<16xf32>
    %330 = vector.shape_cast %329 : vector<16xf32> to vector<16x1xf32>
    %cst_136 = arith.constant 3.200000e+01 : f32
    %331 = vector.broadcast %cst_136 : f32 to vector<16x1xf32>
    %332 = arith.divf %330, %331 : vector<16x1xf32>
    %333 = vector.broadcast %325 : vector<16x1xf32> to vector<16x32xf32>
    %334 = arith.subf %321, %333 : vector<16x32xf32>
    %cst_137 = arith.constant 9.99999996E-13 : f32
    %335 = vector.broadcast %cst_137 : f32 to vector<16x1xf32>
    %336 = arith.addf %332, %335 : vector<16x1xf32>
    %337 = math.rsqrt %336 : vector<16x1xf32>
    %338 = vector.broadcast %337 : vector<16x1xf32> to vector<16x32xf32>
    %339 = arith.mulf %334, %338 : vector<16x32xf32>
    %340 = vector.broadcast %191 : vector<1x32xf32> to vector<16x32xf32>
    %341 = arith.mulf %339, %340 : vector<16x32xf32>
    %342 = vector.broadcast %193 : vector<1x32xf32> to vector<16x32xf32>
    %343 = arith.addf %341, %342 : vector<16x32xf32>
    %344 = vector.extract_strided_slice %343 {offsets = [0, 0], sizes = [1, 32], strides = [1, 1]} : vector<16x32xf32> to vector<1x32xf32>
    %345 = vector.extract_strided_slice %343 {offsets = [8, 0], sizes = [1, 32], strides = [1, 1]} : vector<16x32xf32> to vector<1x32xf32>
    %346 = tpu.concatenate %344, %345 in 0 : vector<1x32xf32>, vector<1x32xf32> -> vector<2x32xf32>
    %c0_138 = arith.constant 0 : index
    %c0_139 = arith.constant 0 : index
    %347 = vector.load %arg17[%c0_138, %c0_139] : memref<32x32xbf16, #tpu.memory_space<vmem>>, vector<32x32xbf16>
    %348 = arith.truncf %346 : vector<2x32xf32> to vector<2x32xbf16>
    %cst_140 = arith.constant dense<0.000000e+00> : vector<2x32xf32>
    %349 = tpu.matmul %348, %347, %cst_140 {dimension_numbers = #tpu.dot_dimension_numbers<[1], [0], [0], [1], [0, 0, 1, 1], [], []>} : vector<2x32xbf16>, vector<32x32xbf16>, vector<2x32xf32> -> vector<2x32xf32>
    %c0_141 = arith.constant 0 : index
    %c0_142 = arith.constant 0 : index
    %350 = vector.load %arg18[%c0_141, %c0_142] : memref<1x32xf32, #tpu.memory_space<vmem>>, vector<1x32xf32>
    %351 = vector.broadcast %350 : vector<1x32xf32> to vector<2x32xf32>
    %352 = arith.addf %349, %351 : vector<2x32xf32>
    %353 = math.tanh %352 : vector<2x32xf32>
    %c0_143 = arith.constant 0 : index
    %c0_144 = arith.constant 0 : index
    %354 = vector.load %arg19[%c0_143, %c0_144] : memref<32x128xbf16, #tpu.memory_space<vmem>>, vector<32x128xbf16>
    %355 = arith.truncf %353 : vector<2x32xf32> to vector<2x32xbf16>
    %cst_145 = arith.constant dense<0.000000e+00> : vector<2x128xf32>
    %356 = tpu.matmul %355, %354, %cst_145 {dimension_numbers = #tpu.dot_dimension_numbers<[1], [0], [0], [1], [0, 0, 1, 1], [], []>} : vector<2x32xbf16>, vector<32x128xbf16>, vector<2x128xf32> -> vector<2x128xf32>
    %c0_146 = arith.constant 0 : index
    %c0_147 = arith.constant 0 : index
    %357 = vector.load %arg20[%c0_146, %c0_147] : memref<1x128xf32, #tpu.memory_space<vmem>>, vector<1x128xf32>
    %358 = vector.broadcast %357 : vector<1x128xf32> to vector<2x128xf32>
    %359 = arith.addf %356, %358 : vector<2x128xf32>
    %c0_148 = arith.constant 0 : index
    %c0_149 = arith.constant 0 : index
    %360 = vector.load %arg21[%c0_148, %c0_149] : memref<2x128xf32, #tpu.memory_space<vmem>>, vector<2x128xf32>
    tpu.vector_store %arg21[%c0_148, %c0_149], %359 {strides = array<i32>} : memref<2x128xf32, #tpu.memory_space<vmem>>, vector<2x128xf32>,
    return
  }
  func.func @transform_0(%arg0: i32) -> (i32, i32) {
    %c0_i32 = arith.constant 0 : i32
    %c0_i32_0 = arith.constant 0 : i32
    %c0_i32_1 = arith.constant 0 : i32
    return %c0_i32, %c0_i32_0 : i32, i32
  }
  func.func @transform_1(%arg0: i32) -> (i32, i32, i32) {
    %c0_i32 = arith.constant 0 : i32
    %c0_i32_0 = arith.constant 0 : i32
    %c0_i32_1 = arith.constant 0 : i32
    %c0_i32_2 = arith.constant 0 : i32
    return %c0_i32, %c0_i32_0, %c0_i32_1 : i32, i32, i32
  }
  func.func @transform_2(%arg0: i32) -> (i32, i32) {
    %c0_i32 = arith.constant 0 : i32
    %c0_i32_0 = arith.constant 0 : i32
    %c0_i32_1 = arith.constant 0 : i32
    return %c0_i32, %c0_i32_0 : i32, i32
  }
  func.func @transform_3(%arg0: i32) -> (i32, i32) {
    %c0_i32 = arith.constant 0 : i32
    %c0_i32_0 = arith.constant 0 : i32
    %c0_i32_1 = arith.constant 0 : i32
    return %c0_i32, %c0_i32_0 : i32, i32
  }
  func.func @transform_4(%arg0: i32) -> (i32, i32, i32) {
    %c0_i32 = arith.constant 0 : i32
    %c0_i32_0 = arith.constant 0 : i32
    %c0_i32_1 = arith.constant 0 : i32
    %c0_i32_2 = arith.constant 0 : i32
    return %c0_i32, %c0_i32_0, %c0_i32_1 : i32, i32, i32
  }
  func.func @transform_5(%arg0: i32) -> (i32, i32, i32) {
    %c0_i32 = arith.constant 0 : i32
    %c0_i32_0 = arith.constant 0 : i32
    %c0_i32_1 = arith.constant 0 : i32
    %c0_i32_2 = arith.constant 0 : i32
    return %c0_i32, %c0_i32_0, %c0_i32_1 : i32, i32, i32
  }
  func.func @transform_6(%arg0: i32) -> (i32, i32, i32) {
    %c0_i32 = arith.constant 0 : i32
    %c0_i32_0 = arith.constant 0 : i32
    %c0_i32_1 = arith.constant 0 : i32
    %c0_i32_2 = arith.constant 0 : i32
    return %c0_i32, %c0_i32_0, %c0_i32_1 : i32, i32, i32
  }
  func.func @transform_7(%arg0: i32) -> (i32, i32, i32) {
    %c0_i32 = arith.constant 0 : i32
    %c0_i32_0 = arith.constant 0 : i32
    %c0_i32_1 = arith.constant 0 : i32
    %c0_i32_2 = arith.constant 0 : i32
    return %c0_i32, %c0_i32_0, %c0_i32_1 : i32, i32, i32
  }
  func.func @transform_8(%arg0: i32) -> (i32, i32, i32) {
    %c0_i32 = arith.constant 0 : i32
    %c0_i32_0 = arith.constant 0 : i32
    %c0_i32_1 = arith.constant 0 : i32
    %c0_i32_2 = arith.constant 0 : i32
    return %c0_i32, %c0_i32_0, %c0_i32_1 : i32, i32, i32
  }
  func.func @transform_9(%arg0: i32) -> (i32, i32, i32) {
    %c0_i32 = arith.constant 0 : i32
    %c0_i32_0 = arith.constant 0 : i32
    %c0_i32_1 = arith.constant 0 : i32
    %c0_i32_2 = arith.constant 0 : i32
    return %c0_i32, %c0_i32_0, %c0_i32_1 : i32, i32, i32
  }
  func.func @transform_10(%arg0: i32) -> (i32, i32, i32) {
    %c0_i32 = arith.constant 0 : i32
    %c0_i32_0 = arith.constant 0 : i32
    %c0_i32_1 = arith.constant 0 : i32
    %c0_i32_2 = arith.constant 0 : i32
    return %c0_i32, %c0_i32_0, %c0_i32_1 : i32, i32, i32
  }
  func.func @transform_11(%arg0: i32) -> (i32, i32, i32) {
    %c0_i32 = arith.constant 0 : i32
    %c0_i32_0 = arith.constant 0 : i32
    %c0_i32_1 = arith.constant 0 : i32
    %c0_i32_2 = arith.constant 0 : i32
    return %c0_i32, %c0_i32_0, %c0_i32_1 : i32, i32, i32
  }
  func.func @transform_12(%arg0: i32) -> (i32, i32, i32) {
    %c0_i32 = arith.constant 0 : i32
    %c0_i32_0 = arith.constant 0 : i32
    %c0_i32_1 = arith.constant 0 : i32
    %c0_i32_2 = arith.constant 0 : i32
    return %c0_i32, %c0_i32_0, %c0_i32_1 : i32, i32, i32
  }
  func.func @transform_13(%arg0: i32) -> (i32, i32, i32) {
    %c0_i32 = arith.constant 0 : i32
    %c0_i32_0 = arith.constant 0 : i32
    %c0_i32_1 = arith.constant 0 : i32
    %c0_i32_2 = arith.constant 0 : i32
    return %c0_i32, %c0_i32_0, %c0_i32_1 : i32, i32, i32
  }
  func.func @transform_14(%arg0: i32) -> (i32, i32, i32) {
    %c0_i32 = arith.constant 0 : i32
    %c0_i32_0 = arith.constant 0 : i32
    %c0_i32_1 = arith.constant 0 : i32
    %c0_i32_2 = arith.constant 0 : i32
    return %c0_i32, %c0_i32_0, %c0_i32_1 : i32, i32, i32
  }
  func.func @transform_15(%arg0: i32) -> (i32, i32, i32) {
    %c0_i32 = arith.constant 0 : i32
    %c0_i32_0 = arith.constant 0 : i32
    %c0_i32_1 = arith.constant 0 : i32
    %c0_i32_2 = arith.constant 0 : i32
    return %c0_i32, %c0_i32_0, %c0_i32_1 : i32, i32, i32
  }
  func.func @transform_16(%arg0: i32) -> (i32, i32) {
    %c0_i32 = arith.constant 0 : i32
    %c0_i32_0 = arith.constant 0 : i32
    %c0_i32_1 = arith.constant 0 : i32
    return %c0_i32, %c0_i32_0 : i32, i32
  }
  func.func @transform_17(%arg0: i32) -> (i32, i32) {
    %c0_i32 = arith.constant 0 : i32
    %c0_i32_0 = arith.constant 0 : i32
    %c0_i32_1 = arith.constant 0 : i32
    return %c0_i32, %c0_i32_0 : i32, i32
  }
  func.func @transform_18(%arg0: i32) -> (i32, i32) {
    %c0_i32 = arith.constant 0 : i32
    %c0_i32_0 = arith.constant 0 : i32
    %c0_i32_1 = arith.constant 0 : i32
    return %c0_i32, %c0_i32_0 : i32, i32
  }
  func.func @transform_19(%arg0: i32) -> (i32, i32) {
    %c0_i32 = arith.constant 0 : i32
    %c0_i32_0 = arith.constant 0 : i32
    %c0_i32_1 = arith.constant 0 : i32
    return %c0_i32, %c0_i32_0 : i32, i32
  }
  func.func @transform_20(%arg0: i32) -> (i32, i32) {
    %c0_i32 = arith.constant 0 : i32
    %c0_i32_0 = arith.constant 0 : i32
    %c0_i32_1 = arith.constant 0 : i32
    return %c0_i32, %c0_i32_0 : i32, i32
  }
  func.func @transform_21(%arg0: i32) -> (i32, i32, i32, i32) {
    %c0_i32 = arith.constant 0 : i32
    %c0_i32_0 = arith.constant 0 : i32
    %c0_i32_1 = arith.constant 0 : i32
    %c0_i32_2 = arith.constant 0 : i32
    %c0_i32_3 = arith.constant 0 : i32
    return %c0_i32, %c0_i32_0, %c0_i32_1, %c0_i32_2 : i32, i32, i32, i32
  }
}

</mosaic_0001>

<bundles_post_ra>
// kernel: tpu_custom_call.1
= control target key start
LH: loop header
LB: loop body
LE: loop exit
PB: predicated region body
PF: predicated region fallthrough
CT: control target
= control target key end

     0   :  { %s5011_s0 = inlined_call_operand.hbm [shape: f32[16,32], index: 0, kind: input, shape index: {}]   ;;  %s5012_s1 = inlined_call_operand.hbm [shape: f32[2,1,8], index: 1, kind: input, shape index: {}]   ;;  %s5013_s2 = inlined_call_operand.hbm [shape: f32[1,32], index: 2, kind: input, shape index: {}]   ;;  %s5014_s3 = inlined_call_operand.hbm [shape: f32[1,32], index: 3, kind: input, shape index: {}]   ;;  %s5015_s4 = inlined_call_operand.vmem [shape: bf16[2,32,96], index: 4, kind: input, shape index: {}]   ;;  %s5016_s5 = inlined_call_operand.hbm [shape: f32[2,1,96], index: 5, kind: input, shape index: {}]   ;;  %s5017_s6 = inlined_call_operand.vmem [shape: bf16[2,32,32], index: 6, kind: input, shape index: {}]   ;;  %s5018_s7 = inlined_call_operand.hbm [shape: f32[2,1,32], index: 7, kind: input, shape index: {}]   ;;  %s5019_s8 = inlined_call_operand.hbm [shape: f32[2,1,32], index: 8, kind: input, shape index: {}]   ;;  %s5020_s9 = inlined_call_operand.hbm [shape: f32[2,1,32], index: 9, kind: input, shape index: {}]   ;;  %s5021_s10 = inlined_call_operand.vmem [shape: bf16[2,32,64], index: 10, kind: input, shape index: {}]   ;;  %s5022_s11 = inlined_call_operand.hbm [shape: f32[2,1,64], index: 11, kind: input, shape index: {}]   ;;  %s5023_s12 = inlined_call_operand.vmem [shape: bf16[2,64,32], index: 12, kind: input, shape index: {}]   ;;  %s5024_s13 = inlined_call_operand.hbm [shape: f32[2,1,32], index: 13, kind: input, shape index: {}]   ;;  %s5025_s14 = inlined_call_operand.hbm [shape: f32[2,1,32], index: 14, kind: input, shape index: {}]   ;;  %s5026_s15 = inlined_call_operand.hbm [shape: f32[2,1,32], index: 15, kind: input, shape index: {}]   ;;  %s5027_s16 = inlined_call_operand.vmem [shape: bf16[32,32], index: 16, kind: input, shape index: {}]   ;;  %s5028_s17 = inlined_call_operand.hbm [shape: f32[1,32], index: 17, kind: input, shape index: {}]   ;;  %s5029_s18 = inlined_call_operand.vmem [shape: bf16[32,128], index: 18, kind: input, shape index: {}]   ;;  %s5030_s19 = inlined_call_operand.vmem [shape: f32[1,128], index: 19, kind: input, shape index: {}]   ;;  %s5031_s20 = inlined_call_operand.hbm [shape: f32[2,128], index: 20, kind: output, shape index: {0}]   ;;  %s5032_s21 = inlined_call_operand.hbm [shape: f32[2,8,8,128], index: 21, kind: output, shape index: {1}]  }
   0x1   :  { %5034 = sst [smem:[#allocation35_spill]] %s5011_s0 }
   0x2   :  { %5035 = sst [smem:[#allocation36_spill]] %s5012_s1 }
   0x3   :  { %5036 = sst [smem:[#allocation37_spill]] %s5013_s2 }
   0x4   :  { %5037 = sst [smem:[#allocation38_spill]] %s5014_s3 }
   0x5   :  { %5038 = sst [smem:[#allocation39_spill]] %s5015_s4 }
   0x6   :  { %5039 = sst [smem:[#allocation40_spill]] %s5016_s5 }
   0x7   :  { %27 = vsyncpa [#allocation3], 0 }
   0x8   :  { %28 = vsyncpa [#allocation6], 0 }
   0x9   :  { %29 = vsyncpa [#allocation9], 0 }
   0xa   :  { %30 = vsyncpa [#allocation12], 0 }
   0xb   :  { %31 = vsyncpa [#allocation15], 0 }
   0xc   :  { %32 = vsyncpa [#allocation18], 0 }
   0xd   :  { %33 = vsyncpa [#allocation21], 0 }
   0xe   :  { %34 = vsyncpa [#allocation4], 0 }
   0xf   :  { %35 = vsyncpa [#allocation25], 0  ;;  %s4199_s2 = smov [#allocation5]  }
  0x10   :  { %s53_s25 = sshll.u32 %s4199_s2, 4  ;;  %s54_s25 = int_to_ptr.vmem [resolvable:$true] %s53_s25 }
  0x11   :  { %s3889_s26 = scalar_lea.vmem %s54_s25, 32  ;;  %p3894_p1 = scmp.lt.s32.totalorder %s54_s25, %s54_s25 }
  0x12   :  { %p3890_p0 = scmp.ne.s32.totalorder %s54_s25, %s3889_s26  ;;  %p3895_p2 = scmp.lt.s32.totalorder %s3889_s26, %s3889_s26 }
  0x14   :  { %p3896_p3 = por %p3895_p2, %p3894_p1 }
  0x16   :  { %p3897_p4 = pnand %p3896_p3, %p3890_p0 }
  0x18   :  { %3900 = shalt.err (!%p3897_p4)
}
  0x19   :  { %s4200_s27 = smov 16   ;;  %s4201_s3 = smov 1  }
  0x1a   :  { %s5040_s0 = sld [smem:[#allocation36_spill]]  ;;  %s4202_s4 = smov [#allocation8]  }
  0x1b   :  { %s76_s30 = sshll.u32 %s4202_s4, 4  ;;  %s4203_s5 = smov [#allocation11]   ;;  %s77_s30 = int_to_ptr.vmem [resolvable:$true] %s76_s30 }
  0x1c   :  { %s101_s22 = sshll.u32 %s4203_s5, 4  ;;  %s3909_s23 = scalar_lea.vmem %s77_s30, 16  ;;  %s102_s22 = int_to_ptr.vmem [resolvable:$true] %s101_s22 }
  0x1d   :  { %p3910_p5 = scmp.ne.s32.totalorder %s77_s30, %s3909_s23  ;;  %s3913_s1 = scalar_lea.vmem %s77_s30, 32 }
  0x1e   :  { %p3914_p6 = scmp.lt.s32.totalorder %s77_s30, %s77_s30  ;;  %p3915_p7 = scmp.lt.s32.totalorder %s3913_s1, %s3909_s23 }
  0x20   :  { %59 = dma.hbm_to_vmem [thread:$0]  %s5040_s0, 32, %s54_s25, [#allocation6], %s4200_s27, %s4200_s27, %s4201_s3  }
  0x21   :  { %p3916_p8 = por %p3915_p7, %p3914_p6 }
  0x23   :  { %p3917_p9 = pnand %p3916_p8, %p3910_p5 }
  0x25   :  { %3920 = shalt.err (!%p3917_p9)
}
  0x26   :  { %s5041_s26 = sld [smem:[#allocation38_spill]]  ;;  %s3929_s28 = scalar_lea.vmem %s102_s22, 32 }
  0x27   :  { %p3930_p10 = scmp.ne.s32.totalorder %s102_s22, %s3929_s28  ;;  %p3934_p11 = scmp.lt.s32.totalorder %s102_s22, %s102_s22 }
  0x28   :  { %p3935_p12 = scmp.lt.s32.totalorder %s3929_s28, %s3929_s28 }
  0x2a   :  { %p3936_p13 = por %p3935_p12, %p3934_p11 }
  0x2c   :  { %79 = dma.hbm_to_vmem [thread:$0]  %s5041_s26, 16, %s77_s30, [#allocation9]  }
  0x2d   :  { %p3937_p0 = pnand %p3936_p13, %p3930_p10 }
  0x2f   :  { %3940 = shalt.err (!%p3937_p0)
}
  0x30   :  { %107 = dma.hbm_to_vmem [thread:$0]  %s5018_s7, 32, %s102_s22, [#allocation12], %s4200_s27, %s4200_s27, %s4201_s3  }
  0x31   :  { %s4204_s0 = smov [#allocation14]   ;;  %s4205_s5 = smov [#allocation17]  }
  0x32   :  { %s125_s4 = sshll.u32 %s4204_s0, 4  ;;  %s153_s30 = sshll.u32 %s4205_s5, 4  ;;  %s126_s4 = int_to_ptr.vmem [resolvable:$true] %s125_s4  ;;  %s154_s30 = int_to_ptr.vmem [resolvable:$true] %s153_s30 }
  0x33   :  { %s3949_s23 = scalar_lea.vmem %s126_s4, 32  ;;  %p3954_p2 = scmp.lt.s32.totalorder %s126_s4, %s126_s4 }
  0x34   :  { %p3950_p1 = scmp.ne.s32.totalorder %s126_s4, %s3949_s23  ;;  %p3955_p3 = scmp.lt.s32.totalorder %s3949_s23, %s3949_s23 }
  0x36   :  { %p3956_p4 = por %p3955_p3, %p3954_p2 }
  0x38   :  { %p3957_p5 = pnand %p3956_p4, %p3950_p1 }
  0x3a   :  { %3960 = shalt.err (!%p3957_p5)
}
  0x3b   :  { %131 = dma.hbm_to_vmem [thread:$0]  %s5020_s9, 32, %s126_s4, [#allocation15], %s4200_s27, %s4200_s27, %s4201_s3  }
  0x3c   :  { %s3969_s7 = scalar_lea.vmem %s154_s30, 32  ;;  %p3974_p7 = scmp.lt.s32.totalorder %s154_s30, %s154_s30 }
  0x3d   :  { %p3970_p6 = scmp.ne.s32.totalorder %s154_s30, %s3969_s7  ;;  %p3975_p8 = scmp.lt.s32.totalorder %s3969_s7, %s3969_s7 }
  0x3f   :  { %p3976_p9 = por %p3975_p8, %p3974_p7 }
  0x41   :  { %p3977_p10 = pnand %p3976_p9, %p3970_p6 }
  0x43   :  { %3980 = shalt.err (!%p3977_p10)
}
  0x44   :  { %159 = dma.hbm_to_vmem [thread:$0]  %s5024_s13, 32, %s154_s30, [#allocation18], %s4200_s27, %s4200_s27, %s4201_s3  }
  0x45   :  { %s4206_s26 = smov [#allocation20]   ;;  %s4207_s25 = smov [#allocation2]  }
  0x46   :  { %s177_s28 = sshll.u32 %s4206_s26, 4  ;;  %s41_s9 = sshll.u32 %s4207_s25, 4  ;;  %s178_s28 = int_to_ptr.vmem [resolvable:$true] %s177_s28  ;;  %s42_s9 = int_to_ptr.vmem [resolvable:$true] %s41_s9 }
  0x47   :  { %s3989_s29 = scalar_lea.vmem %s178_s28, 32  ;;  %p3994_p12 = scmp.lt.s32.totalorder %s178_s28, %s178_s28 }
  0x48   :  { %p3990_p11 = scmp.ne.s32.totalorder %s178_s28, %s3989_s29  ;;  %p3995_p13 = scmp.lt.s32.totalorder %s3989_s29, %s3989_s29 }
  0x4a   :  { %p3996_p0 = por %p3995_p13, %p3994_p12 }
  0x4c   :  { %p3997_p1 = pnand %p3996_p0, %p3990_p11 }
  0x4e   :  { %4000 = shalt.err (!%p3997_p1)
}
  0x4f   :  { %183 = dma.hbm_to_vmem [thread:$0]  %s5026_s15, 32, %s178_s28, [#allocation21], %s4200_s27, %s4200_s27, %s4201_s3  }
  0x50   :  { %s4009_s13 = scalar_lea.vmem %s42_s9, 256  ;;  %p4014_p3 = scmp.lt.s32.totalorder %s42_s9, %s42_s9 }
  0x51   :  { %p4010_p2 = scmp.ne.s32.totalorder %s42_s9, %s4009_s13  ;;  %p4015_p4 = scmp.lt.s32.totalorder %s4009_s13, %s4009_s13 }
  0x53   :  { %p4016_p5 = por %p4015_p4, %p4014_p3 }
  0x55   :  { %p4017_p6 = pnand %p4016_p5, %p4010_p2 }
  0x57   :  { %4020 = shalt.err (!%p4017_p6)
}
  0x58   :  { %s4208_s5 = smov 128   ;;  %s4209_s30 = smov 8  }
  0x59   :  { %s5042_s24 = sld [smem:[#allocation35_spill]]  ;;  %s4210_s7 = smov [#allocation7]  }
  0x5a   :  { %s66_s22 = sshll.u32 %s4210_s7, 4  ;;  %s4211_s15 = smov [#allocation10]   ;;  %s67_s22 = int_to_ptr.vmem [resolvable:$true] %s66_s22 }
  0x5b   :  { %s87_s2 = sshll.u32 %s4211_s15, 4  ;;  %s4029_s26 = scalar_lea.vmem %s67_s22, 16  ;;  %s88_s2 = int_to_ptr.vmem [resolvable:$true] %s87_s2 }
  0x5c   :  { %p4030_p7 = scmp.ne.s32.totalorder %s67_s22, %s4029_s26  ;;  %s4033_s28 = scalar_lea.vmem %s67_s22, 32 }
  0x5d   :  { %p4034_p8 = scmp.lt.s32.totalorder %s67_s22, %s67_s22  ;;  %p4035_p9 = scmp.lt.s32.totalorder %s4033_s28, %s4029_s26 }
  0x5f   :  { %47 = dma.hbm_to_vmem [thread:$0]  %s5042_s24, 256, %s42_s9, [#allocation3], %s4208_s5, %s4208_s5, %s4209_s30  }
  0x60   :  { %p4036_p10 = por %p4035_p9, %p4034_p8 }
  0x62   :  { %p4037_p11 = pnand %p4036_p10, %p4030_p7 }
  0x64   :  { %4040 = shalt.err (!%p4037_p11)
}
  0x65   :  { %s5043_s0 = sld [smem:[#allocation37_spill]]  ;;  %s4049_s4 = scalar_lea.vmem %s88_s2, 32 }
  0x66   :  { %p4050_p12 = scmp.ne.s32.totalorder %s88_s2, %s4049_s4  ;;  %p4054_p13 = scmp.lt.s32.totalorder %s88_s2, %s88_s2 }
  0x67   :  { %p4055_p0 = scmp.lt.s32.totalorder %s4049_s4, %s4049_s4 }
  0x69   :  { %p4056_p1 = por %p4055_p0, %p4054_p13 }
  0x6b   :  { %69 = dma.hbm_to_vmem [thread:$0]  %s5043_s0, 16, %s67_s22, [#allocation6]  }
  0x6c   :  { %p4057_p2 = pnand %p4056_p1, %p4050_p12 }
  0x6e   :  { %4060 = shalt.err (!%p4057_p2)
}
  0x6f   :  { %s5044_s23 = sld [smem:[#allocation40_spill]]  ;;  %s4212_s1 = smov [#allocation13]  }
  0x70   :  { %s113_s24 = sshll.u32 %s4212_s1, 4  ;;  %s4213_s7 = smov [#allocation16]   ;;  %s114_s24 = int_to_ptr.vmem [resolvable:$true] %s113_s24 }
  0x71   :  { %s139_s22 = sshll.u32 %s4213_s7, 4  ;;  %s4069_s15 = scalar_lea.vmem %s114_s24, 32  ;;  %s140_s22 = int_to_ptr.vmem [resolvable:$true] %s139_s22 }
  0x72   :  { %p4070_p3 = scmp.ne.s32.totalorder %s114_s24, %s4069_s15  ;;  %p4074_p4 = scmp.lt.s32.totalorder %s114_s24, %s114_s24 }
  0x73   :  { %p4075_p5 = scmp.lt.s32.totalorder %s4069_s15, %s4069_s15 }
  0x75   :  { %93 = dma.hbm_to_vmem [thread:$0]  %s5044_s23, 32, %s88_s2, [#allocation9], %s4200_s27, %s4200_s27, %s4201_s3  }
  0x76   :  { %p4076_p6 = por %p4075_p5, %p4074_p4 }
  0x78   :  { %p4077_p7 = pnand %p4076_p6, %p4070_p3 }
  0x7a   :  { %4080 = shalt.err (!%p4077_p7)
}
  0x7b   :  { %119 = dma.hbm_to_vmem [thread:$0]  %s5019_s8, 32, %s114_s24, [#allocation12], %s4200_s27, %s4200_s27, %s4201_s3  }
  0x7c   :  { %s4089_s2 = scalar_lea.vmem %s140_s22, 32  ;;  %p4094_p9 = scmp.lt.s32.totalorder %s140_s22, %s140_s22 }
  0x7d   :  { %p4090_p8 = scmp.ne.s32.totalorder %s140_s22, %s4089_s2  ;;  %p4095_p10 = scmp.lt.s32.totalorder %s4089_s2, %s4089_s2 }
  0x7f   :  { %p4096_p11 = por %p4095_p10, %p4094_p9 }
  0x81   :  { %p4097_p12 = pnand %p4096_p11, %p4090_p8 }
  0x83   :  { %4100 = shalt.err (!%p4097_p12)
}
  0x84   :  { %145 = dma.hbm_to_vmem [thread:$0]  %s5022_s11, 32, %s140_s22, [#allocation15], %s4200_s27, %s4200_s27, %s4201_s3  }
  0x85   :  { %s4214_s0 = smov [#allocation19]   ;;  %s4215_s9 = smov [#allocation22]  }
  0x86   :  { %s165_s4 = sshll.u32 %s4214_s0, 4  ;;  %s192_s8 = sshll.u32 %s4215_s9, 4  ;;  %s166_s4 = int_to_ptr.vmem [resolvable:$true] %s165_s4  ;;  %s193_s8 = int_to_ptr.vmem [resolvable:$true] %s192_s8 }
  0x87   :  { %s4109_s13 = scalar_lea.vmem %s166_s4, 32  ;;  %p4114_p0 = scmp.lt.s32.totalorder %s166_s4, %s166_s4 }
  0x88   :  { %p4110_p13 = scmp.ne.s32.totalorder %s166_s4, %s4109_s13  ;;  %p4115_p1 = scmp.lt.s32.totalorder %s4109_s13, %s4109_s13 }
  0x8a   :  { %p4116_p2 = por %p4115_p1, %p4114_p0 }
  0x8c   :  { %p4117_p3 = pnand %p4116_p2, %p4110_p13 }
  0x8e   :  { %4120 = shalt.err (!%p4117_p3)
}
  0x8f   :  { %171 = dma.hbm_to_vmem [thread:$0]  %s5025_s14, 32, %s166_s4, [#allocation18], %s4200_s27, %s4200_s27, %s4201_s3  }
  0x90   :  { %s4129_s11 = scalar_lea.vmem %s193_s8, 16  ;;  %s4133_s24 = scalar_lea.vmem %s193_s8, 32 }
  0x91   :  { %p4130_p4 = scmp.ne.s32.totalorder %s193_s8, %s4129_s11  ;;  %p4134_p5 = scmp.lt.s32.totalorder %s193_s8, %s193_s8 }
  0x92   :  { %p4135_p6 = scmp.lt.s32.totalorder %s4133_s24, %s4129_s11 }
  0x94   :  { %p4136_p7 = por %p4135_p6, %p4134_p5 }
  0x96   :  { %p4137_p8 = pnand %p4136_p7, %p4130_p4 }
  0x98   :  { %4140 = shalt.err (!%p4137_p8)
}
  0x99   :  { %195 = dma.hbm_to_vmem [thread:$0]  %s5028_s17, 16, %s193_s8, [#allocation21]  }
  0x9a   :  { %4181 = dma.done.wait [#allocation3], 256  }
  0x9b   :  { %4182 = vsyncadd [#allocation3], 4294967040 }
  0x9c   :  { %4183 = dma.done.wait [#allocation6], 48  }
  0x9d   :  { %4184 = vsyncadd [#allocation6], 4294967248 }
  0x9e   :  { %4185 = dma.done.wait [#allocation9], 48  }
  0x9f   :  { %4186 = vsyncadd [#allocation9], 4294967248 }
  0xa0   :  { %4187 = dma.done.wait [#allocation12], 64  }
  0xa1   :  { %4188 = vsyncadd [#allocation12], 4294967232 }
  0xa2   :  { %4189 = dma.done.wait [#allocation15], 64  }
  0xa3   :  { %4190 = vsyncadd [#allocation15], 4294967232 }
  0xa4   :  { %4191 = dma.done.wait [#allocation18], 64  }
  0xa5   :  { %4192 = vsyncadd [#allocation18], 4294967232 }
  0xa6   :  { %4193 = dma.done.wait [#allocation21], 48  }
  0xa7   :  { %4194 = vsyncadd [#allocation21], 4294967248  ;;  %vm244_vm0 = vcmask 261120   ;;  %v240_v0 = vld [vmem:[#allocation2] sm:$0xff]  ;;  %v241_v1 = vld [vmem:[#allocation2 + $0x8] sm:$0xff]  ;;  %s5045_s3 = sld [smem:[#allocation39_spill]] }
  0xa8   :  { %v245_v2 = vsel %vm244_vm0, %v240_v0, 0.0  ;;  %v248_v3 = vsel %vm244_vm0, %v241_v1, 0.0  ;;  %v4216_v15 = vmov 0.0   ;;  %vm4217_vm1 = vmmov 0   ;;  %v3218_v25 = vld [vmem:[#allocation7] ss:$0 sm:$0xff] }
  0xa9   :  { %246 = vadd.xlane.f32.xlu0 %v245_v2  ;;  %3424 = vmatprep.subr.bf16.mxu0 %v4216_v15  ;;  %v3219_v29 = vld [vmem:[#allocation8] ss:$0 sm:$0xff]  ;;  %v3220_v34 = vld [vmem:[#allocation10] ss:$0 sm:$0xff]  ;;  %s4218_s28 = smov 120   ;;  %s4219_s2 = smov 104  }
  0xaa   :  { %3428 = vmatprep.mubr.msk.bf16.mxu0 %vm4217_vm1, %v4216_v15  ;;  %3432 = vmatprep.subr.bf16.mxu1 %v4216_v15  ;;  %s4220_s25 = smov 96   ;;  %s4221_s29 = smov 112   ;;  %vm421_vm2 = vcmask 64512   ;;  %vm928_vm3 = vcmask 1043456   ;;  %vm1334_vm4 = vcmask 130048   ;;  %vm1337_vm5 = vcmask 195584  }
  0xab   :  { %3434 = vmatprep.mubr.msk.bf16.mxu1 %vm4217_vm1, %v4216_v15  ;;  %s4222_s0 = smov 64   ;;  %s4223_s23 = smov 24   ;;  %vm1578_vm6 = vcmask 523264   ;;  %vm3043_vm7 = vcmask 1040384  }
  0xac   :  { %s4224_s24 = smov [#allocation24]  }
  0xad   :  { %249 = vadd.xlane.f32.xlu0 %v248_v3  ;;  %v3761_v14 = vld [vmem:[%s5045_s3 + $0x8] sm:$0xff]   ;;  %v3762_v16 = vld [vmem:[%s5045_s3] sm:$0xff]  }
  0xae   :  { %3425 = vmatpush3.bf16.msra.mxu0 %v3761_v14 }
  0xaf   :  { %3426 = vmatprep.subr.bf16.mxu0 %v4216_v15 }
  0xb2   :  { %3427 = vmatpush3.bf16.msra.mxu0 %v3762_v16 }
  0xb3   :  { %3438 = vmatprep.subr.bf16.mxu0 %v4216_v15 }
 0x132   :  { %v247_v4 = vpop.xlane.xlu0 %246 }
 0x133   :  { %v252_v5 = vmul.f32 0.03125, %v247_v4 }
 0x135   :  { %v254_v6 = vsub.f32 %v240_v0, %v252_v5 }
 0x136   :  { %v250_v7 = vpop.xlane.xlu0 %249 }
 0x137   :  { %v253_v8 = vmul.f32 0.03125, %v250_v7  ;;  %v256_v9 = vmul.f32 %v254_v6, %v254_v6 }
 0x139   :  { %v255_v10 = vsub.f32 %v241_v1, %v253_v8  ;;  %v258_v11 = vsel %vm244_vm0, %v256_v9, 0.0 }
 0x13a   :  { %259 = vadd.xlane.f32.xlu1 %v258_v11 }
 0x13b   :  { %v257_v12 = vmul.f32 %v255_v10, %v255_v10 }
 0x13d   :  { %v261_v13 = vsel %vm244_vm0, %v257_v12, 0.0 }
 0x13e   :  { %262 = vadd.xlane.f32.xlu1 %v261_v13 }
 0x1c3   :  { %v260_v17 = vpop.xlane.xlu1 %259 }
 0x1c4   :  { %v264_v18 = vmul.f32 0.03125, %v260_v17 }
 0x1c6   :  { %v266_v19 = vadd.f32 1e-12, %v264_v18 }
 0x1c7   :  { %v263_v20 = vpop.xlane.xlu1 %262 }
 0x1c8   :  { %3785 = vrsqrt.f32 %v266_v19  ;;  %v265_v21 = vmul.f32 0.03125, %v263_v20 }
 0x1ca   :  { %v267_v22 = vadd.f32 1e-12, %v265_v21 }
 0x1cc   :  { %3787 = vrsqrt.f32 %v267_v22 }
 0x1d5   :  { %v3786_v23 = vpop.eup %3785 }
 0x1d6   :  { %v270_v24 = vmul.f32 %v3786_v23, %v254_v6 }
 0x1d8   :  { %v278_v28 = vmul.f32 %v3218_v25, %v270_v24  ;;  %v3224_v24 = vld [vmem:[#allocation5] ss:$0 sm:$0xff] }
 0x1d9   :  { %v3788_v26 = vpop.eup %3787 }
 0x1da   :  { %v271_v27 = vmul.f32 %v3788_v26, %v255_v10  ;;  %v4423_v31 = vadd.f32 %v3219_v29, %v278_v28 }
 0x1dc   :  { %v279_v30 = vmul.f32 %v3218_v25, %v271_v27 }
 0x1de   :  { %v4425_v32 = vadd.f32 %v3219_v29, %v279_v30 }
 0x1e0   :  { %v298_v33 = vpack.c.bf16 %v4425_v32, %v4423_v31 }
 0x1e2   :  { %3429 = vmatmul.mubr.msk.bf16.vlgmr.msra.gmra.mxu0 %vm244_vm0, %v298_v33  ;;  %v3225_v33 = vld [vmem:[#allocation5 + $0x1] ss:$0 sm:$0xff] }
 0x1e3   :  { %3440 = vmatprep.mubr.msk.bf16.mxu0 %vm4217_vm1, %v4216_v15 }
 0x2a2   :  { %v355_v35 = vpop.f32.mrf.mxu0 }
 0x2a3   :  { %v356_v36 = vadd.f32 %v3220_v34, %v355_v35 }
 0x2a4   :  { %v3430_v37 = vpop.f32.mrf.mxu0 }
 0x2a5   :  { %364 = vrot.lane.b32.xlu0 %v356_v36, %s4218_s28  ;;  %v4435_v41 = vpack.c.bf16 %v356_v36, %v356_v36  ;;  %v382_v52 = vmul.f32 0.35355338, %v356_v36 }
 0x2a6   :  { %v358_v38 = vpop.f32.mrf.mxu0 }
 0x2a7   :  { %v359_v39 = vadd.f32 %v3220_v34, %v358_v38  ;;  %v390_v56 = vpack.c.bf16 %v382_v52, %v382_v52 }
 0x2a8   :  { %v3431_v40 = vpop.f32.mrf.mxu0 }
 0x2a9   :  { %376 = vrot.lane.b32.xlu0 %v356_v36, %s4219_s2  ;;  %366 = vrot.lane.b32.xlu1 %v359_v39, %s4218_s28  ;;  %v4442_v42 = vpack.c.bf16 %v359_v39, %v359_v39  ;;  %v383_v61 = vmul.f32 0.35355338, %v359_v39 }
 0x2ab   :  { %v391_v62 = vpack.c.bf16 %v383_v61, %v383_v61 }
 0x2ad   :  { %419 = vrot.lane.b32.xlu0 %v4435_v41, %s4220_s25  ;;  %370 = vrot.lane.b32.xlu1 %v356_v36, %s4221_s29 }
 0x2b1   :  { %372 = vrot.lane.b32.xlu1 %v359_v39, %s4221_s29 }
 0x2b5   :  { %378 = vrot.lane.b32.xlu1 %v359_v39, %s4219_s2 }
 0x2b9   :  { %469 = vrot.lane.b32.xlu1 %v4442_v42, %s4220_s25 }
 0x317   :  { %v365_v43 = vpop.permute.xlu0 %364 }
 0x318   :  { %v4446_v44 = vpack.c.bf16 %v365_v43, %v365_v43  ;;  %v384_v1 = vmul.f32 0.35355338, %v365_v43 }
 0x31a   :  { %518 = vrot.lane.b32.xlu0 %v4446_v44, %s4220_s25  ;;  %v392_v4 = vpack.c.bf16 %v384_v1, %v384_v1 }
 0x31b   :  { %v4450_v45 = vpop.permute.xlu0 %376  ;;  %v367_v46 = vpop.permute.xlu1 %366 }
 0x31c   :  { %v4452_v47 = vpack.c.bf16 %v367_v46, %v367_v46  ;;  %v4464_v54 = vpack.c.bf16 %v4450_v45, %v4450_v45  ;;  %v385_v5 = vmul.f32 0.35355338, %v367_v46  ;;  %v388_v18 = vmul.f32 0.35355338, %v4450_v45 }
 0x31e   :  { %567 = vrot.lane.b32.xlu1 %v4452_v47, %s4220_s25  ;;  %v393_v8 = vpack.c.bf16 %v385_v5, %v385_v5  ;;  %v396_v21 = vpack.c.bf16 %v388_v18, %v388_v18 }
 0x31f   :  { %v420_v48 = vpop.permute.xlu0 %419  ;;  %v371_v49 = vpop.permute.xlu1 %370 }
 0x320   :  { %v4456_v50 = vpack.c.bf16 %v371_v49, %v371_v49  ;;  %v426_v51 = vsel %vm421_vm2, %v420_v48, 0  ;;  %v386_v9 = vmul.f32 0.35355338, %v371_v49 }
 0x321   :  { %3433 = vmatpush3.bf16.xpose.msra.mxu1 %v426_v51 }
 0x322   :  { %616 = vrot.lane.b32.xlu0 %v4456_v50, %s4220_s25  ;;  %3444 = vmatprep.subr.bf16.mxu1 %v4216_v15  ;;  %v394_v13 = vpack.c.bf16 %v386_v9, %v386_v9 }
 0x323   :  { %v373_v53 = vpop.permute.xlu1 %372 }
 0x324   :  { %v4466_v55 = vpack.c.bf16 %v373_v53, %v373_v53  ;;  %v387_v14 = vmul.f32 0.35355338, %v373_v53 }
 0x326   :  { %714 = vrot.lane.b32.xlu0 %v4464_v54, %s4220_s25  ;;  %665 = vrot.lane.b32.xlu1 %v4466_v55, %s4220_s25  ;;  %v395_v19 = vpack.c.bf16 %v387_v14, %v387_v14 }
 0x327   :  { %v379_v57 = vpop.permute.xlu1 %378 }
 0x328   :  { %v4472_v58 = vpack.c.bf16 %v379_v57, %v379_v57  ;;  %3435 = vmatmul.mubr.msk.bf16.vlgmr.msra.gmra.mxu1 %vm421_vm2, %v390_v56  ;;  %v389_v22 = vmul.f32 0.35355338, %v379_v57 }
 0x329   :  { %3446 = vmatprep.mubr.msk.bf16.mxu1 %vm4217_vm1, %v4216_v15 }
 0x32a   :  { %763 = vrot.lane.b32.xlu1 %v4472_v58, %s4220_s25  ;;  %v397_v23 = vpack.c.bf16 %v389_v22, %v389_v22 }
 0x32b   :  { %v470_v59 = vpop.permute.xlu1 %469 }
 0x32c   :  { %v475_v60 = vsel %vm421_vm2, %v470_v59, 0 }
 0x32d   :  { %3439 = vmatpush3.bf16.xpose.msra.mxu0 %v475_v60 }
 0x32e   :  { %3450 = vmatprep.subr.bf16.mxu0 %v4216_v15 }
 0x334   :  { %3441 = vmatmul.mubr.msk.bf16.vlgmr.msra.gmra.mxu0 %vm421_vm2, %v391_v62 }
 0x335   :  { %3452 = vmatprep.mubr.msk.bf16.mxu0 %vm4217_vm1, %v4216_v15 }
 0x38c   :  { %v519_v63 = vpop.permute.xlu0 %518 }
 0x38d   :  { %v524_v0 = vsel %vm421_vm2, %v519_v63, 0 }
 0x38e   :  { %3445 = vmatpush3.bf16.xpose.msra.mxu1 %v524_v0 }
 0x38f   :  { %3456 = vmatprep.subr.bf16.mxu1 %v4216_v15 }
 0x390   :  { %v568_v2 = vpop.permute.xlu1 %567 }
 0x391   :  { %v573_v3 = vsel %vm421_vm2, %v568_v2, 0 }
 0x392   :  { %3451 = vmatpush3.bf16.xpose.msra.mxu0 %v573_v3 }
 0x393   :  { %3462 = vmatprep.subr.bf16.mxu0 %v4216_v15 }
 0x394   :  { %v617_v6 = vpop.permute.xlu0 %616 }
 0x395   :  { %v622_v7 = vsel %vm421_vm2, %v617_v6, 0  ;;  %3447 = vmatmul.mubr.msk.bf16.vlgmr.msra.gmra.mxu1 %vm421_vm2, %v392_v4 }
 0x396   :  { %3457 = vmatpush3.bf16.xpose.msra.mxu1 %v622_v7  ;;  %3458 = vmatprep.mubr.msk.bf16.mxu1 %vm4217_vm1, %v4216_v15 }
 0x397   :  { %3468 = vmatprep.subr.bf16.mxu1 %v4216_v15 }
 0x398   :  { %v666_v10 = vpop.permute.xlu1 %665  ;;  %v715_v12 = vpop.permute.xlu0 %714 }
 0x399   :  { %v671_v11 = vsel %vm421_vm2, %v666_v10, 0  ;;  %3453 = vmatmul.mubr.msk.bf16.vlgmr.msra.gmra.mxu0 %vm421_vm2, %v393_v8  ;;  %v720_v16 = vsel %vm421_vm2, %v715_v12, 0 }
 0x39a   :  { %3463 = vmatpush3.bf16.xpose.msra.mxu0 %v671_v11  ;;  %3464 = vmatprep.mubr.msk.bf16.mxu0 %vm4217_vm1, %v4216_v15 }
 0x39b   :  { %3474 = vmatprep.subr.bf16.mxu0 %v4216_v15 }
 0x39c   :  { %v764_v17 = vpop.permute.xlu1 %763 }
 0x39d   :  { %3459 = vmatmul.mubr.msk.bf16.vlgmr.msra.gmra.mxu1 %vm421_vm2, %v394_v13  ;;  %v769_v20 = vsel %vm421_vm2, %v764_v17, 0 }
 0x39e   :  { %3469 = vmatpush3.bf16.xpose.msra.mxu1 %v720_v16  ;;  %3470 = vmatprep.mubr.msk.bf16.mxu1 %vm4217_vm1, %v4216_v15 }
 0x39f   :  { %3480 = vmatprep.subr.bf16.mxu1 %v4216_v15 }
 0x3a1   :  { %3465 = vmatmul.mubr.msk.bf16.vlgmr.msra.gmra.mxu0 %vm421_vm2, %v395_v19 }
 0x3a2   :  { %3475 = vmatpush3.bf16.xpose.msra.mxu0 %v769_v20  ;;  %3476 = vmatprep.mubr.msk.bf16.mxu0 %vm4217_vm1, %v4216_v15 }
 0x3a3   :  { %3486 = vmatprep.subr.bf16.mxu0 %v4216_v15 }
 0x3a5   :  { %3471 = vmatmul.mubr.msk.bf16.vlgmr.msra.gmra.mxu1 %vm421_vm2, %v396_v21 }
 0x3a6   :  { %3482 = vmatprep.mubr.msk.bf16.mxu1 %vm4217_vm1, %v4216_v15 }
 0x3a9   :  { %3477 = vmatmul.mubr.msk.bf16.vlgmr.msra.gmra.mxu0 %vm421_vm2, %v397_v23 }
 0x3aa   :  { %3488 = vmatprep.mubr.msk.bf16.mxu0 %vm4217_vm1, %v4216_v15 }
 0x3e8   :  { %v462_v25 = vpop.f32.mrf.mxu1 }
 0x3e9   :  { %v463_v26 = vadd.f32 %v3224_v24, %v462_v25 }
 0x3ea   :  { %v3436_v27 = vpop.f32.mrf.mxu1 }
 0x3eb   :  { %v811_v28 = vsel %vm421_vm2, %v463_v26, -inf }
 0x3ec   :  { %v465_v29 = vpop.f32.mrf.mxu1  ;;  %812 = vmax.xlane.f32.xlu0 %v811_v28 }
 0x3ee   :  { %v3437_v30 = vpop.f32.mrf.mxu1 }
 0x3f4   :  { %v511_v34 = vpop.f32.mrf.mxu0 }
 0x3f5   :  { %v512_v35 = vadd.f32 %v3225_v33, %v511_v34 }
 0x3f6   :  { %v3442_v36 = vpop.f32.mrf.mxu0 }
 0x3f7   :  { %v814_v37 = vsel %vm421_vm2, %v512_v35, -inf }
 0x3f8   :  { %815 = vmax.xlane.f32.xlu1 %v814_v37  ;;  %v514_v38 = vpop.f32.mrf.mxu0 }
 0x3fa   :  { %v3443_v39 = vpop.f32.mrf.mxu0 }
 0x455   :  { %v560_v40 = vpop.f32.mrf.mxu1 }
 0x456   :  { %v4517_v43 = vadd.f32 %v3224_v24, %v560_v40 }
 0x457   :  { %v3448_v45 = vpop.f32.mrf.mxu1 }
 0x458   :  { %v817_v46 = vsel %vm421_vm2, %v4517_v43, -inf }
 0x459   :  { %v563_v48 = vpop.f32.mrf.mxu1  ;;  %818 = vmax.xlane.f32.xlu0 %v817_v46  ;;  %v609_v49 = vpop.f32.mrf.mxu0 }
 0x45a   :  { %v4521_v51 = vadd.f32 %v3225_v33, %v609_v49 }
 0x45b   :  { %v3449_v52 = vpop.f32.mrf.mxu1  ;;  %v3454_v53 = vpop.f32.mrf.mxu0 }
 0x45c   :  { %v820_v56 = vsel %vm421_vm2, %v4521_v51, -inf }
 0x45d   :  { %v658_v57 = vpop.f32.mrf.mxu1  ;;  %821 = vmax.xlane.f32.xlu0 %v820_v56  ;;  %v612_v59 = vpop.f32.mrf.mxu0 }
 0x45e   :  { %v4525_v60 = vadd.f32 %v3224_v24, %v658_v57 }
 0x45f   :  { %v3455_v61 = vpop.f32.mrf.mxu0  ;;  %v3460_v62 = vpop.f32.mrf.mxu1 }
 0x460   :  { %v823_v63 = vsel %vm421_vm2, %v4525_v60, -inf }
 0x461   :  { %v661_v0 = vpop.f32.mrf.mxu1  ;;  %824 = vmax.xlane.f32.xlu0 %v823_v63  ;;  %v707_v1 = vpop.f32.mrf.mxu0 }
 0x462   :  { %v708_v2 = vadd.f32 %v3225_v33, %v707_v1 }
 0x463   :  { %v3461_v3 = vpop.f32.mrf.mxu1  ;;  %v3466_v4 = vpop.f32.mrf.mxu0 }
 0x464   :  { %v826_v5 = vsel %vm421_vm2, %v708_v2, -inf }
 0x465   :  { %v756_v6 = vpop.f32.mrf.mxu1  ;;  %827 = vmax.xlane.f32.xlu1 %v826_v5  ;;  %v710_v7 = vpop.f32.mrf.mxu0 }
 0x466   :  { %v4530_v8 = vadd.f32 %v3224_v24, %v756_v6 }
 0x467   :  { %v3467_v9 = vpop.f32.mrf.mxu0  ;;  %v3472_v10 = vpop.f32.mrf.mxu1 }
 0x468   :  { %v829_v11 = vsel %vm421_vm2, %v4530_v8, -inf }
 0x469   :  { %v759_v12 = vpop.f32.mrf.mxu1  ;;  %830 = vmax.xlane.f32.xlu0 %v829_v11  ;;  %v805_v13 = vpop.f32.mrf.mxu0 }
 0x46a   :  { %v806_v22 = vadd.f32 %v3225_v33, %v805_v13 }
 0x46b   :  { %v3473_v14 = vpop.f32.mrf.mxu1  ;;  %v3478_v16 = vpop.f32.mrf.mxu0 }
 0x46c   :  { %v832_v25 = vsel %vm421_vm2, %v806_v22, -inf }
 0x46d   :  { %v808_v17 = vpop.f32.mrf.mxu0 }
 0x46f   :  { %v3479_v18 = vpop.f32.mrf.mxu0 }
 0x475   :  { %v813_v19 = vpop.xlane.xlu0 %812 }
 0x476   :  { %972 = vrot.lane.b32.xlu1 %v4442_v42, %s4222_s0  ;;  %v835_v20 = vsub.f32 %v463_v26, %v813_v19 }
 0x478   :  { %v843_v21 = vmul.f32 1.442695, %v835_v20 }
 0x47a   :  { %1020 = vrot.lane.b32.xlu1 %v4446_v44, %s4222_s0  ;;  %3789 = vpow2.f32 %v843_v21 }
 0x47f   :  { %923 = vrot.lane.b32.xlu0 %v4435_v41, %s4222_s0 }
 0x481   :  { %v816_v42 = vpop.xlane.xlu1 %815 }
 0x482   :  { %v836_v44 = vsub.f32 %v512_v35, %v816_v42 }
 0x484   :  { %v845_v41 = vmul.f32 1.442695, %v836_v44 }
 0x486   :  { %3791 = vpow2.f32 %v845_v41 }
 0x487   :  { %v4540_v23 = vpop.eup %3789 }
 0x488   :  { %v859_v24 = vsel %vm421_vm2, %v4540_v23, 0.0 }
 0x493   :  { %v4547_v26 = vpop.eup %3791 }
 0x494   :  { %v862_v27 = vsel %vm421_vm2, %v4547_v26, 0.0 }
 0x49e   :  { %860 = vadd.xlane.f32.xlu0 %v859_v24  ;;  %833 = vmax.xlane.f32.xlu1 %v832_v25 }
 0x4af   :  { %1068 = vrot.lane.b32.xlu1 %v4452_v47, %s4222_s0 }
 0x4d3   :  { %863 = vadd.xlane.f32.xlu1 %v862_v27 }
 0x4e2   :  { %v819_v28 = vpop.xlane.xlu0 %818 }
 0x4e3   :  { %v837_v29 = vsub.f32 %v4517_v43, %v819_v28 }
 0x4e4   :  { %1164 = vrot.lane.b32.xlu1 %v4466_v55, %s4222_s0 }
 0x4e5   :  { %v847_v30 = vmul.f32 1.442695, %v837_v29 }
 0x4e6   :  { %v822_v33 = vpop.xlane.xlu0 %821 }
 0x4e7   :  { %3793 = vpow2.f32 %v847_v30  ;;  %v838_v35 = vsub.f32 %v4521_v51, %v822_v33 }
 0x4e9   :  { %v849_v38 = vmul.f32 1.442695, %v838_v35 }
 0x4ea   :  { %v825_v47 = vpop.xlane.xlu0 %824 }
 0x4eb   :  { %3795 = vpow2.f32 %v849_v38  ;;  %v839_v56 = vsub.f32 %v4525_v60, %v825_v47 }
 0x4ed   :  { %v851_v57 = vmul.f32 1.442695, %v839_v56 }
 0x4ee   :  { %v828_v34 = vpop.xlane.xlu1 %827 }
 0x4ef   :  { %v840_v39 = vsub.f32 %v708_v2, %v828_v34 }
 0x4f1   :  { %v853_v46 = vmul.f32 1.442695, %v840_v39 }
 0x4f2   :  { %v831_v36 = vpop.xlane.xlu0 %830  ;;  %v973_v37 = vpop.permute.xlu1 %972 }
 0x4f3   :  { %v978_v40 = vsel %vm928_vm3, %v973_v37, 0  ;;  %3797 = vpow2.f32 %v853_v46  ;;  %v841_v59 = vsub.f32 %v4530_v8, %v831_v36 }
 0x4f4   :  { %v4556_v45 = vpop.eup %3793  ;;  %3487 = vmatpush3.bf16.msra.mxu0 %v978_v40  ;;  %3799 = vpow2.f32 %v851_v57 }
 0x4f5   :  { %v865_v55 = vsel %vm421_vm2, %v4556_v45, 0.0  ;;  %3498 = vmatprep.subr.bf16.mxu0 %v4216_v15  ;;  %v855_v61 = vmul.f32 1.442695, %v841_v59 }
 0x4f6   :  { %866 = vadd.xlane.f32.xlu0 %v865_v55  ;;  %v924_v43 = vpop.permute.xlu0 %923  ;;  %v1021_v62 = vpop.permute.xlu1 %1020 }
 0x4f7   :  { %v930_v48 = vsel %vm928_vm3, %v924_v43, 0  ;;  %3801 = vpow2.f32 %v855_v61  ;;  %v1026_v10 = vsel %vm928_vm3, %v1021_v62, 0 }
 0x4f8   :  { %3481 = vmatpush3.bf16.msra.mxu1 %v930_v48  ;;  %v4563_v49 = vpop.eup %3795 }
 0x4f9   :  { %3492 = vmatprep.subr.bf16.mxu1 %v4216_v15  ;;  %v868_v51 = vsel %vm421_vm2, %v4563_v49, 0.0 }
 0x500   :  { %v4567_v52 = vpop.eup %3797 }
 0x501   :  { %v874_v53 = vsel %vm421_vm2, %v4567_v52, 0.0  ;;  %v4575_v63 = vpop.eup %3799 }
 0x504   :  { %v4579_v4 = vpop.eup %3801 }
 0x505   :  { %v877_v60 = vsel %vm421_vm2, %v4579_v4, 0.0 }
 0x508   :  { %869 = vadd.xlane.f32.xlu1 %v868_v51 }
 0x50c   :  { %1116 = vrot.lane.b32.xlu0 %v4456_v50, %s4222_s0  ;;  %875 = vadd.xlane.f32.xlu1 %v874_v53  ;;  %v871_v50 = vsel %vm421_vm2, %v4575_v63, 0.0 }
 0x527   :  { %v861_v0 = vpop.xlane.xlu0 %860  ;;  %v834_v1 = vpop.xlane.xlu1 %833 }
 0x528   :  { %3803 = vrcp.f32 %v861_v0  ;;  %v842_v2 = vsub.f32 %v806_v22, %v834_v1 }
 0x52a   :  { %v857_v3 = vmul.f32 1.442695, %v842_v2 }
 0x52b   :  { %872 = vadd.xlane.f32.xlu0 %v871_v50  ;;  %v1069_v12 = vpop.permute.xlu1 %1068 }
 0x52c   :  { %3805 = vpow2.f32 %v857_v3  ;;  %v1074_v19 = vsel %vm928_vm3, %v1069_v12, 0 }
 0x52f   :  { %878 = vadd.xlane.f32.xlu0 %v877_v60 }
 0x535   :  { %v3804_v5 = vpop.eup %3803 }
 0x536   :  { %v884_v6 = vmul.f32 %v3804_v5, %v4540_v23 }
 0x538   :  { %v899_v7 = vsel %vm421_vm2, %v884_v6, 0.0  ;;  %v915_v8 = vpack.c.bf16 %v884_v6, %v884_v6 }
 0x539   :  { %v4585_v9 = vpop.eup %3805  ;;  %907 = vst [vmem:[#allocation24] sm:$0xff] %v899_v7 }
 0x53a   :  { %3483 = vmatmul.mubr.msk.bf16.vlgmr.msra.gmra.mxu1 %vm421_vm2, %v915_v8  ;;  %v880_v11 = vsel %vm421_vm2, %v4585_v9, 0.0 }
 0x53b   :  { %3493 = vmatpush3.bf16.msra.mxu1 %v1026_v10  ;;  %881 = vadd.xlane.f32.xlu1 %v880_v11 }
 0x53c   :  { %3494 = vmatprep.mubr.msk.bf16.mxu1 %vm4217_vm1, %v4216_v15  ;;  %3504 = vmatprep.subr.bf16.mxu1 %v4216_v15 }
 0x545   :  { %1212 = vrot.lane.b32.xlu0 %v4464_v54, %s4222_s0 }
 0x54c   :  { %1260 = vrot.lane.b32.xlu1 %v4472_v58, %s4222_s0 }
 0x55c   :  { %v864_v13 = vpop.xlane.xlu1 %863 }
 0x55d   :  { %3807 = vrcp.f32 %v864_v13 }
 0x560   :  { %v1165_v20 = vpop.permute.xlu1 %1164 }
 0x561   :  { %v1170_v30 = vsel %vm928_vm3, %v1165_v20, 0 }
 0x56a   :  { %v3808_v14 = vpop.eup %3807 }
 0x56b   :  { %v886_v16 = vmul.f32 %v3808_v14, %v4547_v26 }
 0x56d   :  { %v900_v17 = vsel %vm421_vm2, %v886_v16, 0.0  ;;  %v916_v18 = vpack.c.bf16 %v886_v16, %v886_v16 }
 0x56e   :  { %908 = vst [vmem:[#allocation24 + $0x8] sm:$0xff] %v900_v17 }
 0x56f   :  { %3489 = vmatmul.mubr.msk.bf16.vlgmr.msra.gmra.mxu0 %vm421_vm2, %v916_v18  ;;  %v3763_v18 = vld [vmem:[%s5017_s6 + $0x8] sm:$0xff]  }
 0x570   :  { %3499 = vmatpush3.bf16.msra.mxu0 %v1074_v19  ;;  %3500 = vmatprep.mubr.msk.bf16.mxu0 %vm4217_vm1, %v4216_v15 }
 0x571   :  { %3510 = vmatprep.subr.bf16.mxu0 %v4216_v15 }
 0x57f   :  { %v867_v54 = vpop.xlane.xlu0 %866 }
 0x580   :  { %3809 = vrcp.f32 %v867_v54 }
 0x583   :  { %v1117_v22 = vpop.permute.xlu0 %1116 }
 0x584   :  { %v1122_v42 = vsel %vm928_vm3, %v1117_v22, 0  ;;  %v3764_v22 = vld [vmem:[%s5017_s6] sm:$0xff]  }
 0x58d   :  { %v3810_v58 = vpop.eup %3809 }
 0x58e   :  { %v888_v21 = vmul.f32 %v3810_v58, %v4556_v45 }
 0x590   :  { %v901_v23 = vsel %vm421_vm2, %v888_v21, 0.0  ;;  %v917_v24 = vpack.c.bf16 %v888_v21, %v888_v21 }
 0x591   :  { %v870_v25 = vpop.xlane.xlu1 %869  ;;  %909 = vst [vmem:[#allocation24 + $0x10] sm:$0xff] %v901_v23 }
 0x592   :  { %3811 = vrcp.f32 %v870_v25  ;;  %3495 = vmatmul.mubr.msk.bf16.vlgmr.msra.gmra.mxu1 %vm421_vm2, %v917_v24 }
 0x593   :  { %3505 = vmatpush3.bf16.msra.mxu1 %v1122_v42  ;;  %3506 = vmatprep.mubr.msk.bf16.mxu1 %vm4217_vm1, %v4216_v15 }
 0x594   :  { %3516 = vmatprep.subr.bf16.mxu1 %v4216_v15 }
 0x595   :  { %v876_v44 = vpop.xlane.xlu1 %875 }
 0x596   :  { %3813 = vrcp.f32 %v876_v44 }
 0x59f   :  { %v3812_v41 = vpop.eup %3811 }
 0x5a0   :  { %v890_v26 = vmul.f32 %v3812_v41, %v4563_v49 }
 0x5a2   :  { %v902_v27 = vsel %vm421_vm2, %v890_v26, 0.0  ;;  %v918_v28 = vpack.c.bf16 %v890_v26, %v890_v26 }
 0x5a3   :  { %v3814_v29 = vpop.eup %3813  ;;  %910 = vst [vmem:[#allocation24 + $0x18] sm:$0xff] %v902_v27 }
 0x5a4   :  { %3501 = vmatmul.mubr.msk.bf16.vlgmr.msra.gmra.mxu0 %vm421_vm2, %v918_v28  ;;  %v894_v33 = vmul.f32 %v3814_v29, %v4567_v52 }
 0x5a5   :  { %3511 = vmatpush3.bf16.msra.mxu0 %v1170_v30  ;;  %3512 = vmatprep.mubr.msk.bf16.mxu0 %vm4217_vm1, %v4216_v15 }
 0x5a6   :  { %v904_v47 = vsel %vm421_vm2, %v894_v33, 0.0  ;;  %3522 = vmatprep.subr.bf16.mxu0 %v4216_v15  ;;  %v920_v34 = vpack.c.bf16 %v894_v33, %v894_v33 }
 0x5a7   :  { %912 = vst [vmem:[#allocation24 + $0x28] sm:$0xff] %v904_v47 }
 0x5ac   :  { %3513 = vmatmul.mubr.msk.bf16.vlgmr.msra.gmra.mxu0 %vm421_vm2, %v920_v34 }
 0x5ad   :  { %3524 = vmatprep.mubr.msk.bf16.mxu0 %vm4217_vm1, %v4216_v15 }
 0x5b4   :  { %v873_v35 = vpop.xlane.xlu0 %872 }
 0x5b5   :  { %3815 = vrcp.f32 %v873_v35 }
 0x5b8   :  { %v879_v36 = vpop.xlane.xlu0 %878 }
 0x5b9   :  { %3817 = vrcp.f32 %v879_v36 }
 0x5bc   :  { %v1213_v39 = vpop.permute.xlu0 %1212 }
 0x5bd   :  { %v1218_v46 = vsel %vm928_vm3, %v1213_v39, 0 }
 0x5c2   :  { %v3816_v37 = vpop.eup %3815 }
 0x5c3   :  { %v892_v38 = vmul.f32 %v3816_v37, %v4575_v63 }
 0x5c4   :  { %v882_v40 = vpop.xlane.xlu1 %881 }
 0x5c5   :  { %3819 = vrcp.f32 %v882_v40  ;;  %v903_v45 = vsel %vm421_vm2, %v892_v38, 0.0  ;;  %v919_v55 = vpack.c.bf16 %v892_v38, %v892_v38 }
 0x5c6   :  { %v3818_v43 = vpop.eup %3817  ;;  %911 = vst [vmem:[#allocation24 + $0x20] sm:$0xff] %v903_v45 }
 0x5c7   :  { %3507 = vmatmul.mubr.msk.bf16.vlgmr.msra.gmra.mxu1 %vm421_vm2, %v919_v55  ;;  %v896_v48 = vmul.f32 %v3818_v43, %v4579_v4 }
 0x5c8   :  { %3517 = vmatpush3.bf16.msra.mxu1 %v1218_v46  ;;  %v1261_v49 = vpop.permute.xlu1 %1260  ;;  %3518 = vmatprep.mubr.msk.bf16.mxu1 %vm4217_vm1, %v4216_v15 }
 0x5c9   :  { %v1266_v51 = vsel %vm928_vm3, %v1261_v49, 0  ;;  %v905_v52 = vsel %vm421_vm2, %v896_v48, 0.0  ;;  %3528 = vmatprep.subr.bf16.mxu1 %v4216_v15  ;;  %v921_v53 = vpack.c.bf16 %v896_v48, %v896_v48  ;;  %v3242_v49 = vld [vmem:[#allocation11] ss:$0 sm:$0xff] }
 0x5ca   :  { %3523 = vmatpush3.bf16.msra.mxu0 %v1266_v51  ;;  %913 = vst [vmem:[#allocation24 + $0x30] sm:$0xff] %v905_v52 }
 0x5cb   :  { %3536 = vmatprep.subr.bf16.mxu0 %v4216_v15 }
 0x5cf   :  { %3519 = vmatmul.mubr.msk.bf16.vlgmr.msra.gmra.mxu1 %vm421_vm2, %v921_v53 }
 0x5d0   :  { %3532 = vmatprep.mubr.msk.bf16.mxu1 %vm4217_vm1, %v4216_v15  ;;  %3529 = vmatpush3.bf16.msra.mxu1 %v3763_v18  ;;  %v3246_v18 = vld [vmem:[#allocation13] ss:$0 sm:$0xff] }
 0x5d1   :  { %3530 = vmatprep.subr.bf16.mxu1 %v4216_v15 }
 0x5d2   :  { %v3820_v56 = vpop.eup %3819 }
 0x5d3   :  { %v898_v57 = vmul.f32 %v3820_v56, %v4585_v9 }
 0x5d4   :  { %3531 = vmatpush3.bf16.msra.mxu1 %v3764_v22 }
 0x5d5   :  { %v906_v59 = vsel %vm421_vm2, %v898_v57, 0.0  ;;  %v922_v61 = vpack.c.bf16 %v898_v57, %v898_v57  ;;  %3544 = vmatprep.subr.bf16.mxu1 %v4216_v15 }
 0x5d6   :  { %914 = vst [vmem:[#allocation24 + $0x38] sm:$0xff] %v906_v59 }
 0x5d7   :  { %3525 = vmatmul.mubr.msk.bf16.vlgmr.msra.gmra.mxu0 %vm421_vm2, %v922_v61 }
 0x5d8   :  { %3540 = vmatprep.mubr.msk.bf16.mxu0 %vm4217_vm1, %v4216_v15 }
 0x5fa   :  { %v966_v62 = vpop.f32.mrf.mxu1 }
 0x5fc   :  { %v3484_v63 = vpop.f32.mrf.mxu1 }
 0x5fe   :  { %v969_v0 = vpop.f32.mrf.mxu1 }
 0x600   :  { %v3485_v1 = vpop.f32.mrf.mxu1 }
 0x62f   :  { %v1014_v2 = vpop.f32.mrf.mxu0 }
 0x631   :  { %v3490_v3 = vpop.f32.mrf.mxu0 }
 0x633   :  { %v1017_v50 = vpop.f32.mrf.mxu0 }
 0x635   :  { %v3491_v4 = vpop.f32.mrf.mxu0 }
 0x652   :  { %v1062_v60 = vpop.f32.mrf.mxu1 }
 0x654   :  { %v3496_v5 = vpop.f32.mrf.mxu1 }
 0x656   :  { %v1065_v6 = vpop.f32.mrf.mxu1 }
 0x658   :  { %v3497_v7 = vpop.f32.mrf.mxu1 }
 0x664   :  { %v1110_v8 = vpop.f32.mrf.mxu0 }
 0x665   :  { %v3731_v9 = vpack.i.bf16 %v1110_v8, %v1062_v60  ;;  %v3766_v8 = vld [vmem:[%s5021_s10] sm:$0xff]  }
 0x666   :  { %v3502_v10 = vpop.f32.mrf.mxu0 }
 0x667   :  { %3732 = vrot.lane.b32.xlu0 %v3731_v9, %s4209_s30 }
 0x668   :  { %v1113_v11 = vpop.f32.mrf.mxu0 }
 0x66a   :  { %v3503_v12 = vpop.f32.mrf.mxu0 }
 0x66c   :  { %v1206_v13 = vpop.f32.mrf.mxu0 }
 0x66e   :  { %v3514_v14 = vpop.f32.mrf.mxu0 }
 0x670   :  { %v1209_v16 = vpop.f32.mrf.mxu0 }
 0x672   :  { %v3515_v17 = vpop.f32.mrf.mxu0 }
 0x687   :  { %v1158_v19 = vpop.f32.mrf.mxu1 }
 0x688   :  { %v3736_v54 = vpack.i.bf16 %v1206_v13, %v1158_v19 }
 0x689   :  { %v3508_v58 = vpop.f32.mrf.mxu1 }
 0x68a   :  { %3737 = vrot.lane.b32.xlu1 %v3736_v54, %s4200_s27 }
 0x68b   :  { %v1161_v20 = vpop.f32.mrf.mxu1 }
 0x68c   :  { %v3247_v20 = vld [vmem:[#allocation14] ss:$0 sm:$0xff] }
 0x68d   :  { %v3509_v21 = vpop.f32.mrf.mxu1 }
 0x68f   :  { %v1254_v23 = vpop.f32.mrf.mxu1 }
 0x691   :  { %v3520_v24 = vpop.f32.mrf.mxu1 }
 0x693   :  { %v1257_v25 = vpop.f32.mrf.mxu1 }
 0x694   :  { %v3767_v25 = vld [vmem:[%s5023_s12 + $0x18] sm:$0xff]  }
 0x695   :  { %v3521_v42 = vpop.f32.mrf.mxu1 }
 0x696   :  { %v3768_v42 = vld [vmem:[%s5023_s12 + $0x10] sm:$0xff]  }
 0x697   :  { %v1302_v44 = vpop.f32.mrf.mxu0 }
 0x698   :  { %v3741_v41 = vpack.i.bf16 %v1302_v44, %v1254_v23  ;;  %v3769_v44 = vld [vmem:[%s5023_s12 + $0x8] sm:$0xff]  }
 0x699   :  { %v3526_v26 = vpop.f32.mrf.mxu0 }
 0x69a   :  { %3742 = vrot.lane.b32.xlu0 %v3741_v41, %s4223_s23  ;;  %v3770_v41 = vld [vmem:[%s5023_s12] sm:$0xff]   ;;  %v3248_v26 = vld [vmem:[#allocation16] ss:$0 sm:$0xff] }
 0x69b   :  { %v1305_v27 = vpop.f32.mrf.mxu0 }
 0x69d   :  { %v3527_v28 = vpop.f32.mrf.mxu0 }
 0x6d9   :  { %v3733_v29 = vpop.permute.xlu0 %3732 }
 0x6da   :  { %v3735_v33 = vunpack.i.h.bf16 %v3733_v29  ;;  %v3734_v47 = vunpack.i.l.bf16 %v3733_v29 }
 0x6dc   :  { %v1333_v37 = vsel %vm421_vm2, %v1014_v2, %v3735_v33  ;;  %v1332_v38 = vsel %vm421_vm2, %v966_v62, %v3734_v47 }
 0x6fc   :  { %v3738_v30 = vpop.permute.xlu1 %3737 }
 0x6fd   :  { %v3740_v34 = vunpack.i.h.bf16 %v3738_v30  ;;  %v3739_v35 = vunpack.i.l.bf16 %v3738_v30 }
 0x6ff   :  { %v1336_v45 = vsel %vm1334_vm4, %v1333_v37, %v3740_v34  ;;  %v1335_v55 = vsel %vm1334_vm4, %v1332_v38, %v3739_v35 }
 0x70c   :  { %v3743_v36 = vpop.permute.xlu0 %3742 }
 0x70d   :  { %v3745_v39 = vunpack.i.h.bf16 %v3743_v36  ;;  %v3744_v40 = vunpack.i.l.bf16 %v3743_v36 }
 0x70f   :  { %v1339_v43 = vsel %vm1337_vm5, %v1336_v45, %v3745_v39  ;;  %v1338_v46 = vsel %vm1337_vm5, %v1335_v55, %v3744_v40 }
 0x710   :  { %v1344_v48 = vpack.c.bf16 %v1339_v43, %v1338_v46 }
 0x712   :  { %3533 = vmatmul.mubr.msk.bf16.vlgmr.msra.gmra.mxu1 %vm244_vm0, %v1344_v48 }
 0x713   :  { %3552 = vmatprep.mubr.msk.bf16.mxu1 %vm4217_vm1, %v4216_v15  ;;  %3545 = vmatpush3.bf16.msra.mxu1 %v3767_v25 }
 0x714   :  { %3546 = vmatprep.subr.bf16.mxu1 %v4216_v15 }
 0x717   :  { %3547 = vmatpush3.bf16.msra.mxu1 %v3768_v42 }
 0x718   :  { %3548 = vmatprep.subr.bf16.mxu1 %v4216_v15 }
 0x71b   :  { %3549 = vmatpush3.bf16.msra.mxu1 %v3769_v44  ;;  %v3259_v44 = vld [vmem:[#allocation20] ss:$0 sm:$0xff] }
 0x71c   :  { %3550 = vmatprep.subr.bf16.mxu1 %v4216_v15 }
 0x71f   :  { %3551 = vmatpush3.bf16.msra.mxu1 %v3770_v41 }
 0x720   :  { %3570 = vmatprep.subr.bf16.mxu1 %v4216_v15 }
 0x7d2   :  { %v1401_v51 = vpop.f32.mrf.mxu1 }
 0x7d3   :  { %v1402_v52 = vadd.f32 %v3242_v49, %v1401_v51 }
 0x7d4   :  { %v3534_v53 = vpop.f32.mrf.mxu1 }
 0x7d5   :  { %v1408_v56 = vadd.f32 %v1402_v52, %v4423_v31 }
 0x7d6   :  { %v1404_v57 = vpop.f32.mrf.mxu1 }
 0x7d7   :  { %v1405_v59 = vadd.f32 %v3242_v49, %v1404_v57  ;;  %v1410_v61 = vsel %vm244_vm0, %v1408_v56, 0.0 }
 0x7d8   :  { %1411 = vadd.xlane.f32.xlu1 %v1410_v61  ;;  %v3535_v62 = vpop.f32.mrf.mxu1  ;;  %v3252_v61 = vld [vmem:[#allocation17] ss:$0 sm:$0xff] }
 0x7d9   :  { %v1409_v63 = vadd.f32 %v1405_v59, %v4425_v32  ;;  %v3765_v32 = vld [vmem:[%s5021_s10 + $0x8] sm:$0xff]  }
 0x7da   :  { %3537 = vmatpush3.bf16.msra.mxu0 %v3765_v32 }
 0x7db   :  { %v1413_v0 = vsel %vm244_vm0, %v1409_v63, 0.0  ;;  %3538 = vmatprep.subr.bf16.mxu0 %v4216_v15 }
 0x7dc   :  { %1414 = vadd.xlane.f32.xlu0 %v1413_v0 }
 0x7de   :  { %3539 = vmatpush3.bf16.msra.mxu0 %v3766_v8 }
 0x7df   :  { %3556 = vmatprep.subr.bf16.mxu0 %v4216_v15 }
 0x861   :  { %v1412_v1 = vpop.xlane.xlu1 %1411 }
 0x862   :  { %v1416_v2 = vmul.f32 0.03125, %v1412_v1 }
 0x864   :  { %v1418_v3 = vsub.f32 %v1408_v56, %v1416_v2 }
 0x865   :  { %v1415_v50 = vpop.xlane.xlu0 %1414 }
 0x866   :  { %v1417_v4 = vmul.f32 0.03125, %v1415_v50  ;;  %v1420_v60 = vmul.f32 %v1418_v3, %v1418_v3 }
 0x868   :  { %v1419_v5 = vsub.f32 %v1409_v63, %v1417_v4  ;;  %v1422_v31 = vsel %vm244_vm0, %v1420_v60, 0.0 }
 0x869   :  { %1423 = vadd.xlane.f32.xlu0 %v1422_v31 }
 0x86a   :  { %v1421_v6 = vmul.f32 %v1419_v5, %v1419_v5 }
 0x86c   :  { %v1425_v7 = vsel %vm244_vm0, %v1421_v6, 0.0 }
 0x86d   :  { %1426 = vadd.xlane.f32.xlu0 %v1425_v7 }
 0x8f2   :  { %v1424_v9 = vpop.xlane.xlu0 %1423 }
 0x8f3   :  { %v1428_v10 = vmul.f32 0.03125, %v1424_v9 }
 0x8f5   :  { %v1430_v11 = vadd.f32 1e-12, %v1428_v10 }
 0x8f6   :  { %v1427_v12 = vpop.xlane.xlu0 %1426 }
 0x8f7   :  { %3821 = vrsqrt.f32 %v1430_v11  ;;  %v1429_v13 = vmul.f32 0.03125, %v1427_v12 }
 0x8f9   :  { %v1431_v14 = vadd.f32 1e-12, %v1429_v13 }
 0x8fb   :  { %3823 = vrsqrt.f32 %v1431_v14  ;;  %v3771_v14 = vld [vmem:[%s5045_s3 + $0x18] sm:$0xff]  }
 0x904   :  { %v3822_v16 = vpop.eup %3821 }
 0x905   :  { %v1434_v17 = vmul.f32 %v3822_v16, %v1418_v3  ;;  %v3772_v16 = vld [vmem:[%s5045_s3 + $0x10] sm:$0xff]   ;;  %s3196_s3 = sshll.u32 %s4224_s24, 4  ;;  %s3197_s3 = int_to_ptr.vmem [resolvable:$true] %s3196_s3 }
 0x906   :  { %p4146_p10 = scmp.lt.s32.totalorder %s3197_s3, %s3197_s3 }
 0x907   :  { %v1442_v58 = vmul.f32 %v3246_v18, %v1434_v17 }
 0x908   :  { %v3824_v19 = vpop.eup %3823 }
 0x909   :  { %v1435_v54 = vmul.f32 %v3824_v19, %v1419_v5  ;;  %v1450_v22 = vadd.f32 %v3247_v20, %v1442_v58 }
 0x90b   :  { %v1443_v21 = vmul.f32 %v3246_v18, %v1435_v54 }
 0x90d   :  { %v1451_v23 = vadd.f32 %v3247_v20, %v1443_v21 }
 0x90f   :  { %v1456_v24 = vpack.c.bf16 %v1451_v23, %v1450_v22 }
 0x911   :  { %3541 = vmatmul.mubr.msk.bf16.vlgmr.msra.gmra.mxu0 %vm244_vm0, %v1456_v24 }
 0x912   :  { %3560 = vmatprep.mubr.msk.bf16.mxu0 %vm4217_vm1, %v4216_v15  ;;  %3557 = vmatpush3.bf16.msra.mxu0 %v3771_v14 }
 0x913   :  { %3558 = vmatprep.subr.bf16.mxu0 %v4216_v15 }
 0x916   :  { %3559 = vmatpush3.bf16.msra.mxu0 %v3772_v16 }
 0x917   :  { %3564 = vmatprep.subr.bf16.mxu0 %v4216_v15 }
 0x9d1   :  { %v1513_v27 = vpop.f32.mrf.mxu0 }
 0x9d2   :  { %v1514_v28 = vadd.f32 %v3248_v26, %v1513_v27 }
 0x9d3   :  { %v3542_v29 = vpop.f32.mrf.mxu0 }
 0x9d4   :  { %v1522_v30 = vmul.f32 0.044715, %v1514_v28  ;;  %v1520_v51 = vmul.f32 0.5, %v1514_v28  ;;  %v3264_v29 = vld [vmem:[#allocation10 + $0x1] ss:$0 sm:$0xff] }
 0x9d5   :  { %v1516_v33 = vpop.f32.mrf.mxu0 }
 0x9d6   :  { %v1524_v47 = vmul.f32 %v1522_v30, %v1514_v28  ;;  %v1517_v34 = vadd.f32 %v3248_v26, %v1516_v33 }
 0x9d7   :  { %v3543_v35 = vpop.f32.mrf.mxu0 }
 0x9d8   :  { %v1526_v36 = vmul.f32 %v1524_v47, %v1514_v28  ;;  %v1523_v37 = vmul.f32 0.044715, %v1517_v34  ;;  %v1521_v52 = vmul.f32 0.5, %v1517_v34 }
 0x9da   :  { %v1528_v38 = vadd.f32 %v1526_v36, %v1514_v28  ;;  %v1525_v39 = vmul.f32 %v1523_v37, %v1517_v34 }
 0x9dc   :  { %v1530_v40 = vmul.f32 0.7978846, %v1528_v38  ;;  %v1527_v45 = vmul.f32 %v1525_v39, %v1517_v34 }
 0x9de   :  { %3825 = vtanh.f32 %v1530_v40  ;;  %v1529_v55 = vadd.f32 %v1527_v45, %v1517_v34 }
 0x9e0   :  { %v1531_v43 = vmul.f32 0.7978846, %v1529_v55 }
 0x9e2   :  { %3827 = vtanh.f32 %v1531_v43 }
 0x9eb   :  { %v3826_v46 = vpop.eup %3825 }
 0x9ec   :  { %v1534_v48 = vadd.f32 1.0, %v3826_v46 }
 0x9ee   :  { %v1536_v56 = vmul.f32 %v1534_v48, %v1520_v51 }
 0x9ef   :  { %v3828_v49 = vpop.eup %3827 }
 0x9f0   :  { %v1535_v53 = vadd.f32 1.0, %v3828_v49 }
 0x9f2   :  { %v1537_v57 = vmul.f32 %v1535_v53, %v1521_v52 }
 0x9f4   :  { %v1546_v59 = vpack.c.bf16 %v1537_v57, %v1536_v56 }
 0x9f6   :  { %3553 = vmatmul.mubr.msk.bf16.vlgmr.msra.gmra.mxu1 %vm1578_vm6, %v1546_v59 }
 0x9f7   :  { %3572 = vmatprep.mubr.msk.bf16.mxu1 %vm4217_vm1, %v4216_v15 }
 0xab6   :  { %v1616_v62 = vpop.f32.mrf.mxu1 }
 0xab7   :  { %v1617_v63 = vadd.f32 %v3252_v61, %v1616_v62 }
 0xab8   :  { %v3554_v0 = vpop.f32.mrf.mxu1 }
 0xab9   :  { %v1623_v1 = vadd.f32 %v1617_v63, %v1450_v22 }
 0xaba   :  { %v1619_v2 = vpop.f32.mrf.mxu1 }
 0xabb   :  { %v1620_v3 = vadd.f32 %v3252_v61, %v1619_v2  ;;  %v1625_v50 = vsel %vm244_vm0, %v1623_v1, 0.0 }
 0xabc   :  { %1626 = vadd.xlane.f32.xlu1 %v1625_v50  ;;  %v3555_v4 = vpop.f32.mrf.mxu1 }
 0xabd   :  { %v1624_v60 = vadd.f32 %v1620_v3, %v1451_v23  ;;  %v3258_v23 = vld [vmem:[#allocation19] ss:$0 sm:$0xff] }
 0xabf   :  { %v1628_v5 = vsel %vm244_vm0, %v1624_v60, 0.0 }
 0xac0   :  { %1629 = vadd.xlane.f32.xlu0 %v1628_v5 }
 0xb45   :  { %v1627_v31 = vpop.xlane.xlu1 %1626 }
 0xb46   :  { %v1631_v6 = vmul.f32 0.03125, %v1627_v31 }
 0xb48   :  { %v1633_v7 = vsub.f32 %v1623_v1, %v1631_v6 }
 0xb49   :  { %v1630_v32 = vpop.xlane.xlu0 %1629 }
 0xb4a   :  { %v1632_v8 = vmul.f32 0.03125, %v1630_v32  ;;  %v1635_v9 = vmul.f32 %v1633_v7, %v1633_v7 }
 0xb4c   :  { %v1634_v10 = vsub.f32 %v1624_v60, %v1632_v8  ;;  %v1637_v11 = vsel %vm244_vm0, %v1635_v9, 0.0 }
 0xb4d   :  { %1638 = vadd.xlane.f32.xlu1 %v1637_v11 }
 0xb4e   :  { %v1636_v12 = vmul.f32 %v1634_v10, %v1634_v10 }
 0xb50   :  { %v1640_v13 = vsel %vm244_vm0, %v1636_v12, 0.0 }
 0xb51   :  { %1641 = vadd.xlane.f32.xlu0 %v1640_v13 }
 0xbd6   :  { %v1639_v17 = vpop.xlane.xlu1 %1638 }
 0xbd7   :  { %v1643_v18 = vmul.f32 0.03125, %v1639_v17 }
 0xbd9   :  { %v1645_v19 = vadd.f32 1e-12, %v1643_v18 }
 0xbda   :  { %v1642_v54 = vpop.xlane.xlu0 %1641 }
 0xbdb   :  { %3829 = vrsqrt.f32 %v1645_v19  ;;  %v1644_v58 = vmul.f32 0.03125, %v1642_v54 }
 0xbdd   :  { %v1646_v20 = vadd.f32 1e-12, %v1644_v58 }
 0xbdf   :  { %3831 = vrsqrt.f32 %v1646_v20 }
 0xbe8   :  { %v3830_v21 = vpop.eup %3829 }
 0xbe9   :  { %v1649_v22 = vmul.f32 %v3830_v21, %v1633_v7 }
 0xbeb   :  { %v1657_v42 = vmul.f32 %v3258_v23, %v1649_v22 }
 0xbec   :  { %v3832_v24 = vpop.eup %3831 }
 0xbed   :  { %v1650_v25 = vmul.f32 %v3832_v24, %v1634_v10  ;;  %v4711_v26 = vadd.f32 %v3259_v44, %v1657_v42 }
 0xbef   :  { %v1658_v41 = vmul.f32 %v3258_v23, %v1650_v25  ;;  %v3879_v25 = vld [vmem:[#allocation5 + $0x1] ss:$0 sm:$0xff] }
 0xbf1   :  { %v4713_v27 = vadd.f32 %v3259_v44, %v1658_v41 }
 0xbf3   :  { %v1680_v28 = vpack.c.bf16 %v4713_v27, %v4711_v26 }
 0xbf5   :  { %3561 = vmatmul.mubr.msk.bf16.vlgmr.msra.gmra.mxu0 %vm244_vm0, %v1680_v28 }
 0xbf6   :  { %3566 = vmatprep.mubr.msk.bf16.mxu0 %vm4217_vm1, %v4216_v15 }
 0xcb5   :  { %v1738_v30 = vpop.f32.mrf.mxu0 }
 0xcb6   :  { %v1739_v33 = vadd.f32 %v3264_v29, %v1738_v30  ;;  %v3880_v30 = vld [vmem:[#allocation5] ss:$0 sm:$0xff] }
 0xcb7   :  { %v3562_v47 = vpop.f32.mrf.mxu0 }
 0xcb8   :  { %1747 = vrot.lane.b32.xlu1 %v1739_v33, %s4218_s28  ;;  %v1781_v38 = vpack.c.bf16 %v1739_v33, %v1739_v33  ;;  %v1765_v1 = vmul.f32 0.35355338, %v1739_v33 }
 0xcb9   :  { %v1741_v34 = vpop.f32.mrf.mxu0 }
 0xcba   :  { %v1742_v35 = vadd.f32 %v3264_v29, %v1741_v34  ;;  %v1773_v2 = vpack.c.bf16 %v1765_v1, %v1765_v1 }
 0xcbb   :  { %v3563_v36 = vpop.f32.mrf.mxu0 }
 0xcbc   :  { %1753 = vrot.lane.b32.xlu1 %v1739_v33, %s4221_s29  ;;  %1749 = vrot.lane.b32.xlu0 %v1742_v35, %s4218_s28  ;;  %v4725_v37 = vpack.c.bf16 %v1742_v35, %v1742_v35  ;;  %v1766_v61 = vmul.f32 0.35355338, %v1742_v35  ;;  %s4141_s28 = scalar_lea.vmem %s3197_s3, 2048 }
 0xcbd   :  { %p4142_p9 = scmp.ne.s32.totalorder %s3197_s3, %s4141_s28  ;;  %p4147_p11 = scmp.lt.s32.totalorder %s4141_s28, %s4141_s28 }
 0xcbe   :  { %v1774_v0 = vpack.c.bf16 %v1766_v61, %v1766_v61 }
 0xcbf   :  { %p4148_p12 = por %p4147_p11, %p4146_p10 }
 0xcc0   :  { %1755 = vrot.lane.b32.xlu1 %v1742_v35, %s4221_s29  ;;  %1761 = vrot.lane.b32.xlu0 %v1742_v35, %s4219_s2 }
 0xcc1   :  { %p4149_p13 = pnand %p4148_p12, %p4142_p9 }
 0xcc4   :  { %1759 = vrot.lane.b32.xlu1 %v1739_v33, %s4219_s2  ;;  %1839 = vrot.lane.b32.xlu0 %v4725_v37, %s4220_s25 }
 0xcc8   :  { %1790 = vrot.lane.b32.xlu1 %v1781_v38, %s4220_s25 }
 0xd2a   :  { %v1748_v39 = vpop.permute.xlu1 %1747 }
 0xd2b   :  { %v4731_v40 = vpack.c.bf16 %v1748_v39, %v1748_v39  ;;  %v1767_v4 = vmul.f32 0.35355338, %v1748_v39 }
 0xd2d   :  { %1888 = vrot.lane.b32.xlu1 %v4731_v40, %s4220_s25  ;;  %v1775_v6 = vpack.c.bf16 %v1767_v4, %v1767_v4 }
 0xd2e   :  { %v1754_v45 = vpop.permute.xlu1 %1753  ;;  %v1750_v55 = vpop.permute.xlu0 %1749 }
 0xd2f   :  { %v4735_v43 = vpack.c.bf16 %v1754_v45, %v1754_v45  ;;  %v4737_v46 = vpack.c.bf16 %v1750_v55, %v1750_v55  ;;  %v1768_v7 = vmul.f32 0.35355338, %v1750_v55  ;;  %v1769_v9 = vmul.f32 0.35355338, %v1754_v45 }
 0xd31   :  { %1986 = vrot.lane.b32.xlu1 %v4735_v43, %s4220_s25  ;;  %1937 = vrot.lane.b32.xlu0 %v4737_v46, %s4220_s25  ;;  %v1776_v10 = vpack.c.bf16 %v1768_v7, %v1768_v7  ;;  %v1777_v13 = vpack.c.bf16 %v1769_v9, %v1769_v9 }
 0xd32   :  { %v1756_v48 = vpop.permute.xlu1 %1755  ;;  %v4743_v49 = vpop.permute.xlu0 %1761 }
 0xd33   :  { %v4745_v51 = vpack.c.bf16 %v1756_v48, %v1756_v48  ;;  %v4751_v56 = vpack.c.bf16 %v4743_v49, %v4743_v49  ;;  %v1770_v14 = vmul.f32 0.35355338, %v1756_v48  ;;  %v1772_v20 = vmul.f32 0.35355338, %v4743_v49 }
 0xd35   :  { %2035 = vrot.lane.b32.xlu0 %v4745_v51, %s4220_s25  ;;  %v1778_v18 = vpack.c.bf16 %v1770_v14, %v1770_v14  ;;  %v1780_v23 = vpack.c.bf16 %v1772_v20, %v1772_v20 }
 0xd36   :  { %v1760_v52 = vpop.permute.xlu1 %1759  ;;  %v1840_v53 = vpop.permute.xlu0 %1839 }
 0xd37   :  { %v4753_v57 = vpack.c.bf16 %v1760_v52, %v1760_v52  ;;  %v1845_v59 = vsel %vm421_vm2, %v1840_v53, 0  ;;  %v1771_v19 = vmul.f32 0.35355338, %v1760_v52 }
 0xd38   :  { %3571 = vmatpush3.bf16.xpose.msra.mxu1 %v1845_v59 }
 0xd39   :  { %2084 = vrot.lane.b32.xlu1 %v4753_v57, %s4220_s25  ;;  %2133 = vrot.lane.b32.xlu0 %v4751_v56, %s4220_s25  ;;  %v1779_v21 = vpack.c.bf16 %v1771_v19, %v1771_v19 }
 0xd3a   :  { %v1791_v62 = vpop.permute.xlu1 %1790  ;;  %3582 = vmatprep.subr.bf16.mxu1 %v4216_v15 }
 0xd3b   :  { %v1796_v63 = vsel %vm421_vm2, %v1791_v62, 0 }
 0xd3c   :  { %3565 = vmatpush3.bf16.xpose.msra.mxu0 %v1796_v63 }
 0xd3d   :  { %2294 = vrot.lane.b32.xlu1 %v1781_v38, %s4222_s0  ;;  %3576 = vmatprep.subr.bf16.mxu0 %v4216_v15 }
 0xd3f   :  { %3573 = vmatmul.mubr.msk.bf16.vlgmr.msra.gmra.mxu1 %vm421_vm2, %v1774_v0 }
 0xd40   :  { %3584 = vmatprep.mubr.msk.bf16.mxu1 %vm4217_vm1, %v4216_v15 }
 0xd43   :  { %3567 = vmatmul.mubr.msk.bf16.vlgmr.msra.gmra.mxu0 %vm421_vm2, %v1773_v2 }
 0xd44   :  { %3578 = vmatprep.mubr.msk.bf16.mxu0 %vm4217_vm1, %v4216_v15 }
 0xd9f   :  { %v1889_v3 = vpop.permute.xlu1 %1888 }
 0xda0   :  { %v1894_v50 = vsel %vm421_vm2, %v1889_v3, 0 }
 0xda1   :  { %3577 = vmatpush3.bf16.xpose.msra.mxu0 %v1894_v50 }
 0xda2   :  { %3588 = vmatprep.subr.bf16.mxu0 %v4216_v15 }
 0xda3   :  { %v1938_v60 = vpop.permute.xlu0 %1937  ;;  %v1987_v31 = vpop.permute.xlu1 %1986 }
 0xda4   :  { %v1943_v5 = vsel %vm421_vm2, %v1938_v60, 0  ;;  %v1992_v32 = vsel %vm421_vm2, %v1987_v31, 0 }
 0xda5   :  { %3583 = vmatpush3.bf16.xpose.msra.mxu1 %v1943_v5 }
 0xda6   :  { %3594 = vmatprep.subr.bf16.mxu1 %v4216_v15 }
 0xda7   :  { %v2036_v8 = vpop.permute.xlu0 %2035 }
 0xda8   :  { %3579 = vmatmul.mubr.msk.bf16.vlgmr.msra.gmra.mxu0 %vm421_vm2, %v1775_v6  ;;  %v2041_v11 = vsel %vm421_vm2, %v2036_v8, 0 }
 0xda9   :  { %3589 = vmatpush3.bf16.xpose.msra.mxu0 %v1992_v32  ;;  %3590 = vmatprep.mubr.msk.bf16.mxu0 %vm4217_vm1, %v4216_v15 }
 0xdaa   :  { %3600 = vmatprep.subr.bf16.mxu0 %v4216_v15 }
 0xdab   :  { %v2085_v12 = vpop.permute.xlu1 %2084  ;;  %v2134_v17 = vpop.permute.xlu0 %2133 }
 0xdac   :  { %3585 = vmatmul.mubr.msk.bf16.vlgmr.msra.gmra.mxu1 %vm421_vm2, %v1776_v10  ;;  %v2090_v16 = vsel %vm421_vm2, %v2085_v12, 0  ;;  %v2139_v54 = vsel %vm421_vm2, %v2134_v17, 0 }
 0xdad   :  { %3595 = vmatpush3.bf16.xpose.msra.mxu1 %v2041_v11  ;;  %3596 = vmatprep.mubr.msk.bf16.mxu1 %vm4217_vm1, %v4216_v15 }
 0xdae   :  { %3606 = vmatprep.subr.bf16.mxu1 %v4216_v15 }
 0xdaf   :  { %v2295_v58 = vpop.permute.xlu1 %2294 }
 0xdb0   :  { %3591 = vmatmul.mubr.msk.bf16.vlgmr.msra.gmra.mxu0 %vm421_vm2, %v1777_v13  ;;  %v2300_v22 = vsel %vm928_vm3, %v2295_v58, 0 }
 0xdb1   :  { %3601 = vmatpush3.bf16.xpose.msra.mxu0 %v2090_v16  ;;  %3602 = vmatprep.mubr.msk.bf16.mxu0 %vm4217_vm1, %v4216_v15 }
 0xdb2   :  { %3612 = vmatprep.subr.bf16.mxu0 %v4216_v15 }
 0xdb4   :  { %3597 = vmatmul.mubr.msk.bf16.vlgmr.msra.gmra.mxu1 %vm421_vm2, %v1778_v18 }
 0xdb5   :  { %3607 = vmatpush3.bf16.xpose.msra.mxu1 %v2139_v54  ;;  %3608 = vmatprep.mubr.msk.bf16.mxu1 %vm4217_vm1, %v4216_v15 }
 0xdb6   :  { %3618 = vmatprep.subr.bf16.mxu1 %v4216_v15 }
 0xdb8   :  { %3603 = vmatmul.mubr.msk.bf16.vlgmr.msra.gmra.mxu0 %vm421_vm2, %v1779_v21 }
 0xdb9   :  { %3613 = vmatpush3.bf16.msra.mxu0 %v2300_v22  ;;  %3614 = vmatprep.mubr.msk.bf16.mxu0 %vm4217_vm1, %v4216_v15 }
 0xdba   :  { %3624 = vmatprep.subr.bf16.mxu0 %v4216_v15 }
 0xdbc   :  { %3609 = vmatmul.mubr.msk.bf16.vlgmr.msra.gmra.mxu1 %vm421_vm2, %v1780_v23 }
 0xdbd   :  { %3620 = vmatprep.mubr.msk.bf16.mxu1 %vm4217_vm1, %v4216_v15 }
 0xdff   :  { %v1881_v24 = vpop.f32.mrf.mxu1 }
 0xe00   :  { %v4803_v42 = vadd.f32 %v3879_v25, %v1881_v24 }
 0xe01   :  { %v3574_v44 = vpop.f32.mrf.mxu1 }
 0xe02   :  { %v2184_v41 = vsel %vm421_vm2, %v4803_v42, -inf }
 0xe03   :  { %2185 = vmax.xlane.f32.xlu0 %v2184_v41  ;;  %v1832_v28 = vpop.f32.mrf.mxu0  ;;  %v1884_v29 = vpop.f32.mrf.mxu1 }
 0xe04   :  { %v1833_v33 = vadd.f32 %v3880_v30, %v1832_v28 }
 0xe05   :  { %v3568_v47 = vpop.f32.mrf.mxu0  ;;  %v3575_v34 = vpop.f32.mrf.mxu1 }
 0xe06   :  { %v2181_v35 = vsel %vm421_vm2, %v1833_v33, -inf }
 0xe07   :  { %2182 = vmax.xlane.f32.xlu1 %v2181_v35  ;;  %v1835_v36 = vpop.f32.mrf.mxu0 }
 0xe09   :  { %v3569_v38 = vpop.f32.mrf.mxu0 }
 0xe68   :  { %v1930_v39 = vpop.f32.mrf.mxu0 }
 0xe69   :  { %v1931_v45 = vadd.f32 %v3880_v30, %v1930_v39 }
 0xe6a   :  { %v3580_v55 = vpop.f32.mrf.mxu0 }
 0xe6b   :  { %v2187_v48 = vsel %vm421_vm2, %v1931_v45, -inf }
 0xe6c   :  { %v1979_v49 = vpop.f32.mrf.mxu1  ;;  %2188 = vmax.xlane.f32.xlu0 %v2187_v48  ;;  %v1933_v52 = vpop.f32.mrf.mxu0 }
 0xe6d   :  { %v1980_v53 = vadd.f32 %v3879_v25, %v1979_v49 }
 0xe6e   :  { %v3581_v59 = vpop.f32.mrf.mxu0  ;;  %v3586_v61 = vpop.f32.mrf.mxu1 }
 0xe6f   :  { %v2190_v62 = vsel %vm421_vm2, %v1980_v53, -inf }
 0xe70   :  { %v1982_v63 = vpop.f32.mrf.mxu1  ;;  %2191 = vmax.xlane.f32.xlu0 %v2190_v62  ;;  %v2028_v0 = vpop.f32.mrf.mxu0 }
 0xe71   :  { %v2029_v1 = vadd.f32 %v3880_v30, %v2028_v0 }
 0xe72   :  { %v3587_v2 = vpop.f32.mrf.mxu1  ;;  %v3592_v3 = vpop.f32.mrf.mxu0 }
 0xe73   :  { %v2193_v50 = vsel %vm421_vm2, %v2029_v1, -inf }
 0xe74   :  { %v2077_v4 = vpop.f32.mrf.mxu1  ;;  %2194 = vmax.xlane.f32.xlu1 %v2193_v50  ;;  %v2031_v60 = vpop.f32.mrf.mxu0 }
 0xe75   :  { %v4811_v5 = vadd.f32 %v3879_v25, %v2077_v4 }
 0xe76   :  { %v3593_v31 = vpop.f32.mrf.mxu0  ;;  %v3598_v6 = vpop.f32.mrf.mxu1 }
 0xe77   :  { %v2196_v7 = vsel %vm421_vm2, %v4811_v5, -inf }
 0xe78   :  { %v2080_v32 = vpop.f32.mrf.mxu1  ;;  %2197 = vmax.xlane.f32.xlu0 %v2196_v7  ;;  %v2126_v8 = vpop.f32.mrf.mxu0 }
 0xe79   :  { %v2127_v9 = vadd.f32 %v3880_v30, %v2126_v8 }
 0xe7a   :  { %v3599_v10 = vpop.f32.mrf.mxu1  ;;  %v3604_v11 = vpop.f32.mrf.mxu0 }
 0xe7b   :  { %v2199_v12 = vsel %vm421_vm2, %v2127_v9, -inf }
 0xe7c   :  { %v2175_v13 = vpop.f32.mrf.mxu1  ;;  %2200 = vmax.xlane.f32.xlu1 %v2199_v12  ;;  %v2129_v14 = vpop.f32.mrf.mxu0 }
 0xe7d   :  { %v4816_v16 = vadd.f32 %v3879_v25, %v2175_v13 }
 0xe7e   :  { %v3605_v17 = vpop.f32.mrf.mxu0  ;;  %v3610_v18 = vpop.f32.mrf.mxu1 }
 0xe7f   :  { %v2202_v19 = vsel %vm421_vm2, %v4816_v16, -inf }
 0xe80   :  { %v2178_v54 = vpop.f32.mrf.mxu1  ;;  %2203 = vmax.xlane.f32.xlu0 %v2202_v19 }
 0xe82   :  { %v3611_v58 = vpop.f32.mrf.mxu1 }
 0xe8c   :  { %v2186_v20 = vpop.xlane.xlu0 %2185 }
 0xe8d   :  { %2390 = vrot.lane.b32.xlu1 %v4731_v40, %s4222_s0  ;;  %v2206_v22 = vsub.f32 %v4803_v42, %v2186_v20 }
 0xe8f   :  { %v2215_v24 = vmul.f32 1.442695, %v2206_v22 }
 0xe90   :  { %v2183_v21 = vpop.xlane.xlu1 %2182 }
 0xe91   :  { %2438 = vrot.lane.b32.xlu1 %v4737_v46, %s4222_s0  ;;  %v2205_v23 = vsub.f32 %v1833_v33, %v2183_v21  ;;  %3833 = vpow2.f32 %v2215_v24 }
 0xe93   :  { %v2213_v25 = vmul.f32 1.442695, %v2205_v23 }
 0xe95   :  { %3835 = vpow2.f32 %v2213_v25 }
 0xe96   :  { %2342 = vrot.lane.b32.xlu0 %v4725_v37, %s4222_s0 }
 0xe9e   :  { %v4827_v44 = vpop.eup %3833 }
 0xe9f   :  { %v2232_v40 = vsel %vm421_vm2, %v4827_v44, 0.0 }
 0xea2   :  { %v4829_v41 = vpop.eup %3835 }
 0xea3   :  { %v2229_v46 = vsel %vm421_vm2, %v4829_v41, 0.0 }
 0xeb5   :  { %2233 = vadd.xlane.f32.xlu0 %v2232_v40  ;;  %2230 = vadd.xlane.f32.xlu1 %v2229_v46 }
 0xec6   :  { %2486 = vrot.lane.b32.xlu1 %v4735_v43, %s4222_s0 }
 0xef5   :  { %v2189_v37 = vpop.xlane.xlu0 %2188 }
 0xef6   :  { %v2207_v42 = vsub.f32 %v1931_v45, %v2189_v37 }
 0xef8   :  { %v2217_v28 = vmul.f32 1.442695, %v2207_v42 }
 0xef9   :  { %v2192_v29 = vpop.xlane.xlu0 %2191 }
 0xefa   :  { %3837 = vpow2.f32 %v2217_v28  ;;  %v2208_v30 = vsub.f32 %v1980_v53, %v2192_v29 }
 0xefc   :  { %v2219_v33 = vmul.f32 1.442695, %v2208_v30 }
 0xefd   :  { %v2195_v47 = vpop.xlane.xlu1 %2194 }
 0xefe   :  { %3839 = vpow2.f32 %v2219_v33  ;;  %v2209_v34 = vsub.f32 %v2029_v1, %v2195_v47 }
 0xf00   :  { %v2221_v35 = vmul.f32 1.442695, %v2209_v34 }
 0xf01   :  { %v2198_v36 = vpop.xlane.xlu0 %2197 }
 0xf02   :  { %3841 = vpow2.f32 %v2221_v35  ;;  %v2210_v1 = vsub.f32 %v4811_v5, %v2198_v36 }
 0xf04   :  { %v2223_v2 = vmul.f32 1.442695, %v2210_v1 }
 0xf05   :  { %v2201_v38 = vpop.xlane.xlu1 %2200 }
 0xf06   :  { %v2211_v39 = vsub.f32 %v2127_v9, %v2201_v38 }
 0xf07   :  { %v4837_v55 = vpop.eup %3837 }
 0xf08   :  { %v2225_v48 = vmul.f32 1.442695, %v2211_v39  ;;  %v2235_v43 = vsel %vm421_vm2, %v4837_v55, 0.0 }
 0xf09   :  { %v2204_v45 = vpop.xlane.xlu0 %2203  ;;  %2236 = vadd.xlane.f32.xlu1 %v2235_v43  ;;  %v2391_v4 = vpop.permute.xlu1 %2390 }
 0xf0a   :  { %3843 = vpow2.f32 %v2225_v48  ;;  %v2212_v3 = vsub.f32 %v4816_v16, %v2204_v45  ;;  %v2396_v17 = vsel %vm928_vm3, %v2391_v4, 0 }
 0xf0b   :  { %v4841_v49 = vpop.eup %3839  ;;  %3845 = vpow2.f32 %v2223_v2 }
 0xf0c   :  { %v2238_v52 = vsel %vm421_vm2, %v4841_v49, 0.0  ;;  %v2227_v50 = vmul.f32 1.442695, %v2212_v3 }
 0xf0d   :  { %2239 = vadd.xlane.f32.xlu0 %v2238_v52  ;;  %v2343_v53 = vpop.permute.xlu0 %2342  ;;  %v2439_v60 = vpop.permute.xlu1 %2438 }
 0xf0e   :  { %v2348_v59 = vsel %vm928_vm3, %v2343_v53, 0  ;;  %3847 = vpow2.f32 %v2227_v50  ;;  %v2444_v16 = vsel %vm928_vm3, %v2439_v60, 0 }
 0xf0f   :  { %v4846_v61 = vpop.eup %3841  ;;  %3619 = vmatpush3.bf16.msra.mxu1 %v2348_v59 }
 0xf10   :  { %v2241_v62 = vsel %vm421_vm2, %v4846_v61, 0.0  ;;  %3630 = vmatprep.subr.bf16.mxu1 %v4216_v15 }
 0xf11   :  { %2242 = vadd.xlane.f32.xlu1 %v2241_v62 }
 0xf17   :  { %v4851_v63 = vpop.eup %3843 }
 0xf18   :  { %v2247_v0 = vsel %vm421_vm2, %v4851_v63, 0.0  ;;  %v4861_v31 = vpop.eup %3845 }
 0xf19   :  { %2248 = vadd.xlane.f32.xlu1 %v2247_v0 }
 0xf1b   :  { %v4865_v5 = vpop.eup %3847 }
 0xf23   :  { %2534 = vrot.lane.b32.xlu0 %v4745_v51, %s4222_s0  ;;  %v2244_v51 = vsel %vm421_vm2, %v4861_v31, 0.0 }
 0xf2a   :  { %2582 = vrot.lane.b32.xlu1 %v4753_v57, %s4222_s0  ;;  %v2250_v57 = vsel %vm421_vm2, %v4865_v5, 0.0 }
 0xf3e   :  { %v2234_v6 = vpop.xlane.xlu0 %2233  ;;  %v2231_v7 = vpop.xlane.xlu1 %2230 }
 0xf3f   :  { %3849 = vrcp.f32 %v2234_v6 }
 0xf40   :  { %3851 = vrcp.f32 %v2231_v7 }
 0xf42   :  { %2245 = vadd.xlane.f32.xlu0 %v2244_v51  ;;  %v2487_v18 = vpop.permute.xlu1 %2486 }
 0xf46   :  { %2251 = vadd.xlane.f32.xlu0 %v2250_v57 }
 0xf4c   :  { %v3850_v32 = vpop.eup %3849 }
 0xf4d   :  { %v3852_v8 = vpop.eup %3851  ;;  %v2256_v9 = vmul.f32 %v3850_v32, %v4827_v44  ;;  %v2492_v44 = vsel %vm928_vm3, %v2487_v18, 0 }
 0xf4e   :  { %v2254_v10 = vmul.f32 %v3852_v8, %v4829_v41 }
 0xf4f   :  { %v2270_v11 = vsel %vm421_vm2, %v2256_v9, 0.0  ;;  %v2287_v12 = vpack.c.bf16 %v2256_v9, %v2256_v9 }
 0xf50   :  { %v2269_v13 = vsel %vm421_vm2, %v2254_v10, 0.0  ;;  %v2286_v14 = vpack.c.bf16 %v2254_v10, %v2254_v10  ;;  %2279 = vst [vmem:[#allocation24 + $0x48] sm:$0xff] %v2270_v11 }
 0xf51   :  { %2278 = vst [vmem:[#allocation24 + $0x40] sm:$0xff] %v2269_v13  ;;  %3621 = vmatmul.mubr.msk.bf16.vlgmr.msra.gmra.mxu1 %vm421_vm2, %v2287_v12 }
 0xf52   :  { %3615 = vmatmul.mubr.msk.bf16.vlgmr.msra.gmra.mxu0 %vm421_vm2, %v2286_v14  ;;  %3631 = vmatpush3.bf16.msra.mxu1 %v2444_v16 }
 0xf53   :  { %3625 = vmatpush3.bf16.msra.mxu0 %v2396_v17  ;;  %3626 = vmatprep.mubr.msk.bf16.mxu0 %vm4217_vm1, %v4216_v15 }
 0xf54   :  { %3636 = vmatprep.subr.bf16.mxu0 %v4216_v15  ;;  %3632 = vmatprep.mubr.msk.bf16.mxu1 %vm4217_vm1, %v4216_v15 }
 0xf55   :  { %3642 = vmatprep.subr.bf16.mxu1 %v4216_v15 }
 0xf5c   :  { %2630 = vrot.lane.b32.xlu0 %v4751_v56, %s4222_s0 }
 0xf92   :  { %v2237_v19 = vpop.xlane.xlu1 %2236 }
 0xf93   :  { %3853 = vrcp.f32 %v2237_v19 }
 0xf96   :  { %v2240_v54 = vpop.xlane.xlu0 %2239 }
 0xf97   :  { %3855 = vrcp.f32 %v2240_v54  ;;  %v3773_v54 = vld [vmem:[%s5017_s6 + $0x18] sm:$0xff]  }
 0xf9a   :  { %v2243_v58 = vpop.xlane.xlu1 %2242  ;;  %v2535_v41 = vpop.permute.xlu0 %2534 }
 0xf9b   :  { %3857 = vrcp.f32 %v2243_v58  ;;  %v2540_v42 = vsel %vm928_vm3, %v2535_v41, 0 }
 0xfa0   :  { %v3854_v20 = vpop.eup %3853 }
 0xfa1   :  { %v2258_v21 = vmul.f32 %v3854_v20, %v4837_v55  ;;  %v3774_v20 = vld [vmem:[%s5017_s6 + $0x10] sm:$0xff]  }
 0xfa2   :  { %v2249_v22 = vpop.xlane.xlu1 %2248 }
 0xfa3   :  { %3859 = vrcp.f32 %v2249_v22  ;;  %v2271_v23 = vsel %vm421_vm2, %v2258_v21, 0.0  ;;  %v2288_v24 = vpack.c.bf16 %v2258_v21, %v2258_v21 }
 0xfa4   :  { %v3856_v25 = vpop.eup %3855  ;;  %2280 = vst [vmem:[#allocation24 + $0x50] sm:$0xff] %v2271_v23 }
 0xfa5   :  { %3627 = vmatmul.mubr.msk.bf16.vlgmr.msra.gmra.mxu0 %vm421_vm2, %v2288_v24  ;;  %v2260_v56 = vmul.f32 %v3856_v25, %v4841_v49 }
 0xfa6   :  { %3637 = vmatpush3.bf16.msra.mxu0 %v2492_v44  ;;  %3638 = vmatprep.mubr.msk.bf16.mxu0 %vm4217_vm1, %v4216_v15  ;;  %v2583_v29 = vpop.permute.xlu1 %2582 }
 0xfa7   :  { %v2272_v40 = vsel %vm421_vm2, %v2260_v56, 0.0  ;;  %v2289_v46 = vpack.c.bf16 %v2260_v56, %v2260_v56  ;;  %3648 = vmatprep.subr.bf16.mxu0 %v4216_v15  ;;  %v2588_v47 = vsel %vm928_vm3, %v2583_v29, 0 }
 0xfa8   :  { %v3858_v37 = vpop.eup %3857  ;;  %2281 = vst [vmem:[#allocation24 + $0x58] sm:$0xff] %v2272_v40 }
 0xfa9   :  { %3633 = vmatmul.mubr.msk.bf16.vlgmr.msra.gmra.mxu1 %vm421_vm2, %v2289_v46  ;;  %v2262_v28 = vmul.f32 %v3858_v37, %v4846_v61 }
 0xfaa   :  { %3643 = vmatpush3.bf16.msra.mxu1 %v2540_v42  ;;  %3644 = vmatprep.mubr.msk.bf16.mxu1 %vm4217_vm1, %v4216_v15 }
 0xfab   :  { %v2273_v30 = vsel %vm421_vm2, %v2262_v28, 0.0  ;;  %v2290_v33 = vpack.c.bf16 %v2262_v28, %v2262_v28  ;;  %3654 = vmatprep.subr.bf16.mxu1 %v4216_v15 }
 0xfac   :  { %2282 = vst [vmem:[#allocation24 + $0x60] sm:$0xff] %v2273_v30 }
 0xfad   :  { %3639 = vmatmul.mubr.msk.bf16.vlgmr.msra.gmra.mxu0 %vm421_vm2, %v2290_v33 }
 0xfae   :  { %3649 = vmatpush3.bf16.msra.mxu0 %v2588_v47  ;;  %3650 = vmatprep.mubr.msk.bf16.mxu0 %vm4217_vm1, %v4216_v15 }
 0xfaf   :  { %3660 = vmatprep.subr.bf16.mxu0 %v4216_v15 }
 0xfb0   :  { %v3860_v34 = vpop.eup %3859 }
 0xfb1   :  { %v2266_v35 = vmul.f32 %v3860_v34, %v4851_v63 }
 0xfb3   :  { %v2275_v36 = vsel %vm421_vm2, %v2266_v35, 0.0  ;;  %v2292_v38 = vpack.c.bf16 %v2266_v35, %v2266_v35 }
 0xfb4   :  { %2284 = vst [vmem:[#allocation24 + $0x70] sm:$0xff] %v2275_v36 }
 0xfb5   :  { %3651 = vmatmul.mubr.msk.bf16.vlgmr.msra.gmra.mxu0 %vm421_vm2, %v2292_v38 }
 0xfb6   :  { %3664 = vmatprep.mubr.msk.bf16.mxu0 %vm4217_vm1, %v4216_v15  ;;  %3661 = vmatpush3.bf16.msra.mxu0 %v3773_v54  ;;  %v3293_v54 = vld [vmem:[#allocation14 + $0x1] ss:$0 sm:$0xff] }
 0xfb7   :  { %3662 = vmatprep.subr.bf16.mxu0 %v4216_v15 }
 0xfba   :  { %3663 = vmatpush3.bf16.msra.mxu0 %v3774_v20 }
 0xfbb   :  { %3676 = vmatprep.subr.bf16.mxu0 %v4216_v15 }
 0xfcb   :  { %v2246_v39 = vpop.xlane.xlu0 %2245 }
 0xfcc   :  { %3861 = vrcp.f32 %v2246_v39 }
 0xfcf   :  { %v2252_v55 = vpop.xlane.xlu0 %2251 }
 0xfd0   :  { %3863 = vrcp.f32 %v2252_v55 }
 0xfd3   :  { %v2631_v45 = vpop.permute.xlu0 %2630 }
 0xfd4   :  { %v2636_v59 = vsel %vm928_vm3, %v2631_v45, 0  ;;  %v3288_v45 = vld [vmem:[#allocation11 + $0x1] ss:$0 sm:$0xff] }
 0xfd9   :  { %v3862_v48 = vpop.eup %3861 }
 0xfda   :  { %v2264_v43 = vmul.f32 %v3862_v48, %v4861_v31 }
 0xfdc   :  { %v2274_v49 = vsel %vm421_vm2, %v2264_v43, 0.0  ;;  %v2291_v52 = vpack.c.bf16 %v2264_v43, %v2264_v43 }
 0xfdd   :  { %v3864_v53 = vpop.eup %3863  ;;  %2283 = vst [vmem:[#allocation24 + $0x68] sm:$0xff] %v2274_v49 }
 0xfde   :  { %3645 = vmatmul.mubr.msk.bf16.vlgmr.msra.gmra.mxu1 %vm421_vm2, %v2291_v52  ;;  %v2268_v61 = vmul.f32 %v3864_v53, %v4865_v5 }
 0xfdf   :  { %3655 = vmatpush3.bf16.msra.mxu1 %v2636_v59  ;;  %3656 = vmatprep.mubr.msk.bf16.mxu1 %vm4217_vm1, %v4216_v15 }
 0xfe0   :  { %v2276_v62 = vsel %vm421_vm2, %v2268_v61, 0.0  ;;  %3668 = vmatprep.subr.bf16.mxu1 %v4216_v15  ;;  %v2293_v63 = vpack.c.bf16 %v2268_v61, %v2268_v61 }
 0xfe1   :  { %2285 = vst [vmem:[#allocation24 + $0x78] sm:$0xff] %v2276_v62 }
 0xfe6   :  { %3657 = vmatmul.mubr.msk.bf16.vlgmr.msra.gmra.mxu1 %vm421_vm2, %v2293_v63 }
 0xfe7   :  { %3672 = vmatprep.mubr.msk.bf16.mxu1 %vm4217_vm1, %v4216_v15 }
0x1011   :  { %v2384_v0 = vpop.f32.mrf.mxu1 }
0x1012   :  { %v2336_v1 = vpop.f32.mrf.mxu0 }
0x1013   :  { %v3622_v2 = vpop.f32.mrf.mxu1 }
0x1014   :  { %v3616_v3 = vpop.f32.mrf.mxu0 }
0x1015   :  { %v2387_v50 = vpop.f32.mrf.mxu1 }
0x1016   :  { %v2339_v4 = vpop.f32.mrf.mxu0 }
0x1017   :  { %v3623_v60 = vpop.f32.mrf.mxu1 }
0x1018   :  { %v3617_v31 = vpop.f32.mrf.mxu0 }
0x1065   :  { %v2432_v6 = vpop.f32.mrf.mxu0 }
0x1067   :  { %v3628_v7 = vpop.f32.mrf.mxu0 }
0x1069   :  { %v2435_v51 = vpop.f32.mrf.mxu0  ;;  %v2480_v5 = vpop.f32.mrf.mxu1 }
0x106a   :  { %v3746_v57 = vpack.i.bf16 %v2480_v5, %v2432_v6 }
0x106b   :  { %v3629_v32 = vpop.f32.mrf.mxu0  ;;  %v3634_v8 = vpop.f32.mrf.mxu1 }
0x106c   :  { %3747 = vrot.lane.b32.xlu1 %v3746_v57, %s4209_s30  ;;  %v3776_v57 = vld [vmem:[%s5021_s10 + $0x10] sm:$0xff]  }
0x106d   :  { %v2483_v9 = vpop.f32.mrf.mxu1  ;;  %v2528_v10 = vpop.f32.mrf.mxu0 }
0x106f   :  { %v3635_v11 = vpop.f32.mrf.mxu1  ;;  %v3640_v12 = vpop.f32.mrf.mxu0 }
0x1071   :  { %v2531_v13 = vpop.f32.mrf.mxu0 }
0x1073   :  { %v3641_v14 = vpop.f32.mrf.mxu0 }
0x1075   :  { %v2624_v16 = vpop.f32.mrf.mxu0 }
0x1077   :  { %v3652_v17 = vpop.f32.mrf.mxu0 }
0x1079   :  { %v2627_v18 = vpop.f32.mrf.mxu0 }
0x107b   :  { %v3653_v19 = vpop.f32.mrf.mxu0 }
0x109e   :  { %v2576_v58 = vpop.f32.mrf.mxu1 }
0x109f   :  { %v3751_v21 = vpack.i.bf16 %v2576_v58, %v2528_v10 }
0x10a0   :  { %v3646_v22 = vpop.f32.mrf.mxu1 }
0x10a1   :  { %3752 = vrot.lane.b32.xlu0 %v3751_v21, %s4200_s27 }
0x10a2   :  { %v2579_v23 = vpop.f32.mrf.mxu1 }
0x10a3   :  { %v3777_v23 = vld [vmem:[%s5023_s12 + $0x38] sm:$0xff]  }
0x10a4   :  { %v3647_v24 = vpop.f32.mrf.mxu1 }
0x10a5   :  { %v3778_v24 = vld [vmem:[%s5023_s12 + $0x30] sm:$0xff]  }
0x10a6   :  { %v2672_v25 = vpop.f32.mrf.mxu1 }
0x10a7   :  { %v3756_v44 = vpack.i.bf16 %v2672_v25, %v2624_v16  ;;  %v3292_v16 = vld [vmem:[#allocation13 + $0x1] ss:$0 sm:$0xff]  ;;  %v3779_v25 = vld [vmem:[%s5023_s12 + $0x28] sm:$0xff]  }
0x10a8   :  { %v3658_v56 = vpop.f32.mrf.mxu1 }
0x10a9   :  { %3757 = vrot.lane.b32.xlu1 %v3756_v44, %s4223_s23  ;;  %v3780_v44 = vld [vmem:[%s5023_s12 + $0x20] sm:$0xff]   ;;  %v3298_v56 = vld [vmem:[#allocation16 + $0x1] ss:$0 sm:$0xff] }
0x10aa   :  { %v2675_v41 = vpop.f32.mrf.mxu1 }
0x10ac   :  { %v3659_v40 = vpop.f32.mrf.mxu1 }
0x10de   :  { %v3748_v46 = vpop.permute.xlu1 %3747 }
0x10df   :  { %v3750_v42 = vunpack.i.h.bf16 %v3748_v46  ;;  %v3749_v28 = vunpack.i.l.bf16 %v3748_v46 }
0x10e1   :  { %v2703_v47 = vsel %vm421_vm2, %v2384_v0, %v3750_v42  ;;  %v2702_v34 = vsel %vm421_vm2, %v2336_v1, %v3749_v28 }
0x1113   :  { %v3753_v37 = vpop.permute.xlu0 %3752 }
0x1114   :  { %v3755_v29 = vunpack.i.h.bf16 %v3753_v37  ;;  %v3754_v30 = vunpack.i.l.bf16 %v3753_v37 }
0x1116   :  { %v2705_v38 = vsel %vm1334_vm4, %v2703_v47, %v3755_v29  ;;  %v2704_v39 = vsel %vm1334_vm4, %v2702_v34, %v3754_v30 }
0x111b   :  { %v3758_v33 = vpop.permute.xlu1 %3757 }
0x111c   :  { %v3760_v35 = vunpack.i.h.bf16 %v3758_v33  ;;  %v3759_v36 = vunpack.i.l.bf16 %v3758_v33 }
0x111e   :  { %v2707_v55 = vsel %vm1337_vm5, %v2705_v38, %v3760_v35  ;;  %v2706_v48 = vsel %vm1337_vm5, %v2704_v39, %v3759_v36 }
0x111f   :  { %v2713_v43 = vpack.c.bf16 %v2707_v55, %v2706_v48 }
0x1121   :  { %3665 = vmatmul.mubr.msk.bf16.vlgmr.msra.gmra.mxu0 %vm244_vm0, %v2713_v43 }
0x1122   :  { %3684 = vmatprep.mubr.msk.bf16.mxu0 %vm4217_vm1, %v4216_v15  ;;  %3677 = vmatpush3.bf16.msra.mxu0 %v3777_v23 }
0x1123   :  { %3678 = vmatprep.subr.bf16.mxu0 %v4216_v15 }
0x1126   :  { %3679 = vmatpush3.bf16.msra.mxu0 %v3778_v24 }
0x1127   :  { %3680 = vmatprep.subr.bf16.mxu0 %v4216_v15 }
0x112a   :  { %3681 = vmatpush3.bf16.msra.mxu0 %v3779_v25 }
0x112b   :  { %3682 = vmatprep.subr.bf16.mxu0 %v4216_v15 }
0x112e   :  { %3683 = vmatpush3.bf16.msra.mxu0 %v3780_v44  ;;  %v3317_v44 = vld [vmem:[#allocation20 + $0x1] ss:$0 sm:$0xff] }
0x11e1   :  { %v2771_v49 = vpop.f32.mrf.mxu0 }
0x11e2   :  { %v2772_v52 = vadd.f32 %v3288_v45, %v2771_v49 }
0x11e3   :  { %v3666_v53 = vpop.f32.mrf.mxu0 }
0x11e4   :  { %v2778_v59 = vadd.f32 %v2772_v52, %v4711_v26 }
0x11e5   :  { %v2774_v61 = vpop.f32.mrf.mxu0 }
0x11e6   :  { %v2775_v62 = vadd.f32 %v3288_v45, %v2774_v61  ;;  %v2780_v63 = vsel %vm244_vm0, %v2778_v59, 0.0 }
0x11e7   :  { %2781 = vadd.xlane.f32.xlu0 %v2780_v63  ;;  %v3667_v0 = vpop.f32.mrf.mxu0  ;;  %v3310_v63 = vld [vmem:[#allocation17 + $0x1] ss:$0 sm:$0xff] }
0x11e8   :  { %v2779_v1 = vadd.f32 %v2775_v62, %v4713_v27  ;;  %v3775_v27 = vld [vmem:[%s5021_s10 + $0x18] sm:$0xff]  }
0x11e9   :  { %3669 = vmatpush3.bf16.msra.mxu1 %v3775_v27 }
0x11ea   :  { %v2783_v2 = vsel %vm244_vm0, %v2779_v1, 0.0  ;;  %3670 = vmatprep.subr.bf16.mxu1 %v4216_v15 }
0x11eb   :  { %2784 = vadd.xlane.f32.xlu1 %v2783_v2 }
0x11ed   :  { %3671 = vmatpush3.bf16.msra.mxu1 %v3776_v57 }
0x11ee   :  { %3688 = vmatprep.subr.bf16.mxu1 %v4216_v15 }
0x1270   :  { %v2782_v3 = vpop.xlane.xlu0 %2781 }
0x1271   :  { %v2786_v50 = vmul.f32 0.03125, %v2782_v3 }
0x1273   :  { %v2788_v4 = vsub.f32 %v2778_v59, %v2786_v50 }
0x1274   :  { %v2785_v60 = vpop.xlane.xlu1 %2784 }
0x1275   :  { %v2787_v31 = vmul.f32 0.03125, %v2785_v60  ;;  %v2790_v6 = vmul.f32 %v2788_v4, %v2788_v4 }
0x1277   :  { %v2789_v7 = vsub.f32 %v2779_v1, %v2787_v31  ;;  %v2792_v26 = vsel %vm244_vm0, %v2790_v6, 0.0 }
0x1278   :  { %2793 = vadd.xlane.f32.xlu0 %v2792_v26 }
0x1279   :  { %v2791_v51 = vmul.f32 %v2789_v7, %v2789_v7 }
0x127b   :  { %v2795_v5 = vsel %vm244_vm0, %v2791_v51, 0.0 }
0x127c   :  { %2796 = vadd.xlane.f32.xlu0 %v2795_v5 }
0x1301   :  { %v2794_v32 = vpop.xlane.xlu0 %2793 }
0x1302   :  { %v2798_v8 = vmul.f32 0.03125, %v2794_v32 }
0x1304   :  { %v2800_v9 = vadd.f32 1e-12, %v2798_v8 }
0x1305   :  { %v2797_v10 = vpop.xlane.xlu0 %2796 }
0x1306   :  { %3865 = vrsqrt.f32 %v2800_v9  ;;  %v2799_v11 = vmul.f32 0.03125, %v2797_v10 }
0x1308   :  { %v2801_v12 = vadd.f32 1e-12, %v2799_v11 }
0x130a   :  { %3867 = vrsqrt.f32 %v2801_v12  ;;  %v3781_v12 = vld [vmem:[%s5027_s16 + $0x8] sm:$0xff]  }
0x1313   :  { %v3866_v13 = vpop.eup %3865 }
0x1314   :  { %v2804_v14 = vmul.f32 %v3866_v13, %v2788_v4  ;;  %v3782_v13 = vld [vmem:[%s5027_s16] sm:$0xff]  }
0x1316   :  { %v2812_v19 = vmul.f32 %v3292_v16, %v2804_v14 }
0x1317   :  { %v3868_v17 = vpop.eup %3867 }
0x1318   :  { %v2805_v18 = vmul.f32 %v3868_v17, %v2789_v7  ;;  %v2820_v20 = vadd.f32 %v3293_v54, %v2812_v19 }
0x131a   :  { %v2813_v58 = vmul.f32 %v3292_v16, %v2805_v18 }
0x131c   :  { %v2821_v21 = vadd.f32 %v3293_v54, %v2813_v58 }
0x131e   :  { %v2827_v22 = vpack.c.bf16 %v2821_v21, %v2820_v20 }
0x1320   :  { %3673 = vmatmul.mubr.msk.bf16.vlgmr.msra.gmra.mxu1 %vm244_vm0, %v2827_v22  ;;  %v3316_v22 = vld [vmem:[#allocation19 + $0x1] ss:$0 sm:$0xff] }
0x1321   :  { %3692 = vmatprep.mubr.msk.bf16.mxu1 %vm4217_vm1, %v4216_v15  ;;  %3689 = vmatpush3.bf16.msra.mxu1 %v3781_v12 }
0x1322   :  { %3690 = vmatprep.subr.bf16.mxu1 %v4216_v15 }
0x1325   :  { %3691 = vmatpush3.bf16.msra.mxu1 %v3782_v13 }
0x1326   :  { %3696 = vmatprep.subr.bf16.mxu1 %v4216_v15 }
0x13e0   :  { %v2885_v41 = vpop.f32.mrf.mxu1 }
0x13e1   :  { %v2886_v40 = vadd.f32 %v3298_v56, %v2885_v41 }
0x13e2   :  { %v3674_v46 = vpop.f32.mrf.mxu1 }
0x13e3   :  { %v2894_v37 = vmul.f32 0.044715, %v2886_v40  ;;  %v2892_v49 = vmul.f32 0.5, %v2886_v40 }
0x13e4   :  { %v2888_v42 = vpop.f32.mrf.mxu1 }
0x13e5   :  { %v2896_v28 = vmul.f32 %v2894_v37, %v2886_v40  ;;  %v2889_v29 = vadd.f32 %v3298_v56, %v2888_v42  ;;  %v3783_v42 = vld [vmem:[%s5029_s18 + $0x8] sm:$0xff]  }
0x13e6   :  { %v3675_v30 = vpop.f32.mrf.mxu1 }
0x13e7   :  { %v2898_v33 = vmul.f32 %v2896_v28, %v2886_v40  ;;  %v2895_v47 = vmul.f32 0.044715, %v2889_v29  ;;  %v2893_v52 = vmul.f32 0.5, %v2889_v29  ;;  %v3784_v28 = vld [vmem:[%s5029_s18] sm:$0xff]  }
0x13e9   :  { %v2900_v34 = vadd.f32 %v2898_v33, %v2886_v40  ;;  %v2897_v35 = vmul.f32 %v2895_v47, %v2889_v29 }
0x13eb   :  { %v2902_v36 = vmul.f32 0.7978846, %v2900_v34  ;;  %v2899_v38 = vmul.f32 %v2897_v35, %v2889_v29 }
0x13ed   :  { %3869 = vtanh.f32 %v2902_v36  ;;  %v2901_v39 = vadd.f32 %v2899_v38, %v2889_v29  ;;  %v3318_v29 = vld [vmem:[#allocation22] ss:$0 sm:$0xff] }
0x13ef   :  { %v2903_v55 = vmul.f32 0.7978846, %v2901_v39 }
0x13f1   :  { %3871 = vtanh.f32 %v2903_v55 }
0x13fa   :  { %v3870_v48 = vpop.eup %3869 }
0x13fb   :  { %v2906_v43 = vadd.f32 1.0, %v3870_v48 }
0x13fd   :  { %v2908_v59 = vmul.f32 %v2906_v43, %v2892_v49 }
0x13fe   :  { %v3872_v45 = vpop.eup %3871 }
0x13ff   :  { %v2907_v53 = vadd.f32 1.0, %v3872_v45 }
0x1401   :  { %v2909_v61 = vmul.f32 %v2907_v53, %v2893_v52 }
0x1403   :  { %v2919_v62 = vpack.c.bf16 %v2909_v61, %v2908_v59 }
0x1405   :  { %3685 = vmatmul.mubr.msk.bf16.vlgmr.msra.gmra.mxu0 %vm1578_vm6, %v2919_v62 }
0x14c5   :  { %v2989_v0 = vpop.f32.mrf.mxu0 }
0x14c6   :  { %v2990_v1 = vadd.f32 %v3310_v63, %v2989_v0 }
0x14c7   :  { %v3686_v2 = vpop.f32.mrf.mxu0 }
0x14c8   :  { %v2996_v3 = vadd.f32 %v2990_v1, %v2820_v20 }
0x14c9   :  { %v2992_v50 = vpop.f32.mrf.mxu0 }
0x14ca   :  { %v2993_v4 = vadd.f32 %v3310_v63, %v2992_v50  ;;  %v2998_v60 = vsel %vm244_vm0, %v2996_v3, 0.0 }
0x14cb   :  { %2999 = vadd.xlane.f32.xlu1 %v2998_v60  ;;  %v3687_v31 = vpop.f32.mrf.mxu0 }
0x14cc   :  { %v2997_v6 = vadd.f32 %v2993_v4, %v2821_v21 }
0x14ce   :  { %v3001_v7 = vsel %vm244_vm0, %v2997_v6, 0.0 }
0x14cf   :  { %3002 = vadd.xlane.f32.xlu0 %v3001_v7 }
0x1554   :  { %v3000_v26 = vpop.xlane.xlu1 %2999 }
0x1555   :  { %v3004_v51 = vmul.f32 0.03125, %v3000_v26 }
0x1557   :  { %v3006_v5 = vsub.f32 %v2996_v3, %v3004_v51 }
0x1558   :  { %v3003_v27 = vpop.xlane.xlu0 %3002 }
0x1559   :  { %v3005_v57 = vmul.f32 0.03125, %v3003_v27  ;;  %v3008_v32 = vmul.f32 %v3006_v5, %v3006_v5 }
0x155b   :  { %v3007_v8 = vsub.f32 %v2997_v6, %v3005_v57  ;;  %v3010_v9 = vsel %vm244_vm0, %v3008_v32, 0.0 }
0x155c   :  { %3011 = vadd.xlane.f32.xlu1 %v3010_v9 }
0x155d   :  { %v3009_v10 = vmul.f32 %v3007_v8, %v3007_v8 }
0x155f   :  { %v3013_v11 = vsel %vm244_vm0, %v3009_v10, 0.0 }
0x1560   :  { %3014 = vadd.xlane.f32.xlu0 %v3013_v11 }
0x15e5   :  { %v3012_v14 = vpop.xlane.xlu1 %3011 }
0x15e6   :  { %v3016_v16 = vmul.f32 0.03125, %v3012_v14 }
0x15e8   :  { %v3018_v17 = vadd.f32 1e-12, %v3016_v16 }
0x15e9   :  { %v3015_v18 = vpop.xlane.xlu0 %3014 }
0x15ea   :  { %3873 = vrsqrt.f32 %v3018_v17  ;;  %v3017_v19 = vmul.f32 0.03125, %v3015_v18 }
0x15ec   :  { %v3019_v54 = vadd.f32 1e-12, %v3017_v19 }
0x15ee   :  { %3875 = vrsqrt.f32 %v3019_v54 }
0x15f7   :  { %v3874_v58 = vpop.eup %3873 }
0x15f8   :  { %v3022_v20 = vmul.f32 %v3874_v58, %v3006_v5 }
0x15fa   :  { %v3030_v24 = vmul.f32 %v3316_v22, %v3022_v20 }
0x15fb   :  { %v3876_v21 = vpop.eup %3875 }
0x15fc   :  { %v3023_v23 = vmul.f32 %v3876_v21, %v3007_v8  ;;  %v3038_v41 = vadd.f32 %v3317_v44, %v3030_v24 }
0x15fe   :  { %v3031_v25 = vmul.f32 %v3316_v22, %v3023_v23 }
0x1600   :  { %v3039_v56 = vadd.f32 %v3317_v44, %v3031_v25 }
0x1602   :  { %v3041_v40 = vrot.slane %v3039_v56, 7 }
0x1604   :  { %v3044_v46 = vsel %vm3043_vm7, %v3038_v41, %v3041_v40 }
0x1605   :  { %v3049_v37 = vpack.c.bf16 %v3044_v46, %v3044_v46 }
0x1607   :  { %3693 = vmatmul.mubr.msk.bf16.vlgmr.msra.gmra.mxu1 %vm244_vm0, %v3049_v37 }
0x1608   :  { %3700 = vmatprep.mubr.msk.bf16.mxu1 %vm4217_vm1, %v4216_v15  ;;  %3697 = vmatpush3.bf16.msra.mxu1 %v3783_v42 }
0x1609   :  { %3698 = vmatprep.subr.bf16.mxu1 %v4216_v15 }
0x160c   :  { %3699 = vmatpush3.bf16.msra.mxu1 %v3784_v28 }
0x16c7   :  { %v3106_v30 = vpop.f32.mrf.mxu1 }
0x16c8   :  { %v3107_v33 = vadd.f32 %v3318_v29, %v3106_v30 }
0x16c9   :  { %v3694_v47 = vpop.f32.mrf.mxu1 }
0x16ca   :  { %3877 = vtanh.f32 %v3107_v33 }
0x16cb   :  { %v3109_v34 = vpop.f32.mrf.mxu1 }
0x16cd   :  { %v3695_v35 = vpop.f32.mrf.mxu1 }
0x16d7   :  { %v3878_v36 = vpop.eup %3877 }
0x16d8   :  { %v3117_v38 = vpack.c.bf16 %v3878_v36, %v3878_v36 }
0x16da   :  { %3701 = vmatmul.mubr.msk.bf16.vlgmr.msra.gmra.mxu1 %vm244_vm0, %v3117_v38 }
0x16db   :  { %4152 = shalt.err (!%p4149_p13)
}
0x16dc   :  { %3202 = dma.vmem_to_hbm [thread:$0]  %s3197_s3, 2048, %s5032_s21, [#allocation25], %s4208_s5, %s4208_s5, %s4209_s30  }
0x16dd   :  { %v3322_v15 = vld [vmem:[%s5030_s19] ss:$0 sm:$0xff]  ;;  %s4225_s27 = smov [#allocation23]  }
0x16de   :  { %s3187_s29 = sshll.u32 %s4225_s27, 4  ;;  %s3188_s29 = int_to_ptr.vmem [resolvable:$true] %s3187_s29 }
0x16df   :  { %s4161_s0 = scalar_lea.vmem %s3188_s29, 32  ;;  %p4166_p1 = scmp.lt.s32.totalorder %s3188_s29, %s3188_s29 }
0x16e0   :  { %p4162_p0 = scmp.ne.s32.totalorder %s3188_s29, %s4161_s0  ;;  %p4167_p2 = scmp.lt.s32.totalorder %s4161_s0, %s4161_s0 }
0x16e2   :  { %p4168_p3 = por %p4167_p2, %p4166_p1 }
0x16e4   :  { %p4169_p4 = pnand %p4168_p3, %p4162_p0 }
0x179a   :  { %v3174_v39 = vpop.f32.mrf.mxu1 }
0x179b   :  { %v3175_v55 = vadd.f32 %v3322_v15, %v3174_v39 }
0x179c   :  { %v3702_v48 = vpop.f32.mrf.mxu1 }
0x179d   :  { %3180 = vst [vmem:[#allocation23] sm:$0x3] %v3175_v55 }
0x179e   :  { %v3177_v43 = vpop.f32.mrf.mxu1 }
0x179f   :  { %4172 = shalt.err (!%p4169_p4)
}
0x17a0   :  { %3190 = dma.vmem_to_hbm [thread:$0]  %s3188_s29, 32, %s5031_s20, [#allocation4]   ;;  %v3703_v45 = vpop.f32.mrf.mxu1 }
0x17a1   :  { %4195 = dma.done.wait [#allocation4], 32  }
0x17a2   :  { %4196 = vsyncadd [#allocation4], 4294967264 }
0x17a3   :  { %4197 = dma.done.wait [#allocation25], 2048  }
0x17a4   :  { %4198 = vsyncadd [#allocation25], 4294965248 }
0x17a5   :  { %3209 = vsyncpa [#allocation3], 1 }
0x17a6   :  { %3210 = vsyncpa [#allocation6], 1 }
0x17a7   :  { %3211 = vsyncpa [#allocation9], 1 }
0x17a8   :  { %3212 = vsyncpa [#allocation12], 1 }
0x17a9   :  { %3213 = vsyncpa [#allocation15], 1 }
0x17aa   :  { %3214 = vsyncpa [#allocation18], 1 }
0x17ab   :  { %3215 = vsyncpa [#allocation21], 1 }
0x17ac   :  { %3216 = vsyncpa [#allocation4], 1 }
0x17ad   :  { %3217 = vsyncpa [#allocation25], 1 }

</bundles_post_ra>
